<compile_context>
chip_gen: v6e
topology: v6e:2x2x1
jax: 0.10.0
libtpu: 0.0.40
codegen_flags: <defaults>
</compile_context>

<pallas_src>
import math

import jax
import jax.numpy as jnp
from jax.experimental import pallas as pl
from jax.experimental.pallas import tpu as pltpu


# TODO(synk): image_encoder (CLIP ViT/ResNet) and text_encoder (tokenizer + CLIP
# text transformer) have no self-contained Pallas equivalent; their outputs are
# taken as precomputed `image_features` / `text_features` inputs.


def _round_up(x, m):
    return ((x + m - 1) // m) * m


def _tpu_vmem_capacity_bytes():
    """Physical VMEM per TensorCore; conservative fallback if query fails."""
    try:
        return int(pltpu.get_tpu_info().vmem_capacity_bytes)
    except Exception:
        return 128 * 1024 * 1024  # v5e / v6e


def _pick_block_rows(n, d, hidden, tn, single_col_tile, itemsize,
                     vmem_budget_bytes, min_grid_steps):
    """Largest batch-row tile fitting the budget (honest f32 accounting)."""
    # Resident operands: W1^T + W2^T single-buffered; text block single- or
    # double-buffered depending on whether the class dim is tiled.
    fixed = 2 * d * hidden * itemsize
    fixed += (1 if single_col_tile else 2) * d * tn * itemsize
    per_row = (
        2 * d * itemsize              # x tile, double-buffered (compute dtype)
        + 2 * tn * 4                  # f32 logits tile, double-buffered
        + d * itemsize                # normalized-feature scratch
        + (3 * d + hidden + tn) * 4   # peak f32 temps: x_f32 / a / f (+ h, logits)
    )
    avail = max(vmem_budget_bytes - fixed, 2 * 1024 * 1024)
    bm = int(avail // per_row)
    bm = max(16, min(bm - bm % 16, 2048))
    bm = min(bm, _round_up(n, 16))
    if min_grid_steps > 1 and n > 16 and pl.cdiv(n, bm) < min_grid_steps:
        # Multi-TensorCore chip: keep >= min_grid_steps row tiles so both cores work.
        bm = max(16, _round_up(pl.cdiv(n, min_grid_steps), 16))
    return bm


def _clip_head_kernel(scalars_ref, x_ref, w1t_ref, w2t_ref, t_ref, o_ref, f_ref):
    j = pl.program_id(1)   # class-tile index

    @pl.when(j == 0)
    def _():
        alpha = scalars_ref[0]            # f32 scalar in SMEM
        one_minus_alpha = scalars_ref[1]  # f32 scalar in SMEM
        x = x_ref[...]
        # Adapter: ReLU(x @ W1^T) -> ReLU(h @ W2^T); weights pre-transposed in the
        # wrapper, so both contractions are plain row-major MXU feeds.
        h = jnp.dot(x, w1t_ref[...], preferred_element_type=jnp.float32)
        h = jnp.maximum(h, 0.0)                                   # ReLU #1 (f32)
        a = jnp.dot(h.astype(w2t_ref.dtype), w2t_ref[...],
                    preferred_element_type=jnp.float32)
        a = jnp.maximum(a, 0.0)                                   # ReLU #2 (f32)
        # Residual blend + row-wise L2 normalization, all in f32.
        f = alpha * a + one_minus_alpha * x.astype(jnp.float32)
        sumsq = jnp.sum(f * f, axis=-1, keepdims=True)
        f = f * jax.lax.rsqrt(jnp.maximum(sumsq, 1e-30))          # pad rows stay finite
        f_ref[...] = f.astype(f_ref.dtype)

    # logits tile: f @ t_block.  exp(logit_scale) is pre-folded into t_block.
    o_ref[...] = jnp.dot(f_ref[...], t_ref[...],
                         preferred_element_type=jnp.float32).astype(o_ref.dtype)


def custom_clip_head(image_features, w1, w2, text_features, alpha, logit_scale, *,
                     compute_dtype=jnp.bfloat16, block_rows=None,
                     vmem_limit_bytes=None):
    """CustomCLIP.forward past the encoders.

    image_features: (N, D)     precomputed clip_model.visual output
    w1:             (D//4, D)  nn.Linear(D, D//4, bias=False).weight (PyTorch layout)
    w2:             (D, D//4)  nn.Linear(D//4, D, bias=False).weight (PyTorch layout)
    text_features:  (C, D)     precomputed text encoder output
    alpha:          cfg.TRAINER.CLIPADAPTER.ALPHA
    logit_scale:    raw learned logit_scale (exp() applied here, as in the module)
    Returns logits (N, C) in float32.
    """
    n, d = image_features.shape
    hidden = w1.shape[0]
    c = text_features.shape[0]
    assert w1.shape == (hidden, d) and w2.shape == (d, hidden)
    assert text_features.shape == (c, d)

    itemsize = jnp.dtype(compute_dtype).itemsize

    # ---- generation-aware budgets ------------------------------------------
    vmem_cap = _tpu_vmem_capacity_bytes()
    small_vmem = vmem_cap <= 80 * 1024 * 1024   # v7x-like: 64 MiB / TC, 2 TCs / chip
    if small_vmem:
        budget, limit = 36 * 1024 * 1024, 48 * 1024 * 1024
        min_grid_steps = 2            # keep both TensorCores fed
        max_tn = 512                  # tile the class dim earlier under 64 MiB
    else:
        budget, limit = 88 * 1024 * 1024, 104 * 1024 * 1024
        min_grid_steps = 1            # single TC: one big row tile, no step overhead
        max_tn = 2048
    if vmem_limit_bytes is None:
        vmem_limit_bytes = limit

    # ---- class-dim: lane-dense (multiple of 128), tiled when large ----------
    c_pad = _round_up(c, 128)
    if c_pad <= max_tn:
        tn = c_pad
    else:
        tn = max_tn
        c_pad = _round_up(c, tn)
    single_col_tile = (c_pad == tn)

    # ---- one-time operand prep in plain XLA (grid-invariant, tiny) ----------
    # Normalize text features in f32 *before* casting (no double rounding),
    # fold exp(logit_scale) in, transpose to (D, C), pad C to a lane multiple.
    t32 = text_features.astype(jnp.float32)
    t32 = t32 / jnp.linalg.norm(t32, axis=-1, keepdims=True)
    t32 = jnp.exp(jnp.asarray(logit_scale, jnp.float32)) * t32
    t_mat = t32.T.astype(compute_dtype)                            # (D, C)
    if c_pad != c:
        t_mat = jnp.pad(t_mat, ((0, 0), (0, c_pad - c)))

    w1t = w1.astype(compute_dtype).T                               # (D, hidden)
    w2t = w2.astype(compute_dtype).T                               # (hidden, D)
    x = image_features.astype(compute_dtype)

    if block_rows is None:
        block_rows = _pick_block_rows(n, d, hidden, tn, single_col_tile,
                                      itemsize, budget, min_grid_steps)
    bm = max(16, (block_rows // 16) * 16)

    # Pad ragged batch to a multiple of the row tile; padded rows sliced off.
    n_pad = _round_up(n, bm)
    if n_pad != n:
        x = jnp.pad(x, ((0, n_pad - n), (0, 0)))

    scalars = jnp.stack([jnp.asarray(alpha, jnp.float32),
                         1.0 - jnp.asarray(alpha, jnp.float32)])

    grid = (n_pad // bm, c_pad // tn)

    resident = pl.Buffered(1)          # grid-invariant: no wasted double buffer
    t_pipeline = resident if single_col_tile else None

    cost = pl.CostEstimate(
        flops=2 * n_pad * d * (2 * hidden + c_pad),
        transcendentals=n_pad,
        bytes_accessed=(n_pad * d * itemsize
                        + (2 * d * hidden + c_pad * d) * itemsize
                        + n_pad * c_pad * 4),
    )

    logits = pl.pallas_call(
        _clip_head_kernel,
        out_shape=jax.ShapeDtypeStruct((n_pad, c_pad), jnp.float32),
        grid=grid,
        in_specs=[
            # alpha, (1 - alpha) as f32 scalars in SMEM
            pl.BlockSpec(memory_space=pltpu.MemorySpace.SMEM),
            # image-feature rows, tiled over the batch (constant in j -> no re-fetch)
            pl.BlockSpec((bm, d), lambda i, j: (i, 0)),
            # grid-invariant operands (constant index_map -> resident, single-buffered)
            pl.BlockSpec((d, hidden), lambda i, j: (0, 0), pipeline_mode=resident),  # W1^T
            pl.BlockSpec((hidden, d), lambda i, j: (0, 0), pipeline_mode=resident),  # W2^T
            # scaled, normalized text features (D, C); tiled over classes if large
            pl.BlockSpec((d, tn), lambda i, j: (0, j), pipeline_mode=t_pipeline),
        ],
        out_specs=pl.BlockSpec((bm, tn), lambda i, j: (i, j)),
        scratch_shapes=[pltpu.VMEM((bm, d), compute_dtype)],   # normalized image features
        compiler_params=pltpu.CompilerParams(
            dimension_semantics=("parallel", "arbitrary"),
            vmem_limit_bytes=vmem_limit_bytes,
        ),
        cost_estimate=cost,
    )(scalars, x, w1t, w2t, t_mat)
    return logits[:n, :c]


if __name__ == "__main__":
    # Small but lane-dense shapes consistent with CLIP: D=512 (ViT-B/32 output
    # dim), hidden = D//4 = 128, 128 classes, batch 256.
    N, D, REDUCTION, C = 256, 512, 4, 128
    HIDDEN = D // REDUCTION
    ALPHA = 0.2                                      # cfg.TRAINER.CLIPADAPTER.ALPHA
    logit_scale = jnp.float32(math.log(1.0 / 0.07))  # CLIP's learned logit_scale (pre-exp)

    key = jax.random.PRNGKey(0)
    kx, k1, k2, kt = jax.random.split(key, 4)
    img = jax.random.normal(kx, (N, D), dtype=jnp.float32)          # "image_encoder" output
    txt = jax.random.normal(kt, (C, D), dtype=jnp.float32)          # "text_encoder" output
    w1 = jax.random.normal(k1, (HIDDEN, D), jnp.float32) * (1.0 / D) ** 0.5
    w2 = jax.random.normal(k2, (D, HIDDEN), jnp.float32) * (1.0 / HIDDEN) ** 0.5

    logits = custom_clip_head(img, w1, w2, txt, ALPHA, logit_scale)
    logits = jax.block_until_ready(logits)

    # Pure-JAX f32 reference (same math as CustomCLIP.forward past the encoders).
    h_ref = jnp.maximum(img @ w1.T, 0.0)
    a_ref = jnp.maximum(h_ref @ w2.T, 0.0)
    f_ref = ALPHA * a_ref + (1.0 - ALPHA) * img
    f_ref = f_ref / jnp.linalg.norm(f_ref, axis=-1, keepdims=True)
    t_ref = txt / jnp.linalg.norm(txt, axis=-1, keepdims=True)
    ref = jnp.exp(logit_scale) * (f_ref @ t_ref.T)

    assert logits.shape == (N, C)
    assert bool(jnp.isfinite(logits).all())
    # bf16 input/weight quantization (f32 accumulation) -> ~0.5-1% relative error.
    rel = float(jnp.linalg.norm(logits - ref) / (jnp.linalg.norm(ref) + 1e-12))
    assert rel < 5e-2, f"relative error too large: {rel}"

    print("KERNEL_OK")
</pallas_src>

<mosaic_0001>
module attributes {stable_mosaic.version = 11 : i64} {
  func.func @_clip_head_kernel(%arg0: i32, %arg1: i32, %arg2: memref<2xf32, #tpu.memory_space<smem>>, %arg3: memref<256x512xbf16, #tpu.memory_space<vmem>>, %arg4: memref<512x128xbf16, #tpu.memory_space<vmem>>, %arg5: memref<128x512xbf16, #tpu.memory_space<vmem>>, %arg6: memref<512x128xbf16, #tpu.memory_space<vmem>>, %arg7: memref<256x128xf32, #tpu.memory_space<vmem>>, %arg8: memref<256x512xbf16, #tpu.memory_space<vmem>>) attributes {dimension_semantics = [#tpu.dimension_semantics<parallel>, #tpu.dimension_semantics<arbitrary>], iteration_bounds = array<i64: 1, 1>, scalar_prefetch = 0 : i64, scratch_operands = 1 : i64, tpu.core_type = #tpu.core_type<tc>, window_params = [{transform_indices = @transform_0, window_bounds = array<i64: 2>}, {transform_indices = @transform_1, window_bounds = array<i64: 256, 512>}, {pipeline_mode = #tpu.pipeline_mode<synchronous>, transform_indices = @transform_2, window_bounds = array<i64: 512, 128>}, {pipeline_mode = #tpu.pipeline_mode<synchronous>, transform_indices = @transform_3, window_bounds = array<i64: 128, 512>}, {pipeline_mode = #tpu.pipeline_mode<synchronous>, transform_indices = @transform_4, window_bounds = array<i64: 512, 128>}, {transform_indices = @transform_5, window_bounds = array<i64: 256, 128>}]} {
    %c0_i32 = arith.constant 0 : i32
    %0 = arith.cmpi eq, %arg1, %c0_i32 : i32
    %1 = arith.extui %0 : i1 to i32
    %c0_i32_0 = arith.constant 0 : i32
    %2 = arith.cmpi ne, %1, %c0_i32_0 : i32
    scf.if %2 {
      %c0_6 = arith.constant 0 : index
      %7 = memref.load %arg2[%c0_6] : memref<2xf32, #tpu.memory_space<smem>>
      %c1 = arith.constant 1 : index
      %8 = memref.load %arg2[%c1] : memref<2xf32, #tpu.memory_space<smem>>
      %c0_7 = arith.constant 0 : index
      %c0_8 = arith.constant 0 : index
      %9 = vector.load %arg3[%c0_7, %c0_8] : memref<256x512xbf16, #tpu.memory_space<vmem>>, vector<256x512xbf16>
      %c0_9 = arith.constant 0 : index
      %c0_10 = arith.constant 0 : index
      %10 = vector.load %arg4[%c0_9, %c0_10] : memref<512x128xbf16, #tpu.memory_space<vmem>>, vector<512x128xbf16>
      %cst_11 = arith.constant dense<0.000000e+00> : vector<256x128xf32>
      %11 = tpu.matmul %9, %10, %cst_11 {dimension_numbers = #tpu.dot_dimension_numbers<[1], [0], [0], [1], [0, 0, 1, 1], [], []>} : vector<256x512xbf16>, vector<512x128xbf16>, vector<256x128xf32> -> vector<256x128xf32>
      %cst_12 = arith.constant 0.000000e+00 : f32
      %12 = vector.broadcast %cst_12 : f32 to vector<256x128xf32>
      %13 = arith.maximumf %11, %12 : vector<256x128xf32>
      %14 = arith.truncf %13 : vector<256x128xf32> to vector<256x128xbf16>
      %c0_13 = arith.constant 0 : index
      %c0_14 = arith.constant 0 : index
      %15 = vector.load %arg5[%c0_13, %c0_14] : memref<128x512xbf16, #tpu.memory_space<vmem>>, vector<128x512xbf16>
      %cst_15 = arith.constant dense<0.000000e+00> : vector<256x512xf32>
      %16 = tpu.matmul %14, %15, %cst_15 {dimension_numbers = #tpu.dot_dimension_numbers<[1], [0], [0], [1], [0, 0, 1, 1], [], []>} : vector<256x128xbf16>, vector<128x512xbf16>, vector<256x512xf32> -> vector<256x512xf32>
      %cst_16 = arith.constant 0.000000e+00 : f32
      %17 = vector.broadcast %cst_16 : f32 to vector<256x512xf32>
      %18 = arith.maximumf %16, %17 : vector<256x512xf32>
      %19 = vector.broadcast %7 : f32 to vector<256x512xf32>
      %20 = arith.mulf %19, %18 : vector<256x512xf32>
      %21 = arith.extf %9 : vector<256x512xbf16> to vector<256x512xf32>
      %22 = vector.broadcast %8 : f32 to vector<256x512xf32>
      %23 = arith.mulf %22, %21 : vector<256x512xf32>
      %24 = arith.addf %20, %23 : vector<256x512xf32>
      %25 = arith.mulf %24, %24 : vector<256x512xf32>
      %cst_17 = arith.constant dense<0.000000e+00> : vector<256xf32>
      %26 = vector.multi_reduction <add>, %25, %cst_17 [1] : vector<256x512xf32> to vector<256xf32>
      %27 = vector.shape_cast %26 : vector<256xf32> to vector<256x1xf32>
      %cst_18 = arith.constant 1.000000e-30 : f32
      %28 = vector.broadcast %cst_18 : f32 to vector<256x1xf32>
      %29 = arith.maximumf %27, %28 : vector<256x1xf32>
      %30 = math.rsqrt %29 : vector<256x1xf32>
      %31 = vector.broadcast %30 : vector<256x1xf32> to vector<256x512xf32>
      %32 = arith.mulf %24, %31 : vector<256x512xf32>
      %33 = arith.truncf %32 : vector<256x512xf32> to vector<256x512xbf16>
      %c0_19 = arith.constant 0 : index
      %c0_20 = arith.constant 0 : index
      %34 = vector.load %arg8[%c0_19, %c0_20] : memref<256x512xbf16, #tpu.memory_space<vmem>>, vector<256x512xbf16>
      tpu.vector_store %arg8[%c0_19, %c0_20], %33 {strides = array<i32>} : memref<256x512xbf16, #tpu.memory_space<vmem>>, vector<256x512xbf16>,
    } else {
    }
    %c0 = arith.constant 0 : index
    %c0_1 = arith.constant 0 : index
    %3 = vector.load %arg8[%c0, %c0_1] : memref<256x512xbf16, #tpu.memory_space<vmem>>, vector<256x512xbf16>
    %c0_2 = arith.constant 0 : index
    %c0_3 = arith.constant 0 : index
    %4 = vector.load %arg6[%c0_2, %c0_3] : memref<512x128xbf16, #tpu.memory_space<vmem>>, vector<512x128xbf16>
    %cst = arith.constant dense<0.000000e+00> : vector<256x128xf32>
    %5 = tpu.matmul %3, %4, %cst {dimension_numbers = #tpu.dot_dimension_numbers<[1], [0], [0], [1], [0, 0, 1, 1], [], []>} : vector<256x512xbf16>, vector<512x128xbf16>, vector<256x128xf32> -> vector<256x128xf32>
    %c0_4 = arith.constant 0 : index
    %c0_5 = arith.constant 0 : index
    %6 = vector.load %arg7[%c0_4, %c0_5] : memref<256x128xf32, #tpu.memory_space<vmem>>, vector<256x128xf32>
    tpu.vector_store %arg7[%c0_4, %c0_5], %5 {strides = array<i32>} : memref<256x128xf32, #tpu.memory_space<vmem>>, vector<256x128xf32>,
    return
  }
  func.func @transform_0(%arg0: i32, %arg1: i32) -> i32 {
    %c0_i32 = arith.constant 0 : i32
    %c0_i32_0 = arith.constant 0 : i32
    return %c0_i32 : i32
  }
  func.func @transform_1(%arg0: i32, %arg1: i32) -> (i32, i32) {
    %c0_i32 = arith.constant 0 : i32
    %c0_i32_0 = arith.constant 0 : i32
    return %arg0, %c0_i32 : i32, i32
  }
  func.func @transform_2(%arg0: i32, %arg1: i32) -> (i32, i32) {
    %c0_i32 = arith.constant 0 : i32
    %c0_i32_0 = arith.constant 0 : i32
    %c0_i32_1 = arith.constant 0 : i32
    return %c0_i32, %c0_i32_0 : i32, i32
  }
  func.func @transform_3(%arg0: i32, %arg1: i32) -> (i32, i32) {
    %c0_i32 = arith.constant 0 : i32
    %c0_i32_0 = arith.constant 0 : i32
    %c0_i32_1 = arith.constant 0 : i32
    return %c0_i32, %c0_i32_0 : i32, i32
  }
  func.func @transform_4(%arg0: i32, %arg1: i32) -> (i32, i32) {
    %c0_i32 = arith.constant 0 : i32
    %c0_i32_0 = arith.constant 0 : i32
    return %c0_i32, %arg1 : i32, i32
  }
  func.func @transform_5(%arg0: i32, %arg1: i32) -> (i32, i32) {
    %c0_i32 = arith.constant 0 : i32
    return %arg0, %arg1 : i32, i32
  }
}

</mosaic_0001>

<bundles_post_ra>
// kernel: tpu_custom_call.1
= control target key start
LH: loop header
LB: loop body
LE: loop exit
PB: predicated region body
PF: predicated region fallthrough
CT: control target
= control target key end

     0   :  { %10 = vsyncpa [#allocation6], 0  ;;  %s7130_s0 = inlined_call_operand.hbm [shape: f32[2], index: 0, kind: input, shape index: {}]   ;;  %s7131_s1 = inlined_call_operand.hbm [shape: bf16[256,512], index: 1, kind: input, shape index: {}]   ;;  %s7132_s2 = inlined_call_operand.hbm [shape: bf16[512,128], index: 2, kind: input, shape index: {}]   ;;  %s7133_s3 = inlined_call_operand.hbm [shape: bf16[128,512], index: 3, kind: input, shape index: {}]   ;;  %s7134_s4 = inlined_call_operand.hbm [shape: bf16[512,128], index: 4, kind: input, shape index: {}]   ;;  %s7135_s5 = inlined_call_operand.hbm [shape: f32[256,128], index: 5, kind: output, shape index: {}]  }
   0x1   :  { %11 = vsyncpa [#allocation4], 0 }
   0x2   :  { %12 = vsyncpa [#allocation9], 0 }
   0x3   :  { %13 = vsyncpa [#allocation12], 0 }
   0x4   :  { %14 = vsyncpa [#allocation5], 0  ;;  %s5567_s18 = smov [#allocation8]  }
   0x5   :  { %s40_s19 = sshll.u32 %s5567_s18, 4  ;;  %s41_s19 = int_to_ptr.vmem [resolvable:$true] %s40_s19 }
   0x6   :  { %s5457_s20 = scalar_lea.vmem %s41_s19, 4096  ;;  %p5462_p1 = scmp.lt.s32.totalorder %s41_s19, %s41_s19 }
   0x7   :  { %p5458_p0 = scmp.ne.s32.totalorder %s41_s19, %s5457_s20  ;;  %p5463_p2 = scmp.lt.s32.totalorder %s5457_s20, %s5457_s20 }
   0x9   :  { %p5464_p3 = por %p5463_p2, %p5462_p1 }
   0xb   :  { %p5465_p4 = pnand %p5464_p3, %p5458_p0 }
   0xd   :  { %5468 = shalt.err (!%p5465_p4)
}
   0xe   :  { %s5568_s21 = smov 64   ;;  %s5569_s22 = smov 4  }
   0xf   :  { %46 = dma.hbm_to_vmem [thread:$0]  %s7132_s2, 4096, %s41_s19, [#allocation9], %s5568_s21, %s5568_s21, %s5569_s22  }
  0x10   :  { %s5570_s25 = smov [#allocation3]   ;;  %s5571_s28 = smov [#allocation7]  }
  0x11   :  { %22 = dma.hbm_to_smem %s7130_s0, 16, %s5570_s25, [#allocation6]  }
  0x12   :  { %s28_s29 = sshll.u32 %s5571_s28, 4  ;;  %s29_s29 = int_to_ptr.vmem [resolvable:$true] %s28_s29 }
  0x13   :  { %s5485_s30 = scalar_lea.vmem %s29_s29, 8192  ;;  %p5490_p6 = scmp.lt.s32.totalorder %s29_s29, %s29_s29 }
  0x14   :  { %p5486_p5 = scmp.ne.s32.totalorder %s29_s29, %s5485_s30  ;;  %p5491_p7 = scmp.lt.s32.totalorder %s5485_s30, %s5485_s30 }
  0x16   :  { %p5492_p8 = por %p5491_p7, %p5490_p6 }
  0x18   :  { %p5493_p9 = pnand %p5492_p8, %p5486_p5 }
  0x1a   :  { %5496 = shalt.err (!%p5493_p9)
}
  0x1b   :  { %s5572_s6 = smov 256   ;;  %s5573_s7 = smov 16  }
  0x1c   :  { %34 = dma.hbm_to_vmem [thread:$0]  %s7131_s1, 8192, %s29_s29, [#allocation4], %s5572_s6, %s5572_s6, %s5573_s7  }
  0x1d   :  { %s5574_s2 = smov [#allocation10]   ;;  %s5575_s0 = smov [#allocation11]  }
  0x1e   :  { %s52_s10 = sshll.u32 %s5574_s2, 4  ;;  %s64_s11 = sshll.u32 %s5575_s0, 4  ;;  %s53_s10 = int_to_ptr.vmem [resolvable:$true] %s52_s10  ;;  %s65_s11 = int_to_ptr.vmem [resolvable:$true] %s64_s11 }
  0x1f   :  { %s5505_s12 = scalar_lea.vmem %s53_s10, 4096  ;;  %p5510_p11 = scmp.lt.s32.totalorder %s53_s10, %s53_s10 }
  0x20   :  { %p5506_p10 = scmp.ne.s32.totalorder %s53_s10, %s5505_s12  ;;  %p5511_p12 = scmp.lt.s32.totalorder %s5505_s12, %s5505_s12 }
  0x22   :  { %p5512_p13 = por %p5511_p12, %p5510_p11 }
  0x24   :  { %p5513_p0 = pnand %p5512_p13, %p5506_p10 }
  0x26   :  { %5516 = shalt.err (!%p5513_p0)
}
  0x27   :  { %58 = dma.hbm_to_vmem [thread:$0]  %s7133_s3, 4096, %s53_s10, [#allocation9], %s5572_s6, %s5572_s6, %s5573_s7  }
  0x28   :  { %s5525_s15 = scalar_lea.vmem %s65_s11, 4096  ;;  %p5530_p2 = scmp.lt.s32.totalorder %s65_s11, %s65_s11 }
  0x29   :  { %p5526_p1 = scmp.ne.s32.totalorder %s65_s11, %s5525_s15  ;;  %p5531_p3 = scmp.lt.s32.totalorder %s5525_s15, %s5525_s15 }
  0x2b   :  { %p5532_p4 = por %p5531_p3, %p5530_p2 }
  0x2d   :  { %p5533_p5 = pnand %p5532_p4, %p5526_p1 }
  0x2f   :  { %5536 = shalt.err (!%p5533_p5)
}
  0x30   :  { %70 = dma.hbm_to_vmem [thread:$0]  %s7134_s4, 4096, %s65_s11, [#allocation12], %s5568_s21, %s5568_s21, %s5569_s22  }
  0x31   :  { %5557 = dma.done.wait [#allocation6], 16  }
  0x32   :  { %5558 = vsyncadd [#allocation6], 4294967280 }
  0x33   :  { %5559 = dma.done.wait [#allocation4], 8192  }
  0x34   :  { %5560 = vsyncadd [#allocation4], 4294959104 }
  0x35   :  { %5561 = dma.done.wait [#allocation9], 8192  }
  0x36   :  { %5562 = vsyncadd [#allocation9], 4294959104 }
  0x37   :  { %5563 = dma.done.wait [#allocation12], 4096  }
  0x38   :  { %5564 = vsyncadd [#allocation12], 4294963200 }
  0x39   :  { %86 = sfence }
  0x3a   :  { %v5144_v0 = vld [vmem:[#allocation8 + $0x78] sm:$0xff]   ;;  %v5148_v4 = vld [vmem:[#allocation8 + $0x70] sm:$0xff]   ;;  %v5152_v8 = vld [vmem:[#allocation8 + $0x68] sm:$0xff]   ;;  %s4266_s3 = sld [smem:[#allocation3 + $0x1]]  ;;  %s5577_s17 = smov [#allocation13]  }
  0x3b   :  { %v5145_v1 = vld [vmem:[#allocation8 + $0xf8] sm:$0xff]   ;;  %4683 = vmatprep.subr.bf16.mxu0 %v5144_v0  ;;  %v5149_v5 = vld [vmem:[#allocation8 + $0xf0] sm:$0xff]   ;;  %v5153_v9 = vld [vmem:[#allocation8 + $0xe8] sm:$0xff]   ;;  %s5764_s4 = sld [smem:[#allocation3]]  ;;  %s4251_s18 = sshll.u32 %s5577_s17, 4  ;;  %s4252_s18 = int_to_ptr.vmem [resolvable:$true] %s4251_s18 }
  0x3c   :  { %v5146_v2 = vld [vmem:[#allocation8 + $0x38] sm:$0xff]   ;;  %4795 = vmatprep.subr.bf16.mxu1 %v5145_v1  ;;  %v5150_v6 = vld [vmem:[#allocation8 + $0x30] sm:$0xff]   ;;  %v5154_v10 = vld [vmem:[#allocation8 + $0x28] sm:$0xff]   ;;  %s5537_s19 = scalar_lea.vmem %s4252_s18, 4096  ;;  %p5542_p7 = scmp.lt.s32.totalorder %s4252_s18, %s4252_s18 }
  0x3d   :  { %v5147_v3 = vld [vmem:[#allocation8 + $0xb8] sm:$0xff]   ;;  %4684 = vmatpush3.bf16.msra.mxu0 %v5146_v2  ;;  %v5151_v7 = vld [vmem:[#allocation8 + $0xb0] sm:$0xff]   ;;  %v5155_v11 = vld [vmem:[#allocation8 + $0xa8] sm:$0xff]   ;;  %p5538_p6 = scmp.ne.s32.totalorder %s4252_s18, %s5537_s19  ;;  %p5543_p8 = scmp.lt.s32.totalorder %s5537_s19, %s5537_s19 }
  0x3e   :  { %4796 = vmatpush3.bf16.msra.mxu1 %v5147_v3  ;;  %4685 = vmatprep.subr.bf16.mxu0 %v5148_v4  ;;  %v5156_v12 = vld [vmem:[#allocation8 + $0x60] sm:$0xff]   ;;  %v5160_v16 = vld [vmem:[#allocation8 + $0x58] sm:$0xff]   ;;  %v5164_v20 = vld [vmem:[#allocation8 + $0x50] sm:$0xff]  }
  0x3f   :  { %4797 = vmatprep.subr.bf16.mxu1 %v5149_v5  ;;  %v5157_v13 = vld [vmem:[#allocation8 + $0xe0] sm:$0xff]   ;;  %v5161_v17 = vld [vmem:[#allocation8 + $0xd8] sm:$0xff]   ;;  %v5165_v21 = vld [vmem:[#allocation8 + $0xd0] sm:$0xff]   ;;  %p5544_p9 = por %p5543_p8, %p5542_p7 }
  0x40   :  { %v5158_v14 = vld [vmem:[#allocation8 + $0x20] sm:$0xff]   ;;  %v5162_v18 = vld [vmem:[#allocation8 + $0x18] sm:$0xff]   ;;  %v5166_v22 = vld [vmem:[#allocation8 + $0x10] sm:$0xff]  }
  0x41   :  { %4686 = vmatpush3.bf16.msra.mxu0 %v5150_v6  ;;  %v5159_v15 = vld [vmem:[#allocation8 + $0xa0] sm:$0xff]   ;;  %v5163_v19 = vld [vmem:[#allocation8 + $0x98] sm:$0xff]   ;;  %v5167_v23 = vld [vmem:[#allocation8 + $0x90] sm:$0xff]   ;;  %p5545_p10 = pnand %p5544_p9, %p5538_p6 }
  0x42   :  { %4798 = vmatpush3.bf16.msra.mxu1 %v5151_v7  ;;  %4687 = vmatprep.subr.bf16.mxu0 %v5152_v8  ;;  %v5168_v24 = vld [vmem:[#allocation8 + $0x48] sm:$0xff]   ;;  %v5172_v28 = vld [vmem:[#allocation8 + $0x40] sm:$0xff]   ;;  %v96_v33 = vld [vmem:[#allocation7 + $0x10] sm:$0xff] }
  0x43   :  { %4799 = vmatprep.subr.bf16.mxu1 %v5153_v9  ;;  %v5169_v25 = vld [vmem:[#allocation8 + $0xc8] sm:$0xff]   ;;  %v5173_v29 = vld [vmem:[#allocation8 + $0xc0] sm:$0xff]   ;;  %v97_v36 = vld [vmem:[#allocation7 + $0x18] sm:$0xff] }
  0x44   :  { %v5170_v26 = vld [vmem:[#allocation8 + $0x8] sm:$0xff]   ;;  %v5174_v30 = vld [vmem:[#allocation8] sm:$0xff]   ;;  %v100_v38 = vld [vmem:[#allocation7 + $0x30] sm:$0xff] }
  0x45   :  { %4688 = vmatpush3.bf16.msra.mxu0 %v5154_v10  ;;  %v5171_v27 = vld [vmem:[#allocation8 + $0x88] sm:$0xff]   ;;  %v5175_v31 = vld [vmem:[#allocation8 + $0x80] sm:$0xff]   ;;  %v101_v41 = vld [vmem:[#allocation7 + $0x38] sm:$0xff] }
  0x46   :  { %4800 = vmatpush3.bf16.msra.mxu1 %v5155_v11  ;;  %4689 = vmatprep.subr.bf16.mxu0 %v5156_v12  ;;  %v94_v32 = vld [vmem:[#allocation7] sm:$0xff]  ;;  %v95_v34 = vld [vmem:[#allocation7 + $0x8] sm:$0xff]  ;;  %v104_v47 = vld [vmem:[#allocation7 + $0x50] sm:$0xff] }
  0x47   :  { %4801 = vmatprep.subr.bf16.mxu1 %v5157_v13  ;;  %v4268_v35 = vcombine.high %v94_v32, %v96_v33  ;;  %v98_v37 = vld [vmem:[#allocation7 + $0x20] sm:$0xff]  ;;  %v4270_v39 = vcombine.high %v95_v34, %v97_v36  ;;  %v99_v40 = vld [vmem:[#allocation7 + $0x28] sm:$0xff]  ;;  %v4267_v42 = vcombine.low %v94_v32, %v96_v33  ;;  %v4269_v43 = vcombine.low %v95_v34, %v97_v36  ;;  %v105_v49 = vld [vmem:[#allocation7 + $0x58] sm:$0xff] }
  0x48   :  { %v4272_v44 = vcombine.high %v98_v37, %v100_v38  ;;  %v4274_v45 = vcombine.high %v99_v40, %v101_v41  ;;  %v102_v46 = vld [vmem:[#allocation7 + $0x40] sm:$0xff]  ;;  %v103_v48 = vld [vmem:[#allocation7 + $0x48] sm:$0xff]  ;;  %v4271_v50 = vcombine.low %v98_v37, %v100_v38  ;;  %v4273_v51 = vcombine.low %v99_v40, %v101_v41  ;;  %v108_v57 = vld [vmem:[#allocation7 + $0x70] sm:$0xff] }
  0x49   :  { %4690 = vmatpush3.bf16.msra.mxu0 %v5158_v14  ;;  %766 = vmatprep.mubr.bf16.mxu0 %v4268_v35  ;;  %v4276_v52 = vcombine.high %v102_v46, %v104_v47  ;;  %v4278_v53 = vcombine.high %v103_v48, %v105_v49  ;;  %v106_v54 = vld [vmem:[#allocation7 + $0x60] sm:$0xff]  ;;  %v107_v58 = vld [vmem:[#allocation7 + $0x68] sm:$0xff]  ;;  %v109_v59 = vld [vmem:[#allocation7 + $0x78] sm:$0xff]  ;;  %v4275_v61 = vcombine.low %v102_v46, %v104_v47 }
  0x4a   :  { %4802 = vmatpush3.bf16.msra.mxu1 %v5159_v15  ;;  %4691 = vmatprep.subr.bf16.mxu0 %v5160_v16  ;;  %v5216_v55 = vld [vmem:[#allocation10 + $0xe0] ss:$16 sps:$4 sm:$0xff]   ;;  %v5218_v56 = vld [vmem:[#allocation10 + $0xe4] ss:$16 sps:$4 sm:$0xff]   ;;  %v5223_v60 = vld [vmem:[#allocation10 + $0xe8] ss:$16 sps:$4 sm:$0xff]   ;;  %v4277_v62 = vcombine.low %v103_v48, %v105_v49  ;;  %v4280_v0 = vcombine.high %v106_v54, %v108_v57  ;;  %v4282_v1 = vcombine.high %v107_v58, %v109_v59 }
  0x4b   :  { %4803 = vmatprep.subr.bf16.mxu1 %v5161_v17  ;;  %927 = vmatprep.mubr.bf16.mxu1 %v4270_v39  ;;  %v5225_v63 = vld [vmem:[#allocation10 + $0xec] ss:$16 sps:$4 sm:$0xff]   ;;  %v5232_v2 = vld [vmem:[#allocation10 + $0xc4] ss:$16 sps:$4 sm:$0xff]   ;;  %v5230_v3 = vld [vmem:[#allocation10 + $0xc0] ss:$16 sps:$4 sm:$0xff]   ;;  %v4279_v11 = vcombine.low %v106_v54, %v108_v57  ;;  %v4281_v12 = vcombine.low %v107_v58, %v109_v59 }
  0x4c   :  { %v110_v4 = vld [vmem:[#allocation7 + $0x80] sm:$0xff]  ;;  %v5237_v5 = vld [vmem:[#allocation10 + $0xc8] ss:$16 sps:$4 sm:$0xff]   ;;  %v5239_v6 = vld [vmem:[#allocation10 + $0xcc] ss:$16 sps:$4 sm:$0xff]  }
  0x4d   :  { %4692 = vmatpush3.bf16.msra.mxu0 %v5162_v18  ;;  %v112_v7 = vld [vmem:[#allocation7 + $0x90] sm:$0xff]  ;;  %v111_v8 = vld [vmem:[#allocation7 + $0x88] sm:$0xff]  ;;  %v113_v9 = vld [vmem:[#allocation7 + $0x98] sm:$0xff] }
  0x4e   :  { %4804 = vmatpush3.bf16.msra.mxu1 %v5163_v19  ;;  %4693 = vmatprep.subr.bf16.mxu0 %v5164_v20  ;;  %v5244_v10 = vld [vmem:[#allocation10 + $0xa0] ss:$16 sps:$4 sm:$0xff]   ;;  %v5246_v13 = vld [vmem:[#allocation10 + $0xa4] ss:$16 sps:$4 sm:$0xff]   ;;  %v4284_v14 = vcombine.high %v110_v4, %v112_v7  ;;  %v4286_v15 = vcombine.high %v111_v8, %v113_v9  ;;  %v5253_v16 = vld [vmem:[#allocation10 + $0xac] ss:$16 sps:$4 sm:$0xff]  }
  0x4f   :  { %4805 = vmatprep.subr.bf16.mxu1 %v5165_v21  ;;  %v5251_v17 = vld [vmem:[#allocation10 + $0xa8] ss:$16 sps:$4 sm:$0xff]   ;;  %v114_v18 = vld [vmem:[#allocation7 + $0xa0] sm:$0xff]  ;;  %v116_v19 = vld [vmem:[#allocation7 + $0xb0] sm:$0xff] }
  0x50   :  { %v115_v20 = vld [vmem:[#allocation7 + $0xa8] sm:$0xff]  ;;  %v5258_v21 = vld [vmem:[#allocation10 + $0x80] ss:$16 sps:$4 sm:$0xff]   ;;  %v5272_v34 = vld [vmem:[#allocation10 + $0x44] ss:$16 sps:$4 sm:$0xff]  }
  0x51   :  { %4694 = vmatpush3.bf16.msra.mxu0 %v5166_v22  ;;  %v5260_v22 = vld [vmem:[#allocation10 + $0x84] ss:$16 sps:$4 sm:$0xff]   ;;  %v5267_v32 = vld [vmem:[#allocation10 + $0x68] ss:$16 sps:$4 sm:$0xff]   ;;  %v5269_v33 = vld [vmem:[#allocation10 + $0x6c] ss:$16 sps:$4 sm:$0xff]  }
  0x52   :  { %4806 = vmatpush3.bf16.msra.mxu1 %v5167_v23  ;;  %4695 = vmatprep.subr.bf16.mxu0 %v5168_v24  ;;  %v117_v23 = vld [vmem:[#allocation7 + $0xb8] sm:$0xff]  ;;  %v118_v35 = vld [vmem:[#allocation7 + $0xc0] sm:$0xff]  ;;  %v120_v36 = vld [vmem:[#allocation7 + $0xd0] sm:$0xff] }
  0x53   :  { %4807 = vmatprep.subr.bf16.mxu1 %v5169_v25  ;;  %v5263_v24 = vld [vmem:[#allocation10 + $0x8c] ss:$16 sps:$4 sm:$0xff]   ;;  %v5261_v25 = vld [vmem:[#allocation10 + $0x88] ss:$16 sps:$4 sm:$0xff]   ;;  %v5270_v40 = vld [vmem:[#allocation10 + $0x40] ss:$16 sps:$4 sm:$0xff]   ;;  %v4292_v47 = vcombine.high %v118_v35, %v120_v36 }
  0x54   :  { %v5275_v37 = vld [vmem:[#allocation10 + $0x4c] ss:$16 sps:$4 sm:$0xff]   ;;  %v5273_v41 = vld [vmem:[#allocation10 + $0x48] ss:$16 sps:$4 sm:$0xff]  }
  0x55   :  { %4696 = vmatpush3.bf16.msra.mxu0 %v5170_v26  ;;  %v4283_v26 = vcombine.low %v110_v4, %v112_v7  ;;  %v119_v38 = vld [vmem:[#allocation7 + $0xc8] sm:$0xff]  ;;  %v121_v39 = vld [vmem:[#allocation7 + $0xd8] sm:$0xff]  ;;  %v130_v4 = vld [vmem:[#allocation7 + $0x120] sm:$0xff] }
  0x56   :  { %4808 = vmatpush3.bf16.msra.mxu1 %v5171_v27  ;;  %4697 = vmatprep.subr.bf16.mxu0 %v5172_v28  ;;  %v4285_v27 = vcombine.low %v111_v8, %v113_v9  ;;  %v5266_v28 = vld [vmem:[#allocation10 + $0x64] ss:$16 sps:$4 sm:$0xff]   ;;  %v5281_v46 = vld [vmem:[#allocation10 + $0x2c] ss:$16 sps:$4 sm:$0xff]   ;;  %v4294_v48 = vcombine.high %v119_v38, %v121_v39  ;;  %v5279_v49 = vld [vmem:[#allocation10 + $0x28] ss:$16 sps:$4 sm:$0xff]   ;;  %v4293_v57 = vcombine.low %v119_v38, %v121_v39 }
  0x57   :  { %4809 = vmatprep.subr.bf16.mxu1 %v5173_v29  ;;  %v4288_v29 = vcombine.high %v114_v18, %v116_v19  ;;  %v125_v54 = vld [vmem:[#allocation7 + $0xf8] sm:$0xff]  ;;  %v146_v38 = vld [vmem:[#allocation7 + $0x1a0] sm:$0xff]  ;;  %v148_v39 = vld [vmem:[#allocation7 + $0x1b0] sm:$0xff] }
  0x58   :  { %v133_v7 = vld [vmem:[#allocation7 + $0x138] sm:$0xff] }
  0x59   :  { %4698 = vmatpush3.bf16.msra.mxu0 %v5174_v30  ;;  %v4290_v30 = vcombine.high %v115_v20, %v117_v23 }
  0x5a   :  { %4810 = vmatpush3.bf16.msra.mxu1 %v5175_v31  ;;  %1296 = vmatprep.subr.bf16.mxu0 %v5218_v56  ;;  %v5264_v31 = vld [vmem:[#allocation10 + $0x60] ss:$16 sps:$4 sm:$0xff]   ;;  %v4291_v56 = vcombine.low %v118_v35, %v120_v36 }
  0x5b   :  { %1489 = vmatprep.subr.bf16.mxu1 %v5225_v63  ;;  %v129_v63 = vld [vmem:[#allocation7 + $0x118] sm:$0xff] }
  0x5c   :  { %767 = vmatmul.mubr.bf16.vlgmr.msra.gmra.mxu0 %v4267_v42  ;;  %v5278_v42 = vld [vmem:[#allocation10 + $0x24] ss:$16 sps:$4 sm:$0xff]  }
  0x5d   :  { %928 = vmatmul.mubr.bf16.vlgmr.msra.gmra.mxu1 %v4269_v43  ;;  %774 = vmatprep.mubr.bf16.mxu0 %v4272_v44  ;;  %v4287_v43 = vcombine.low %v114_v18, %v116_v19  ;;  %v4289_v44 = vcombine.low %v115_v20, %v117_v23  ;;  %v5285_v20 = vld [vmem:[#allocation10 + $0x8] ss:$16 sps:$4 sm:$0xff]   ;;  %v140_v23 = vld [vmem:[#allocation7 + $0x170] sm:$0xff] }
  0x5e   :  { %935 = vmatprep.mubr.bf16.mxu1 %v4274_v45  ;;  %1297 = vmatpush1.bf16.msra.mxu0 %v5216_v55  ;;  %v5276_v45 = vld [vmem:[#allocation10 + $0x20] ss:$16 sps:$4 sm:$0xff]  }
  0x5f   :  { %1490 = vmatpush1.bf16.msra.mxu1 %v5223_v60  ;;  %1298 = vmatprep.subr.bf16.mxu0 %v5232_v2  ;;  %v5282_v55 = vld [vmem:[#allocation10] ss:$16 sps:$4 sm:$0xff]  }
  0x60   :  { %1491 = vmatprep.subr.bf16.mxu1 %v5239_v6  ;;  %v126_v60 = vld [vmem:[#allocation7 + $0x100] sm:$0xff]  ;;  %v131_v6 = vld [vmem:[#allocation7 + $0x128] sm:$0xff] }
  0x62   :  { %1299 = vmatpush1.bf16.msra.mxu0 %v5230_v3 }
  0x63   :  { %1492 = vmatpush1.bf16.msra.mxu1 %v5237_v5  ;;  %1300 = vmatprep.subr.bf16.mxu0 %v5246_v13  ;;  %v132_v5 = vld [vmem:[#allocation7 + $0x130] sm:$0xff] }
  0x64   :  { %775 = vmatmul.mubr.bf16.gmra.mxu0 %v4271_v50  ;;  %1493 = vmatprep.subr.bf16.mxu1 %v5253_v16  ;;  %v5284_v50 = vld [vmem:[#allocation10 + $0x4] ss:$16 sps:$4 sm:$0xff]   ;;  %v4303_v16 = vcombine.low %v130_v4, %v132_v5 }
  0x65   :  { %936 = vmatmul.mubr.bf16.gmra.mxu1 %v4273_v51  ;;  %782 = vmatprep.mubr.bf16.mxu0 %v4276_v52  ;;  %v122_v51 = vld [vmem:[#allocation7 + $0xe0] sm:$0xff]  ;;  %v124_v52 = vld [vmem:[#allocation7 + $0xf0] sm:$0xff] }
  0x66   :  { %943 = vmatprep.mubr.bf16.mxu1 %v4278_v53  ;;  %1301 = vmatpush1.bf16.msra.mxu0 %v5244_v10  ;;  %v123_v53 = vld [vmem:[#allocation7 + $0xe8] sm:$0xff]  ;;  %v4296_v58 = vcombine.high %v122_v51, %v124_v52  ;;  %v4304_v10 = vcombine.high %v130_v4, %v132_v5  ;;  %v136_v13 = vld [vmem:[#allocation7 + $0x150] sm:$0xff] }
  0x67   :  { %1494 = vmatpush1.bf16.msra.mxu1 %v5251_v17  ;;  %1302 = vmatprep.subr.bf16.mxu0 %v5260_v22  ;;  %v4298_v59 = vcombine.high %v123_v53, %v125_v54  ;;  %v4305_v17 = vcombine.low %v131_v6, %v133_v7  ;;  %v138_v22 = vld [vmem:[#allocation7 + $0x160] sm:$0xff] }
  0x68   :  { %1495 = vmatprep.subr.bf16.mxu1 %v5263_v24  ;;  %v139_v24 = vld [vmem:[#allocation7 + $0x168] sm:$0xff] }
  0x6a   :  { %1303 = vmatpush1.bf16.msra.mxu0 %v5258_v21  ;;  %v5287_v21 = vld [vmem:[#allocation10 + $0xc] ss:$16 sps:$4 sm:$0xff]  }
  0x6b   :  { %1304 = vmatprep.subr.bf16.mxu0 %v5266_v28  ;;  %1496 = vmatpush1.bf16.msra.mxu1 %v5261_v25  ;;  %v141_v25 = vld [vmem:[#allocation7 + $0x178] sm:$0xff]  ;;  %v4312_v28 = vcombine.high %v138_v22, %v140_v23 }
  0x6c   :  { %783 = vmatmul.mubr.bf16.gmra.mxu0 %v4275_v61  ;;  %1497 = vmatprep.subr.bf16.mxu1 %v5269_v33  ;;  %v128_v61 = vld [vmem:[#allocation7 + $0x110] sm:$0xff]  ;;  %v145_v33 = vld [vmem:[#allocation7 + $0x198] sm:$0xff]  ;;  %v4313_v35 = vcombine.low %v139_v24, %v141_v25 }
  0x6d   :  { %944 = vmatmul.mubr.bf16.gmra.mxu1 %v4277_v62  ;;  %790 = vmatprep.mubr.bf16.mxu0 %v4280_v0  ;;  %v127_v62 = vld [vmem:[#allocation7 + $0x108] sm:$0xff]  ;;  %v4295_v0 = vcombine.low %v122_v51, %v124_v52  ;;  %v4300_v2 = vcombine.high %v126_v60, %v128_v61  ;;  %v4299_v8 = vcombine.low %v126_v60, %v128_v61 }
  0x6e   :  { %951 = vmatprep.mubr.bf16.mxu1 %v4282_v1  ;;  %1305 = vmatpush1.bf16.msra.mxu0 %v5264_v31  ;;  %v4297_v1 = vcombine.low %v123_v53, %v125_v54  ;;  %v4302_v3 = vcombine.high %v127_v62, %v129_v63  ;;  %v4301_v9 = vcombine.low %v127_v62, %v129_v63  ;;  %v144_v31 = vld [vmem:[#allocation7 + $0x190] sm:$0xff]  ;;  %v154_v54 = vld [vmem:[#allocation7 + $0x1e0] sm:$0xff] }
  0x6f   :  { %1498 = vmatpush1.bf16.msra.mxu1 %v5267_v32  ;;  %1306 = vmatprep.subr.bf16.mxu0 %v5272_v34  ;;  %v143_v32 = vld [vmem:[#allocation7 + $0x188] sm:$0xff]  ;;  %v4311_v34 = vcombine.low %v138_v22, %v140_v23 }
  0x70   :  { %1499 = vmatprep.subr.bf16.mxu1 %v5275_v37  ;;  %v4318_v37 = vcombine.high %v143_v32, %v145_v33 }
  0x72   :  { %1307 = vmatpush1.bf16.msra.mxu0 %v5270_v40  ;;  %v147_v40 = vld [vmem:[#allocation7 + $0x1a8] sm:$0xff] }
  0x73   :  { %1500 = vmatpush1.bf16.msra.mxu1 %v5273_v41  ;;  %1308 = vmatprep.subr.bf16.mxu0 %v5278_v42  ;;  %v149_v41 = vld [vmem:[#allocation7 + $0x1b8] sm:$0xff] }
  0x74   :  { %791 = vmatmul.mubr.bf16.gmra.mxu0 %v4279_v11  ;;  %1501 = vmatprep.subr.bf16.mxu1 %v5281_v46  ;;  %v4306_v11 = vcombine.high %v131_v6, %v133_v7  ;;  %v150_v46 = vld [vmem:[#allocation7 + $0x1c0] sm:$0xff]  ;;  %v4321_v51 = vcombine.low %v147_v40, %v149_v41 }
  0x75   :  { %952 = vmatmul.mubr.bf16.gmra.mxu1 %v4281_v12  ;;  %798 = vmatprep.mubr.bf16.mxu0 %v4284_v14  ;;  %v134_v12 = vld [vmem:[#allocation7 + $0x140] sm:$0xff]  ;;  %v135_v14 = vld [vmem:[#allocation7 + $0x148] sm:$0xff] }
  0x76   :  { %959 = vmatprep.mubr.bf16.mxu1 %v4286_v15  ;;  %1309 = vmatpush1.bf16.msra.mxu0 %v5276_v45  ;;  %v137_v15 = vld [vmem:[#allocation7 + $0x158] sm:$0xff]  ;;  %v4308_v18 = vcombine.high %v134_v12, %v136_v13  ;;  %v4322_v45 = vcombine.high %v147_v40, %v149_v41 }
  0x77   :  { %1502 = vmatpush1.bf16.msra.mxu1 %v5279_v49  ;;  %1310 = vmatprep.subr.bf16.mxu0 %v5284_v50  ;;  %v4310_v19 = vcombine.high %v135_v14, %v137_v15  ;;  %v153_v49 = vld [vmem:[#allocation7 + $0x1d8] sm:$0xff]  ;;  %v4319_v50 = vcombine.low %v146_v38, %v148_v39 }
  0x78   :  { %1503 = vmatprep.subr.bf16.mxu1 %v5287_v21 }
  0x7a   :  { %1311 = vmatpush1.bf16.msra.mxu0 %v5282_v55  ;;  %v156_v55 = vld [vmem:[#allocation7 + $0x1f0] sm:$0xff] }
  0x7b   :  { %1504 = vmatpush1.bf16.msra.mxu1 %v5285_v20  ;;  %v4328_v60 = vcombine.high %v154_v54, %v156_v55  ;;  %v4327_v62 = vcombine.low %v154_v54, %v156_v55 }
  0x7c   :  { %799 = vmatmul.mubr.bf16.gmra.mxu0 %v4283_v26  ;;  %v4307_v26 = vcombine.low %v134_v12, %v136_v13 }
  0x7d   :  { %960 = vmatmul.mubr.bf16.gmra.mxu1 %v4285_v27  ;;  %806 = vmatprep.mubr.bf16.mxu0 %v4288_v29  ;;  %v4309_v27 = vcombine.low %v135_v14, %v137_v15  ;;  %v4314_v29 = vcombine.high %v139_v24, %v141_v25 }
  0x7e   :  { %967 = vmatprep.mubr.bf16.mxu1 %v4290_v30  ;;  %v142_v30 = vld [vmem:[#allocation7 + $0x180] sm:$0xff] }
  0x7f   :  { %v4316_v36 = vcombine.high %v142_v30, %v144_v31  ;;  %v4315_v42 = vcombine.low %v142_v30, %v144_v31 }
  0x84   :  { %807 = vmatmul.mubr.bf16.gmra.mxu0 %v4287_v43  ;;  %v4317_v43 = vcombine.low %v143_v32, %v145_v33 }
  0x85   :  { %968 = vmatmul.mubr.bf16.gmra.mxu1 %v4289_v44  ;;  %814 = vmatprep.mubr.bf16.mxu0 %v4292_v47  ;;  %v4320_v44 = vcombine.high %v146_v38, %v148_v39  ;;  %v152_v47 = vld [vmem:[#allocation7 + $0x1d0] sm:$0xff] }
  0x86   :  { %975 = vmatprep.mubr.bf16.mxu1 %v4294_v48  ;;  %v151_v48 = vld [vmem:[#allocation7 + $0x1c8] sm:$0xff]  ;;  %v4324_v52 = vcombine.high %v150_v46, %v152_v47 }
  0x87   :  { %v4326_v53 = vcombine.high %v151_v48, %v153_v49 }
  0x8c   :  { %815 = vmatmul.mubr.bf16.gmra.mxu0 %v4291_v56  ;;  %v155_v56 = vld [vmem:[#allocation7 + $0x1e8] sm:$0xff] }
  0x8d   :  { %976 = vmatmul.mubr.bf16.gmra.mxu1 %v4293_v57  ;;  %822 = vmatprep.mubr.bf16.mxu0 %v4296_v58  ;;  %v157_v57 = vld [vmem:[#allocation7 + $0x1f8] sm:$0xff]  ;;  %v4323_v58 = vcombine.low %v150_v46, %v152_v47 }
  0x8e   :  { %983 = vmatprep.mubr.bf16.mxu1 %v4298_v59  ;;  %v4325_v59 = vcombine.low %v151_v48, %v153_v49  ;;  %v4330_v61 = vcombine.high %v155_v56, %v157_v57  ;;  %v4329_v63 = vcombine.low %v155_v56, %v157_v57 }
  0x94   :  { %823 = vmatmul.mubr.bf16.gmra.mxu0 %v4295_v0  ;;  %v5576_v0 = vmov 0  }
  0x95   :  { %984 = vmatmul.mubr.bf16.gmra.mxu1 %v4297_v1  ;;  %830 = vmatprep.mubr.bf16.mxu0 %v4300_v2 }
  0x96   :  { %991 = vmatprep.mubr.bf16.mxu1 %v4302_v3 }
  0x9c   :  { %831 = vmatmul.mubr.bf16.gmra.mxu0 %v4299_v8 }
  0x9d   :  { %992 = vmatmul.mubr.bf16.gmra.mxu1 %v4301_v9  ;;  %838 = vmatprep.mubr.bf16.mxu0 %v4304_v10 }
  0x9e   :  { %999 = vmatprep.mubr.bf16.mxu1 %v4306_v11 }
  0xa4   :  { %839 = vmatmul.mubr.bf16.gmra.mxu0 %v4303_v16 }
  0xa5   :  { %1000 = vmatmul.mubr.bf16.gmra.mxu1 %v4305_v17  ;;  %846 = vmatprep.mubr.bf16.mxu0 %v4308_v18 }
  0xa6   :  { %1007 = vmatprep.mubr.bf16.mxu1 %v4310_v19 }
  0xac   :  { %847 = vmatmul.mubr.bf16.gmra.mxu0 %v4307_v26 }
  0xad   :  { %1008 = vmatmul.mubr.bf16.gmra.mxu1 %v4309_v27  ;;  %854 = vmatprep.mubr.bf16.mxu0 %v4312_v28 }
  0xae   :  { %1015 = vmatprep.mubr.bf16.mxu1 %v4314_v29 }
  0xb4   :  { %855 = vmatmul.mubr.bf16.gmra.mxu0 %v4311_v34 }
  0xb5   :  { %1016 = vmatmul.mubr.bf16.gmra.mxu1 %v4313_v35  ;;  %862 = vmatprep.mubr.bf16.mxu0 %v4316_v36 }
  0xb6   :  { %1023 = vmatprep.mubr.bf16.mxu1 %v4318_v37 }
  0xbc   :  { %863 = vmatmul.mubr.bf16.gmra.mxu0 %v4315_v42 }
  0xbd   :  { %1024 = vmatmul.mubr.bf16.gmra.mxu1 %v4317_v43  ;;  %870 = vmatprep.mubr.bf16.mxu0 %v4320_v44 }
  0xbe   :  { %1031 = vmatprep.mubr.bf16.mxu1 %v4322_v45 }
  0xc4   :  { %871 = vmatmul.mubr.bf16.gmra.mxu0 %v4319_v50 }
  0xc5   :  { %1032 = vmatmul.mubr.bf16.gmra.mxu1 %v4321_v51  ;;  %878 = vmatprep.mubr.bf16.mxu0 %v4324_v52 }
  0xc6   :  { %1039 = vmatprep.mubr.bf16.mxu1 %v4326_v53 }
  0xcc   :  { %879 = vmatmul.mubr.bf16.gmra.mxu0 %v4323_v58 }
  0xcd   :  { %1040 = vmatmul.mubr.bf16.gmra.mxu1 %v4325_v59  ;;  %886 = vmatprep.mubr.bf16.mxu0 %v4328_v60 }
  0xce   :  { %1047 = vmatprep.mubr.bf16.mxu1 %v4330_v61 }
  0xd4   :  { %887 = vmatmul.mubr.bf16.gmra.mxu0 %v4327_v62 }
  0xd5   :  { %1048 = vmatmul.mubr.bf16.gmra.mxu1 %v4329_v63  ;;  %1328 = vmatprep.mubr.bf16.mxu0 %v5576_v0 }
  0xd6   :  { %1521 = vmatprep.mubr.bf16.mxu1 %v5576_v0 }
 0x11c   :  { %v4699_v1 = vpop.f32.mrf.mxu0 }
 0x11d   :  { %v4811_v2 = vpop.f32.mrf.mxu1 }
 0x11e   :  { %v4700_v3 = vpop.f32.mrf.mxu0 }
 0x11f   :  { %v4812_v4 = vpop.f32.mrf.mxu1  ;;  %v4701_v5 = vadd.f32 %v4700_v3, %v4699_v1 }
 0x120   :  { %v4813_v6 = vadd.f32 %v4812_v4, %v4811_v2  ;;  %v4702_v7 = vpop.f32.mrf.mxu0 }
 0x121   :  { %v4814_v8 = vpop.f32.mrf.mxu1 }
 0x122   :  { %v4703_v9 = vpop.f32.mrf.mxu0  ;;  %v930_v11 = vadd.f32 %v4813_v6, %v4701_v5 }
 0x123   :  { %v4815_v10 = vpop.f32.mrf.mxu1  ;;  %v4704_v12 = vadd.f32 %v4703_v9, %v4702_v7 }
 0x124   :  { %v4816_v13 = vadd.f32 %v4815_v10, %v4814_v8  ;;  %v4705_v14 = vpop.f32.mrf.mxu0  ;;  %v1056_v19 = vmax.f32 %v930_v11, 0.0 }
 0x125   :  { %v4817_v15 = vpop.f32.mrf.mxu1 }
 0x126   :  { %v933_v16 = vadd.f32 %v4816_v13, %v4704_v12  ;;  %v4706_v17 = vpop.f32.mrf.mxu0 }
 0x127   :  { %v4818_v18 = vpop.f32.mrf.mxu1  ;;  %v4707_v21 = vadd.f32 %v4706_v17, %v4705_v14 }
 0x128   :  { %v1057_v20 = vmax.f32 %v933_v16, 0.0  ;;  %v4819_v22 = vadd.f32 %v4818_v18, %v4817_v15  ;;  %v4708_v23 = vpop.f32.mrf.mxu0 }
 0x129   :  { %v4820_v24 = vpop.f32.mrf.mxu1 }
 0x12a   :  { %v1088_v25 = vpack.c.bf16 %v1057_v20, %v1056_v19  ;;  %v4709_v26 = vpop.f32.mrf.mxu0  ;;  %v938_v28 = vadd.f32 %v4819_v22, %v4707_v21 }
 0x12b   :  { %v4821_v27 = vpop.f32.mrf.mxu1  ;;  %v4710_v29 = vadd.f32 %v4709_v26, %v4708_v23 }
 0x12c   :  { %v4822_v30 = vadd.f32 %v4821_v27, %v4820_v24  ;;  %1329 = vmatmul.mubr.bf16.vlgmr.msra.gmra.mxu0 %v1088_v25  ;;  %1522 = vmatmul.mubr.bf16.vlgmr.msra.gmra.mxu1 %v1088_v25  ;;  %v4711_v31 = vpop.f32.mrf.mxu0  ;;  %v1058_v36 = vmax.f32 %v938_v28, 0.0 }
 0x12d   :  { %v4823_v32 = vpop.f32.mrf.mxu1  ;;  %1338 = vmatprep.mubr.bf16.mxu0 %v5576_v0  ;;  %1531 = vmatprep.mubr.bf16.mxu1 %v5576_v0 }
 0x12e   :  { %v941_v33 = vadd.f32 %v4822_v30, %v4710_v29  ;;  %v4712_v34 = vpop.f32.mrf.mxu0 }
 0x12f   :  { %v4824_v35 = vpop.f32.mrf.mxu1  ;;  %v4713_v38 = vadd.f32 %v4712_v34, %v4711_v31 }
 0x130   :  { %v1059_v37 = vmax.f32 %v941_v33, 0.0  ;;  %v4825_v39 = vadd.f32 %v4824_v35, %v4823_v32  ;;  %v4714_v40 = vpop.f32.mrf.mxu0 }
 0x131   :  { %v4826_v41 = vpop.f32.mrf.mxu1 }
 0x132   :  { %v1089_v42 = vpack.c.bf16 %v1059_v37, %v1058_v36  ;;  %v4715_v43 = vpop.f32.mrf.mxu0  ;;  %v946_v45 = vadd.f32 %v4825_v39, %v4713_v38 }
 0x133   :  { %v4827_v44 = vpop.f32.mrf.mxu1  ;;  %v4716_v46 = vadd.f32 %v4715_v43, %v4714_v40 }
 0x134   :  { %v4828_v47 = vadd.f32 %v4827_v44, %v4826_v41  ;;  %1339 = vmatmul.mubr.bf16.gmra.mxu0 %v1089_v42  ;;  %1532 = vmatmul.mubr.bf16.gmra.mxu1 %v1089_v42  ;;  %v4717_v48 = vpop.f32.mrf.mxu0  ;;  %v1060_v53 = vmax.f32 %v946_v45, 0.0 }
 0x135   :  { %v4829_v49 = vpop.f32.mrf.mxu1  ;;  %1348 = vmatprep.mubr.bf16.mxu0 %v5576_v0  ;;  %1541 = vmatprep.mubr.bf16.mxu1 %v5576_v0 }
 0x136   :  { %v949_v50 = vadd.f32 %v4828_v47, %v4716_v46  ;;  %v4718_v51 = vpop.f32.mrf.mxu0 }
 0x137   :  { %v4830_v52 = vpop.f32.mrf.mxu1  ;;  %v4719_v55 = vadd.f32 %v4718_v51, %v4717_v48 }
 0x138   :  { %v1061_v54 = vmax.f32 %v949_v50, 0.0  ;;  %v4831_v56 = vadd.f32 %v4830_v52, %v4829_v49  ;;  %v4720_v57 = vpop.f32.mrf.mxu0 }
 0x139   :  { %v4832_v58 = vpop.f32.mrf.mxu1 }
 0x13a   :  { %v1090_v59 = vpack.c.bf16 %v1061_v54, %v1060_v53  ;;  %v4721_v60 = vpop.f32.mrf.mxu0  ;;  %v954_v62 = vadd.f32 %v4831_v56, %v4719_v55 }
 0x13b   :  { %v4833_v61 = vpop.f32.mrf.mxu1  ;;  %v4722_v63 = vadd.f32 %v4721_v60, %v4720_v57 }
 0x13c   :  { %v4834_v1 = vadd.f32 %v4833_v61, %v4832_v58  ;;  %1349 = vmatmul.mubr.bf16.gmra.mxu0 %v1090_v59  ;;  %1542 = vmatmul.mubr.bf16.gmra.mxu1 %v1090_v59  ;;  %v4723_v2 = vpop.f32.mrf.mxu0  ;;  %v1062_v7 = vmax.f32 %v954_v62, 0.0 }
 0x13d   :  { %v4835_v3 = vpop.f32.mrf.mxu1  ;;  %1358 = vmatprep.mubr.bf16.mxu0 %v5576_v0  ;;  %1551 = vmatprep.mubr.bf16.mxu1 %v5576_v0 }
 0x13e   :  { %v957_v4 = vadd.f32 %v4834_v1, %v4722_v63  ;;  %v4724_v5 = vpop.f32.mrf.mxu0 }
 0x13f   :  { %v4836_v6 = vpop.f32.mrf.mxu1  ;;  %v4725_v9 = vadd.f32 %v4724_v5, %v4723_v2 }
 0x140   :  { %v1063_v8 = vmax.f32 %v957_v4, 0.0  ;;  %v4837_v10 = vadd.f32 %v4836_v6, %v4835_v3  ;;  %v4726_v11 = vpop.f32.mrf.mxu0 }
 0x141   :  { %v4838_v12 = vpop.f32.mrf.mxu1 }
 0x142   :  { %v1091_v13 = vpack.c.bf16 %v1063_v8, %v1062_v7  ;;  %v4727_v14 = vpop.f32.mrf.mxu0  ;;  %v962_v16 = vadd.f32 %v4837_v10, %v4725_v9 }
 0x143   :  { %v4839_v15 = vpop.f32.mrf.mxu1  ;;  %v4728_v17 = vadd.f32 %v4727_v14, %v4726_v11 }
 0x144   :  { %v4840_v18 = vadd.f32 %v4839_v15, %v4838_v12  ;;  %1359 = vmatmul.mubr.bf16.gmra.mxu0 %v1091_v13  ;;  %1552 = vmatmul.mubr.bf16.gmra.mxu1 %v1091_v13  ;;  %v4729_v19 = vpop.f32.mrf.mxu0  ;;  %v1064_v24 = vmax.f32 %v962_v16, 0.0 }
 0x145   :  { %v4841_v20 = vpop.f32.mrf.mxu1  ;;  %1368 = vmatprep.mubr.bf16.mxu0 %v5576_v0  ;;  %1561 = vmatprep.mubr.bf16.mxu1 %v5576_v0 }
 0x146   :  { %v965_v21 = vadd.f32 %v4840_v18, %v4728_v17  ;;  %v4730_v22 = vpop.f32.mrf.mxu0 }
 0x147   :  { %v4842_v23 = vpop.f32.mrf.mxu1  ;;  %v4731_v26 = vadd.f32 %v4730_v22, %v4729_v19 }
 0x148   :  { %v1065_v25 = vmax.f32 %v965_v21, 0.0  ;;  %v4843_v27 = vadd.f32 %v4842_v23, %v4841_v20  ;;  %v4732_v28 = vpop.f32.mrf.mxu0 }
 0x149   :  { %v4844_v29 = vpop.f32.mrf.mxu1 }
 0x14a   :  { %v1092_v30 = vpack.c.bf16 %v1065_v25, %v1064_v24  ;;  %v4733_v31 = vpop.f32.mrf.mxu0  ;;  %v970_v33 = vadd.f32 %v4843_v27, %v4731_v26 }
 0x14b   :  { %v4845_v32 = vpop.f32.mrf.mxu1  ;;  %v4734_v34 = vadd.f32 %v4733_v31, %v4732_v28 }
 0x14c   :  { %v4846_v35 = vadd.f32 %v4845_v32, %v4844_v29  ;;  %1369 = vmatmul.mubr.bf16.gmra.mxu0 %v1092_v30  ;;  %1562 = vmatmul.mubr.bf16.gmra.mxu1 %v1092_v30  ;;  %v4735_v36 = vpop.f32.mrf.mxu0  ;;  %v1066_v41 = vmax.f32 %v970_v33, 0.0 }
 0x14d   :  { %v4847_v37 = vpop.f32.mrf.mxu1  ;;  %1378 = vmatprep.mubr.bf16.mxu0 %v5576_v0  ;;  %1571 = vmatprep.mubr.bf16.mxu1 %v5576_v0 }
 0x14e   :  { %v973_v38 = vadd.f32 %v4846_v35, %v4734_v34  ;;  %v4736_v39 = vpop.f32.mrf.mxu0 }
 0x14f   :  { %v4848_v40 = vpop.f32.mrf.mxu1  ;;  %v4737_v43 = vadd.f32 %v4736_v39, %v4735_v36 }
 0x150   :  { %v1067_v42 = vmax.f32 %v973_v38, 0.0  ;;  %v4849_v44 = vadd.f32 %v4848_v40, %v4847_v37  ;;  %v4738_v45 = vpop.f32.mrf.mxu0 }
 0x151   :  { %v4850_v46 = vpop.f32.mrf.mxu1 }
 0x152   :  { %v1093_v47 = vpack.c.bf16 %v1067_v42, %v1066_v41  ;;  %v4739_v48 = vpop.f32.mrf.mxu0  ;;  %v978_v50 = vadd.f32 %v4849_v44, %v4737_v43 }
 0x153   :  { %v4851_v49 = vpop.f32.mrf.mxu1  ;;  %v4740_v51 = vadd.f32 %v4739_v48, %v4738_v45 }
 0x154   :  { %v4852_v52 = vadd.f32 %v4851_v49, %v4850_v46  ;;  %1379 = vmatmul.mubr.bf16.gmra.mxu0 %v1093_v47  ;;  %1572 = vmatmul.mubr.bf16.gmra.mxu1 %v1093_v47  ;;  %v4741_v53 = vpop.f32.mrf.mxu0  ;;  %v1068_v58 = vmax.f32 %v978_v50, 0.0 }
 0x155   :  { %v4853_v54 = vpop.f32.mrf.mxu1  ;;  %1388 = vmatprep.mubr.bf16.mxu0 %v5576_v0  ;;  %1581 = vmatprep.mubr.bf16.mxu1 %v5576_v0 }
 0x156   :  { %v981_v55 = vadd.f32 %v4852_v52, %v4740_v51  ;;  %v4742_v56 = vpop.f32.mrf.mxu0 }
 0x157   :  { %v4854_v57 = vpop.f32.mrf.mxu1  ;;  %v4743_v60 = vadd.f32 %v4742_v56, %v4741_v53 }
 0x158   :  { %v1069_v59 = vmax.f32 %v981_v55, 0.0  ;;  %v4855_v61 = vadd.f32 %v4854_v57, %v4853_v54  ;;  %v4744_v62 = vpop.f32.mrf.mxu0 }
 0x159   :  { %v4856_v63 = vpop.f32.mrf.mxu1 }
 0x15a   :  { %v1094_v1 = vpack.c.bf16 %v1069_v59, %v1068_v58  ;;  %v4745_v2 = vpop.f32.mrf.mxu0  ;;  %v986_v4 = vadd.f32 %v4855_v61, %v4743_v60 }
 0x15b   :  { %v4857_v3 = vpop.f32.mrf.mxu1  ;;  %v4746_v5 = vadd.f32 %v4745_v2, %v4744_v62 }
 0x15c   :  { %v4858_v6 = vadd.f32 %v4857_v3, %v4856_v63  ;;  %1389 = vmatmul.mubr.bf16.gmra.mxu0 %v1094_v1  ;;  %1582 = vmatmul.mubr.bf16.gmra.mxu1 %v1094_v1  ;;  %v4747_v7 = vpop.f32.mrf.mxu0  ;;  %v1070_v12 = vmax.f32 %v986_v4, 0.0 }
 0x15d   :  { %v4859_v8 = vpop.f32.mrf.mxu1  ;;  %1398 = vmatprep.mubr.bf16.mxu0 %v5576_v0  ;;  %1591 = vmatprep.mubr.bf16.mxu1 %v5576_v0 }
 0x15e   :  { %v989_v9 = vadd.f32 %v4858_v6, %v4746_v5  ;;  %v4748_v10 = vpop.f32.mrf.mxu0 }
 0x15f   :  { %v4860_v11 = vpop.f32.mrf.mxu1  ;;  %v4749_v14 = vadd.f32 %v4748_v10, %v4747_v7 }
 0x160   :  { %v1071_v13 = vmax.f32 %v989_v9, 0.0  ;;  %v4861_v15 = vadd.f32 %v4860_v11, %v4859_v8  ;;  %v4750_v16 = vpop.f32.mrf.mxu0 }
 0x161   :  { %v4862_v17 = vpop.f32.mrf.mxu1 }
 0x162   :  { %v1095_v18 = vpack.c.bf16 %v1071_v13, %v1070_v12  ;;  %v4751_v19 = vpop.f32.mrf.mxu0  ;;  %v994_v21 = vadd.f32 %v4861_v15, %v4749_v14 }
 0x163   :  { %v4863_v20 = vpop.f32.mrf.mxu1  ;;  %v4752_v22 = vadd.f32 %v4751_v19, %v4750_v16 }
 0x164   :  { %v4864_v23 = vadd.f32 %v4863_v20, %v4862_v17  ;;  %1399 = vmatmul.mubr.bf16.gmra.mxu0 %v1095_v18  ;;  %1592 = vmatmul.mubr.bf16.gmra.mxu1 %v1095_v18  ;;  %v4753_v24 = vpop.f32.mrf.mxu0  ;;  %v1072_v29 = vmax.f32 %v994_v21, 0.0 }
 0x165   :  { %v4865_v25 = vpop.f32.mrf.mxu1  ;;  %1408 = vmatprep.mubr.bf16.mxu0 %v5576_v0  ;;  %1601 = vmatprep.mubr.bf16.mxu1 %v5576_v0 }
 0x166   :  { %v997_v26 = vadd.f32 %v4864_v23, %v4752_v22  ;;  %v4754_v27 = vpop.f32.mrf.mxu0 }
 0x167   :  { %v4866_v28 = vpop.f32.mrf.mxu1  ;;  %v4755_v31 = vadd.f32 %v4754_v27, %v4753_v24 }
 0x168   :  { %v1073_v30 = vmax.f32 %v997_v26, 0.0  ;;  %v4867_v32 = vadd.f32 %v4866_v28, %v4865_v25  ;;  %v4756_v33 = vpop.f32.mrf.mxu0 }
 0x169   :  { %v4868_v34 = vpop.f32.mrf.mxu1 }
 0x16a   :  { %v1096_v35 = vpack.c.bf16 %v1073_v30, %v1072_v29  ;;  %v4757_v36 = vpop.f32.mrf.mxu0  ;;  %v1002_v38 = vadd.f32 %v4867_v32, %v4755_v31 }
 0x16b   :  { %v4869_v37 = vpop.f32.mrf.mxu1  ;;  %v4758_v39 = vadd.f32 %v4757_v36, %v4756_v33 }
 0x16c   :  { %v4870_v40 = vadd.f32 %v4869_v37, %v4868_v34  ;;  %1409 = vmatmul.mubr.bf16.gmra.mxu0 %v1096_v35  ;;  %1602 = vmatmul.mubr.bf16.gmra.mxu1 %v1096_v35  ;;  %v4759_v41 = vpop.f32.mrf.mxu0  ;;  %v1074_v46 = vmax.f32 %v1002_v38, 0.0 }
 0x16d   :  { %v4871_v42 = vpop.f32.mrf.mxu1  ;;  %1418 = vmatprep.mubr.bf16.mxu0 %v5576_v0  ;;  %1611 = vmatprep.mubr.bf16.mxu1 %v5576_v0 }
 0x16e   :  { %v1005_v43 = vadd.f32 %v4870_v40, %v4758_v39  ;;  %v4760_v44 = vpop.f32.mrf.mxu0 }
 0x16f   :  { %v4872_v45 = vpop.f32.mrf.mxu1  ;;  %v4761_v48 = vadd.f32 %v4760_v44, %v4759_v41 }
 0x170   :  { %v1075_v47 = vmax.f32 %v1005_v43, 0.0  ;;  %v4873_v49 = vadd.f32 %v4872_v45, %v4871_v42  ;;  %v4762_v50 = vpop.f32.mrf.mxu0 }
 0x171   :  { %v4874_v51 = vpop.f32.mrf.mxu1 }
 0x172   :  { %v1097_v52 = vpack.c.bf16 %v1075_v47, %v1074_v46  ;;  %v4763_v53 = vpop.f32.mrf.mxu0  ;;  %v1010_v55 = vadd.f32 %v4873_v49, %v4761_v48 }
 0x173   :  { %v4875_v54 = vpop.f32.mrf.mxu1  ;;  %v4764_v56 = vadd.f32 %v4763_v53, %v4762_v50 }
 0x174   :  { %v4876_v57 = vadd.f32 %v4875_v54, %v4874_v51  ;;  %1419 = vmatmul.mubr.bf16.gmra.mxu0 %v1097_v52  ;;  %1612 = vmatmul.mubr.bf16.gmra.mxu1 %v1097_v52  ;;  %v4765_v58 = vpop.f32.mrf.mxu0  ;;  %v1076_v63 = vmax.f32 %v1010_v55, 0.0 }
 0x175   :  { %v4877_v59 = vpop.f32.mrf.mxu1  ;;  %1428 = vmatprep.mubr.bf16.mxu0 %v5576_v0  ;;  %1621 = vmatprep.mubr.bf16.mxu1 %v5576_v0 }
 0x176   :  { %v1013_v60 = vadd.f32 %v4876_v57, %v4764_v56  ;;  %v4766_v61 = vpop.f32.mrf.mxu0 }
 0x177   :  { %v4878_v62 = vpop.f32.mrf.mxu1  ;;  %v4767_v2 = vadd.f32 %v4766_v61, %v4765_v58 }
 0x178   :  { %v1077_v1 = vmax.f32 %v1013_v60, 0.0  ;;  %v4879_v3 = vadd.f32 %v4878_v62, %v4877_v59  ;;  %v4768_v4 = vpop.f32.mrf.mxu0 }
 0x179   :  { %v4880_v5 = vpop.f32.mrf.mxu1 }
 0x17a   :  { %v1098_v6 = vpack.c.bf16 %v1077_v1, %v1076_v63  ;;  %v4769_v7 = vpop.f32.mrf.mxu0  ;;  %v1018_v9 = vadd.f32 %v4879_v3, %v4767_v2 }
 0x17b   :  { %v4881_v8 = vpop.f32.mrf.mxu1  ;;  %v4770_v10 = vadd.f32 %v4769_v7, %v4768_v4 }
 0x17c   :  { %v4882_v11 = vadd.f32 %v4881_v8, %v4880_v5  ;;  %1429 = vmatmul.mubr.bf16.gmra.mxu0 %v1098_v6  ;;  %1622 = vmatmul.mubr.bf16.gmra.mxu1 %v1098_v6  ;;  %v4771_v12 = vpop.f32.mrf.mxu0  ;;  %v1078_v17 = vmax.f32 %v1018_v9, 0.0 }
 0x17d   :  { %v4883_v13 = vpop.f32.mrf.mxu1  ;;  %1438 = vmatprep.mubr.bf16.mxu0 %v5576_v0  ;;  %1631 = vmatprep.mubr.bf16.mxu1 %v5576_v0 }
 0x17e   :  { %v1021_v14 = vadd.f32 %v4882_v11, %v4770_v10  ;;  %v4772_v15 = vpop.f32.mrf.mxu0 }
 0x17f   :  { %v4884_v16 = vpop.f32.mrf.mxu1  ;;  %v4773_v19 = vadd.f32 %v4772_v15, %v4771_v12 }
 0x180   :  { %v1079_v18 = vmax.f32 %v1021_v14, 0.0  ;;  %v4885_v20 = vadd.f32 %v4884_v16, %v4883_v13  ;;  %v4774_v21 = vpop.f32.mrf.mxu0 }
 0x181   :  { %v4886_v22 = vpop.f32.mrf.mxu1 }
 0x182   :  { %v1099_v23 = vpack.c.bf16 %v1079_v18, %v1078_v17  ;;  %v4775_v24 = vpop.f32.mrf.mxu0  ;;  %v1026_v26 = vadd.f32 %v4885_v20, %v4773_v19 }
 0x183   :  { %v4887_v25 = vpop.f32.mrf.mxu1  ;;  %v4776_v27 = vadd.f32 %v4775_v24, %v4774_v21  ;;  %v5288_v21 = vld [vmem:[#allocation11 + $0x78] sm:$0xff]  }
 0x184   :  { %v4888_v28 = vadd.f32 %v4887_v25, %v4886_v22  ;;  %1439 = vmatmul.mubr.bf16.gmra.mxu0 %v1099_v23  ;;  %1632 = vmatmul.mubr.bf16.gmra.mxu1 %v1099_v23  ;;  %v4777_v29 = vpop.f32.mrf.mxu0  ;;  %v1080_v34 = vmax.f32 %v1026_v26, 0.0  ;;  %v5289_v22 = vld [vmem:[#allocation11 + $0xf8] sm:$0xff]   ;;  %v5384_v25 = vld [vmem:[#allocation7] sm:$0xff] }
 0x185   :  { %v4889_v30 = vpop.f32.mrf.mxu1  ;;  %1448 = vmatprep.mubr.bf16.mxu0 %v5576_v0  ;;  %1641 = vmatprep.mubr.bf16.mxu1 %v5576_v0  ;;  %v5290_v23 = vld [vmem:[#allocation11 + $0x38] sm:$0xff]   ;;  %v1939_v26 = vunpack.c.l.bf16 %v5384_v25 }
 0x186   :  { %v1029_v31 = vadd.f32 %v4888_v28, %v4776_v27  ;;  %v4778_v32 = vpop.f32.mrf.mxu0  ;;  %4907 = vmatprep.subr.bf16.mxu0 %v5288_v21  ;;  %5019 = vmatprep.subr.bf16.mxu1 %v5289_v22  ;;  %v5291_v24 = vld [vmem:[#allocation11 + $0xb8] sm:$0xff]   ;;  %v1940_v27 = vunpack.c.h.bf16 %v5384_v25  ;;  %v5385_v28 = vld [vmem:[#allocation7 + $0x8] sm:$0xff]  ;;  %v5396_v21 = vld [vmem:[#allocation7 + $0x60] sm:$0xff] }
 0x187   :  { %v4890_v33 = vpop.f32.mrf.mxu1  ;;  %v4779_v36 = vadd.f32 %v4778_v32, %v4777_v29  ;;  %4908 = vmatpush3.bf16.msra.mxu0 %v5290_v23  ;;  %5020 = vmatpush3.bf16.msra.mxu1 %v5291_v24  ;;  %v1942_v29 = vunpack.c.h.bf16 %v5385_v28  ;;  %v5663_v32 = vstv %s4266_s3  ;;  %v1963_v22 = vunpack.c.l.bf16 %v5396_v21  ;;  %v5397_v24 = vld [vmem:[#allocation7 + $0x68] sm:$0xff] }
 0x188   :  { %v1081_v35 = vmax.f32 %v1029_v31, 0.0  ;;  %v4891_v37 = vadd.f32 %v4890_v33, %v4889_v30  ;;  %v4780_v38 = vpop.f32.mrf.mxu0  ;;  %v5386_v30 = vld [vmem:[#allocation7 + $0x10] sm:$0xff]  ;;  %v5387_v33 = vld [vmem:[#allocation7 + $0x18] sm:$0xff]  ;;  %v1965_v25 = vunpack.c.l.bf16 %v5397_v24 }
 0x189   :  { %v4892_v39 = vpop.f32.mrf.mxu1  ;;  %v1943_v31 = vunpack.c.l.bf16 %v5386_v30 }
 0x18a   :  { %v1100_v40 = vpack.c.bf16 %v1081_v35, %v1080_v34  ;;  %v4781_v41 = vpop.f32.mrf.mxu0  ;;  %v1034_v43 = vadd.f32 %v4891_v37, %v4779_v36  ;;  %v1945_v34 = vunpack.c.l.bf16 %v5387_v33  ;;  %v1944_v35 = vunpack.c.h.bf16 %v5386_v30 }
 0x18b   :  { %v4893_v42 = vpop.f32.mrf.mxu1  ;;  %v4782_v44 = vadd.f32 %v4781_v41, %v4780_v38  ;;  %v1946_v36 = vunpack.c.h.bf16 %v5387_v33  ;;  %v5666_v37 = vmul.f32 %v5663_v32, %v1939_v26  ;;  %v5678_v41 = vmul.f32 %v5663_v32, %v1943_v31 }
 0x18c   :  { %v4894_v45 = vadd.f32 %v4893_v42, %v4892_v39  ;;  %1449 = vmatmul.mubr.bf16.gmra.mxu0 %v1100_v40  ;;  %1642 = vmatmul.mubr.bf16.gmra.mxu1 %v1100_v40  ;;  %v4783_v46 = vpop.f32.mrf.mxu0  ;;  %v1082_v51 = vmax.f32 %v1034_v43, 0.0  ;;  %v5672_v39 = vmul.f32 %v5663_v32, %v1940_v27  ;;  %v5675_v40 = vmul.f32 %v5663_v32, %v1942_v29  ;;  %v5388_v42 = vld [vmem:[#allocation7 + $0x20] sm:$0xff]  ;;  %v5399_v29 = vld [vmem:[#allocation7 + $0x78] sm:$0xff] }
 0x18d   :  { %v4895_v47 = vpop.f32.mrf.mxu1  ;;  %1458 = vmatprep.mubr.bf16.mxu0 %v5576_v0  ;;  %1651 = vmatprep.mubr.bf16.mxu1 %v5576_v0  ;;  %v1947_v43 = vunpack.c.l.bf16 %v5388_v42  ;;  %v1964_v26 = vunpack.c.h.bf16 %v5396_v21  ;;  %v1966_v27 = vunpack.c.h.bf16 %v5397_v24  ;;  %v1969_v30 = vunpack.c.l.bf16 %v5399_v29 }
 0x18e   :  { %v1037_v48 = vadd.f32 %v4894_v45, %v4782_v44  ;;  %v4784_v49 = vpop.f32.mrf.mxu0  ;;  %v5389_v44 = vld [vmem:[#allocation7 + $0x28] sm:$0xff] }
 0x18f   :  { %v4896_v50 = vpop.f32.mrf.mxu1  ;;  %v4785_v53 = vadd.f32 %v4784_v49, %v4783_v46  ;;  %v1949_v45 = vunpack.c.l.bf16 %v5389_v44  ;;  %v1948_v46 = vunpack.c.h.bf16 %v5388_v42 }
 0x190   :  { %v1083_v52 = vmax.f32 %v1037_v48, 0.0  ;;  %v4897_v54 = vadd.f32 %v4896_v50, %v4895_v47  ;;  %v4786_v55 = vpop.f32.mrf.mxu0  ;;  %v5681_v47 = vmul.f32 %v5663_v32, %v1945_v34  ;;  %v5390_v48 = vld [vmem:[#allocation7 + $0x30] sm:$0xff]  ;;  %v5391_v50 = vld [vmem:[#allocation7 + $0x38] sm:$0xff] }
 0x191   :  { %v4898_v56 = vpop.f32.mrf.mxu1  ;;  %v1951_v49 = vunpack.c.l.bf16 %v5390_v48 }
 0x192   :  { %v1101_v57 = vpack.c.bf16 %v1083_v52, %v1082_v51  ;;  %v4787_v58 = vpop.f32.mrf.mxu0  ;;  %v1042_v60 = vadd.f32 %v4897_v54, %v4785_v53  ;;  %v1953_v51 = vunpack.c.l.bf16 %v5391_v50  ;;  %v1952_v52 = vunpack.c.h.bf16 %v5390_v48  ;;  %v5392_v54 = vld [vmem:[#allocation7 + $0x40] sm:$0xff] }
 0x193   :  { %v4899_v59 = vpop.f32.mrf.mxu1  ;;  %v4788_v61 = vadd.f32 %v4787_v58, %v4786_v55  ;;  %v5684_v53 = vmul.f32 %v5663_v32, %v1944_v35  ;;  %v1955_v55 = vunpack.c.l.bf16 %v5392_v54  ;;  %v1950_v58 = vunpack.c.h.bf16 %v5389_v44 }
 0x194   :  { %v4900_v62 = vadd.f32 %v4899_v59, %v4898_v56  ;;  %1459 = vmatmul.mubr.bf16.gmra.mxu0 %v1101_v57  ;;  %1652 = vmatmul.mubr.bf16.gmra.mxu1 %v1101_v57  ;;  %v4789_v63 = vpop.f32.mrf.mxu0  ;;  %v1084_v5 = vmax.f32 %v1042_v60, 0.0  ;;  %v5393_v56 = vld [vmem:[#allocation7 + $0x48] sm:$0xff]  ;;  %v5292_v59 = vld [vmem:[#allocation11 + $0x70] sm:$0xff]  }
 0x195   :  { %v4901_v1 = vpop.f32.mrf.mxu1  ;;  %1468 = vmatprep.mubr.bf16.mxu0 %v5576_v0  ;;  %1661 = vmatprep.mubr.bf16.mxu1 %v5576_v0  ;;  %v1957_v57 = vunpack.c.l.bf16 %v5393_v56  ;;  %v5293_v60 = vld [vmem:[#allocation11 + $0xf0] sm:$0xff]  }
 0x196   :  { %v1045_v2 = vadd.f32 %v4900_v62, %v4788_v61  ;;  %v4790_v3 = vpop.f32.mrf.mxu0  ;;  %v1956_v61 = vunpack.c.h.bf16 %v5392_v54  ;;  %v1958_v62 = vunpack.c.h.bf16 %v5393_v56  ;;  %4909 = vmatprep.subr.bf16.mxu0 %v5292_v59  ;;  %5021 = vmatprep.subr.bf16.mxu1 %v5293_v60  ;;  %v5744_v54 = vmul.f32 %v5663_v32, %v1966_v27  ;;  %v5406_v27 = vld [vmem:[#allocation7 + $0xb0] sm:$0xff] }
 0x197   :  { %v4902_v4 = vpop.f32.mrf.mxu1  ;;  %v4791_v7 = vadd.f32 %v4790_v3, %v4789_v63  ;;  %v5394_v63 = vld [vmem:[#allocation7 + $0x50] sm:$0xff]  ;;  %v1970_v60 = vunpack.c.h.bf16 %v5399_v29 }
 0x198   :  { %v1085_v6 = vmax.f32 %v1045_v2, 0.0  ;;  %v4903_v8 = vadd.f32 %v4902_v4, %v4901_v1  ;;  %v4792_v9 = vpop.f32.mrf.mxu0  ;;  %v1959_v1 = vunpack.c.l.bf16 %v5394_v63  ;;  %v5687_v2 = vmul.f32 %v5663_v32, %v1946_v36  ;;  %v5294_v3 = vld [vmem:[#allocation11 + $0x30] sm:$0xff]   ;;  %v5400_v36 = vld [vmem:[#allocation7 + $0x80] sm:$0xff] }
 0x199   :  { %v4904_v10 = vpop.f32.mrf.mxu1  ;;  %v5295_v4 = vld [vmem:[#allocation11 + $0xb0] sm:$0xff]   ;;  %4910 = vmatpush3.bf16.msra.mxu0 %v5294_v3  ;;  %v1971_v42 = vunpack.c.l.bf16 %v5400_v36 }
 0x19a   :  { %v1102_v11 = vpack.c.bf16 %v1085_v6, %v1084_v5  ;;  %v4793_v12 = vpop.f32.mrf.mxu0  ;;  %v1050_v14 = vadd.f32 %v4903_v8, %v4791_v7  ;;  %v5690_v5 = vmul.f32 %v5663_v32, %v1947_v43  ;;  %v5693_v6 = vmul.f32 %v5663_v32, %v1949_v45  ;;  %v5395_v8 = vld [vmem:[#allocation7 + $0x58] sm:$0xff]  ;;  %5022 = vmatpush3.bf16.msra.mxu1 %v5295_v4  ;;  %v5401_v43 = vld [vmem:[#allocation7 + $0x88] sm:$0xff] }
 0x19b   :  { %v4905_v13 = vpop.f32.mrf.mxu1  ;;  %v4794_v15 = vadd.f32 %v4793_v12, %v4792_v9  ;;  %v5696_v7 = vmul.f32 %v5663_v32, %v1948_v46  ;;  %v1961_v9 = vunpack.c.l.bf16 %v5395_v8  ;;  %v5705_v12 = vmul.f32 %v5663_v32, %v1952_v52 }
 0x19c   :  { %v4906_v16 = vadd.f32 %v4905_v13, %v4904_v10  ;;  %1469 = vmatmul.mubr.bf16.gmra.mxu0 %v1102_v11  ;;  %1662 = vmatmul.mubr.bf16.gmra.mxu1 %v1102_v11  ;;  %v1086_v18 = vmax.f32 %v1050_v14, 0.0  ;;  %v5699_v10 = vmul.f32 %v5663_v32, %v1951_v49  ;;  %v5702_v11 = vmul.f32 %v5663_v32, %v1953_v51  ;;  %v5402_v49 = vld [vmem:[#allocation7 + $0x90] sm:$0xff] }
 0x19d   :  { %1478 = vmatprep.mubr.bf16.mxu0 %v5576_v0  ;;  %1671 = vmatprep.mubr.bf16.mxu1 %v5576_v0  ;;  %v1941_v0 = vunpack.c.l.bf16 %v5385_v28  ;;  %v1954_v13 = vunpack.c.h.bf16 %v5391_v50  ;;  %v5708_v14 = vmul.f32 %v5663_v32, %v1955_v55  ;;  %v5726_v23 = vmul.f32 %v5663_v32, %v1961_v9  ;;  %v5398_v28 = vld [vmem:[#allocation7 + $0x70] sm:$0xff]  ;;  %v5403_v55 = vld [vmem:[#allocation7 + $0x98] sm:$0xff] }
 0x19e   :  { %v1053_v17 = vadd.f32 %v4906_v16, %v4794_v15  ;;  %v5711_v15 = vmul.f32 %v5663_v32, %v1957_v57  ;;  %v1960_v16 = vunpack.c.h.bf16 %v5394_v63  ;;  %v1962_v33 = vunpack.c.h.bf16 %v5395_v8 }
 0x19f   :  { %v5669_v38 = vmul.f32 %v5663_v32, %v1941_v0  ;;  %v1967_v0 = vunpack.c.l.bf16 %v5398_v28  ;;  %v5729_v31 = vmul.f32 %v5663_v32, %v1954_v13  ;;  %v1968_v35 = vunpack.c.h.bf16 %v5398_v28 }
 0x1a0   :  { %v1087_v19 = vmax.f32 %v1053_v17, 0.0  ;;  %v5714_v17 = vmul.f32 %v5663_v32, %v1950_v58  ;;  %v5732_v34 = vmul.f32 %v5663_v32, %v1960_v16  ;;  %v1973_v44 = vunpack.c.l.bf16 %v5401_v43  ;;  %v5404_v16 = vld [vmem:[#allocation7 + $0xa0] sm:$0xff] }
 0x1a1   :  { %v5735_v45 = vmul.f32 %v5663_v32, %v1963_v22  ;;  %v1972_v46 = vunpack.c.h.bf16 %v5400_v36  ;;  %v1974_v48 = vunpack.c.h.bf16 %v5401_v43  ;;  %v1975_v50 = vunpack.c.l.bf16 %v5402_v49  ;;  %v5405_v22 = vld [vmem:[#allocation7 + $0xa8] sm:$0xff] }
 0x1a2   :  { %v1103_v20 = vpack.c.bf16 %v1087_v19, %v1086_v18  ;;  %v5717_v18 = vmul.f32 %v5663_v32, %v1956_v61  ;;  %v5720_v19 = vmul.f32 %v5663_v32, %v1958_v62  ;;  %v5738_v51 = vmul.f32 %v5663_v32, %v1965_v25 }
 0x1a3   :  { %v5741_v52 = vmul.f32 %v5663_v32, %v1964_v26  ;;  %v1977_v56 = vunpack.c.l.bf16 %v5403_v55  ;;  %v5747_v57 = vmul.f32 %v5663_v32, %v1967_v0  ;;  %v5750_v58 = vmul.f32 %v5663_v32, %v1969_v30  ;;  %v5407_v0 = vld [vmem:[#allocation7 + $0xb8] sm:$0xff] }
 0x1a4   :  { %1479 = vmatmul.mubr.bf16.gmra.mxu0 %v1103_v20  ;;  %1672 = vmatmul.mubr.bf16.gmra.mxu1 %v1103_v20  ;;  %v5723_v20 = vmul.f32 %v5663_v32, %v1959_v1  ;;  %v5753_v59 = vmul.f32 %v5663_v32, %v1962_v33  ;;  %v5756_v61 = vmul.f32 %v5663_v32, %v1968_v35  ;;  %v1976_v1 = vunpack.c.h.bf16 %v5402_v49 }
 0x1a5   :  { %v5759_v62 = vmul.f32 %v5663_v32, %v1971_v42  ;;  %v5762_v63 = vmul.f32 %v5663_v32, %v1973_v44  ;;  %v5767_v3 = vmul.f32 %v5663_v32, %v1972_v46  ;;  %v5770_v4 = vmul.f32 %v5663_v32, %v1974_v48  ;;  %v5408_v42 = vld [vmem:[#allocation7 + $0xc0] sm:$0xff]  ;;  %v5409_v46 = vld [vmem:[#allocation7 + $0xc8] sm:$0xff] }
 0x1a6   :  { %v5773_v8 = vmul.f32 %v5663_v32, %v1975_v50  ;;  %v1978_v9 = vunpack.c.h.bf16 %v5403_v55  ;;  %v5776_v13 = vmul.f32 %v5663_v32, %v1977_v56  ;;  %v1979_v21 = vunpack.c.l.bf16 %v5404_v16 }
 0x1a7   :  { %v1981_v24 = vunpack.c.l.bf16 %v5405_v22  ;;  %v1980_v25 = vunpack.c.h.bf16 %v5404_v16  ;;  %v1982_v26 = vunpack.c.h.bf16 %v5405_v22  ;;  %v1983_v28 = vunpack.c.l.bf16 %v5406_v27 }
 0x1a8   :  { %v1985_v29 = vunpack.c.l.bf16 %v5407_v0  ;;  %v5779_v30 = vmul.f32 %v5663_v32, %v1970_v60  ;;  %v5782_v33 = vmul.f32 %v5663_v32, %v1976_v1  ;;  %v1984_v35 = vunpack.c.h.bf16 %v5406_v27  ;;  %v5410_v1 = vld [vmem:[#allocation7 + $0xd0] sm:$0xff] }
 0x1a9   :  { %v1986_v36 = vunpack.c.h.bf16 %v5407_v0  ;;  %v1987_v43 = vunpack.c.l.bf16 %v5408_v42  ;;  %v5785_v44 = vmul.f32 %v5663_v32, %v1978_v9  ;;  %v1989_v48 = vunpack.c.l.bf16 %v5409_v46 }
 0x1aa   :  { %7228 = vst [vmem:[#allocation19_spill] sm:$0xff] %v5779_v30  ;;  %v1988_v49 = vunpack.c.h.bf16 %v5408_v42  ;;  %v1990_v50 = vunpack.c.h.bf16 %v5409_v46  ;;  %v5788_v55 = vmul.f32 %v5663_v32, %v1979_v21  ;;  %v5791_v56 = vmul.f32 %v5663_v32, %v1981_v24  ;;  %v5411_v21 = vld [vmem:[#allocation7 + $0xd8] sm:$0xff]  ;;  %v5296_v42 = vld [vmem:[#allocation11 + $0x68] sm:$0xff]  }
 0x1ab   :  { %7229 = vst [vmem:[#allocation20_spill] sm:$0xff] %v5785_v44  ;;  %v5794_v60 = vmul.f32 %v5663_v32, %v1980_v25  ;;  %v1991_v16 = vunpack.c.l.bf16 %v5410_v1  ;;  %v5797_v22 = vmul.f32 %v5663_v32, %v1982_v26  ;;  %v5800_v9 = vmul.f32 %v5663_v32, %v1983_v28  ;;  %v5297_v24 = vld [vmem:[#allocation11 + $0xe8] sm:$0xff]   ;;  %4911 = vmatprep.subr.bf16.mxu0 %v5296_v42 }
 0x1ac   :  { %7230 = vst [vmem:[#allocation21_spill] sm:$0xff] %v5788_v55  ;;  %7231 = vst [vmem:[#allocation22_spill] sm:$0xff] %v5791_v56  ;;  %v5803_v27 = vmul.f32 %v5663_v32, %v1985_v29  ;;  %v1993_v0 = vunpack.c.l.bf16 %v5411_v21  ;;  %v5806_v46 = vmul.f32 %v5663_v32, %v1984_v35  ;;  %v5809_v25 = vmul.f32 %v5663_v32, %v1986_v36  ;;  %v5299_v28 = vld [vmem:[#allocation11 + $0xa8] sm:$0xff]  }
 0x1ad   :  { %7232 = vst [vmem:[#allocation23_spill] sm:$0xff] %v5794_v60  ;;  %7233 = vst [vmem:[#allocation24_spill] sm:$0xff] %v5797_v22  ;;  %v5812_v60 = vmul.f32 %v5663_v32, %v1987_v43  ;;  %v1992_v26 = vunpack.c.h.bf16 %v5410_v1  ;;  %v5298_v22 = vld [vmem:[#allocation11 + $0x28] sm:$0xff]   ;;  %v5818_v29 = vmul.f32 %v5663_v32, %v1989_v48  ;;  %v5824_v35 = vmul.f32 %v5663_v32, %v1990_v50  ;;  %v5412_v1 = vld [vmem:[#allocation7 + $0xe0] sm:$0xff] }
 0x1ae   :  { %7234 = vst [vmem:[#allocation25_spill] sm:$0xff] %v5800_v9  ;;  %7235 = vst [vmem:[#allocation26_spill] sm:$0xff] %v5803_v27  ;;  %v5815_v9 = vstv %s5764_s4  ;;  %v5821_v27 = vmul.f32 %v5663_v32, %v1988_v49  ;;  %5023 = vmatprep.subr.bf16.mxu1 %v5297_v24  ;;  %v5827_v36 = vmul.f32 %v5663_v32, %v1991_v16  ;;  %v1994_v43 = vunpack.c.h.bf16 %v5411_v21  ;;  %v5415_v24 = vld [vmem:[#allocation7 + $0xf8] sm:$0xff]  ;;  %v5417_v56 = vld [vmem:[#allocation7 + $0x108] sm:$0xff] }
 0x1af   :  { %7236 = vst [vmem:[#allocation27_spill] sm:$0xff] %v5806_v46  ;;  %7237 = vst [vmem:[#allocation28_spill] sm:$0xff] %v5809_v25  ;;  %v5413_v25 = vld [vmem:[#allocation7 + $0xe8] sm:$0xff]  ;;  %4912 = vmatpush3.bf16.msra.mxu0 %v5298_v22  ;;  %5024 = vmatpush3.bf16.msra.mxu1 %v5299_v28  ;;  %v5830_v48 = vmul.f32 %v5663_v32, %v1993_v0  ;;  %v1996_v49 = vunpack.c.h.bf16 %v5412_v1  ;;  %v5833_v42 = vmul.f32 %v5663_v32, %v1992_v26  ;;  %v5418_v26 = vld [vmem:[#allocation7 + $0x110] sm:$0xff] }
 0x1b0   :  { %7238 = vst [vmem:[#allocation29_spill] sm:$0xff] %v5812_v60  ;;  %7239 = vst [vmem:[#allocation30_spill] sm:$0xff] %v5818_v29  ;;  %v1995_v60 = vunpack.c.l.bf16 %v5412_v1  ;;  %v1997_v46 = vunpack.c.l.bf16 %v5413_v25  ;;  %v5414_v29 = vld [vmem:[#allocation7 + $0xf0] sm:$0xff]  ;;  %v2001_v16 = vunpack.c.l.bf16 %v5415_v24  ;;  %v2002_v21 = vunpack.c.h.bf16 %v5415_v24  ;;  %v5433_v55 = vld [vmem:[#allocation7 + $0x188] sm:$0xff] }
 0x1b1   :  { %7240 = vst [vmem:[#allocation31_spill] sm:$0xff] %v5821_v27  ;;  %7241 = vst [vmem:[#allocation32_spill] sm:$0xff] %v5824_v35  ;;  %v1998_v27 = vunpack.c.h.bf16 %v5413_v25  ;;  %v1999_v50 = vunpack.c.l.bf16 %v5414_v29  ;;  %v5416_v35 = vld [vmem:[#allocation7 + $0x100] sm:$0xff]  ;;  %v2005_v44 = vunpack.c.l.bf16 %v5417_v56  ;;  %v2006_v28 = vunpack.c.h.bf16 %v5417_v56  ;;  %v5419_v56 = vld [vmem:[#allocation7 + $0x118] sm:$0xff] }
 0x1b2   :  { %7242 = vst [vmem:[#allocation33_spill] sm:$0xff] %v5827_v36  ;;  %7243 = vst [vmem:[#allocation34_spill] sm:$0xff] %v5830_v48  ;;  %v2000_v36 = vunpack.c.h.bf16 %v5414_v29  ;;  %v2003_v30 = vunpack.c.l.bf16 %v5416_v35  ;;  %v2004_v22 = vunpack.c.h.bf16 %v5416_v35  ;;  %v5836_v0 = vmul.f32 %v5663_v32, %v1994_v43 }
 0x1b3   :  { %7244 = vst [vmem:[#allocation35_spill] sm:$0xff] %v5833_v42  ;;  %v5839_v25 = vmul.f32 %v5663_v32, %v1995_v60  ;;  %v5842_v1 = vmul.f32 %v5663_v32, %v1997_v46  ;;  %v2007_v42 = vunpack.c.l.bf16 %v5418_v26  ;;  %v5845_v29 = vmul.f32 %v5663_v32, %v1996_v49 }
 0x1b4   :  { %7245 = vst [vmem:[#allocation36_spill] sm:$0xff] %v5836_v0  ;;  %v5848_v24 = vmul.f32 %v5663_v32, %v1998_v27  ;;  %v5851_v35 = vmul.f32 %v5663_v32, %v1999_v50  ;;  %v2009_v43 = vunpack.c.l.bf16 %v5419_v56  ;;  %v5854_v0 = vmul.f32 %v5663_v32, %v2001_v16 }
 0x1b5   :  { %7246 = vst [vmem:[#allocation37_spill] sm:$0xff] %v5839_v25  ;;  %7247 = vst [vmem:[#allocation38_spill] sm:$0xff] %v5842_v1  ;;  %v5857_v60 = vmul.f32 %v5663_v32, %v2000_v36  ;;  %v5860_v46 = vmul.f32 %v5663_v32, %v2002_v21  ;;  %v2008_v1 = vunpack.c.h.bf16 %v5418_v26  ;;  %v5863_v49 = vmul.f32 %v5663_v32, %v2003_v30 }
 0x1b6   :  { %7248 = vst [vmem:[#allocation39_spill] sm:$0xff] %v5845_v29  ;;  %7249 = vst [vmem:[#allocation40_spill] sm:$0xff] %v5848_v24  ;;  %v5866_v27 = vmul.f32 %v5663_v32, %v2005_v44  ;;  %v5869_v50 = vmul.f32 %v5663_v32, %v2004_v22  ;;  %v5872_v24 = vmul.f32 %v5663_v32, %v2006_v28  ;;  %v2010_v36 = vunpack.c.h.bf16 %v5419_v56  ;;  %v5423_v28 = vld [vmem:[#allocation7 + $0x138] sm:$0xff] }
 0x1b7   :  { %7250 = vst [vmem:[#allocation41_spill] sm:$0xff] %v5851_v35  ;;  %7251 = vst [vmem:[#allocation42_spill] sm:$0xff] %v5854_v0  ;;  %v5875_v16 = vmul.f32 %v5663_v32, %v2007_v42  ;;  %v5878_v30 = vmul.f32 %v5663_v32, %v2009_v43  ;;  %v5881_v22 = vmul.f32 %v5663_v32, %v2008_v1  ;;  %v2018_v42 = vunpack.c.h.bf16 %v5423_v28  ;;  %v5425_v35 = vld [vmem:[#allocation7 + $0x148] sm:$0xff]  ;;  %v5426_v1 = vld [vmem:[#allocation7 + $0x150] sm:$0xff] }
 0x1b8   :  { %7252 = vst [vmem:[#allocation43_spill] sm:$0xff] %v5857_v60  ;;  %7253 = vst [vmem:[#allocation44_spill] sm:$0xff] %v5860_v46  ;;  %v5420_v60 = vld [vmem:[#allocation7 + $0x120] sm:$0xff]  ;;  %v5421_v46 = vld [vmem:[#allocation7 + $0x128] sm:$0xff]  ;;  %v2021_v29 = vunpack.c.l.bf16 %v5425_v35  ;;  %v2022_v48 = vunpack.c.h.bf16 %v5425_v35  ;;  %v5884_v43 = vmul.f32 %v5663_v32, %v2010_v36 }
 0x1b9   :  { %7254 = vst [vmem:[#allocation45_spill] sm:$0xff] %v5863_v49  ;;  %7255 = vst [vmem:[#allocation46_spill] sm:$0xff] %v5866_v27  ;;  %v2011_v21 = vunpack.c.l.bf16 %v5420_v60  ;;  %v2013_v26 = vunpack.c.l.bf16 %v5421_v46  ;;  %v2012_v49 = vunpack.c.h.bf16 %v5420_v60  ;;  %v2014_v44 = vunpack.c.h.bf16 %v5421_v46  ;;  %v5422_v27 = vld [vmem:[#allocation7 + $0x130] sm:$0xff]  ;;  %v5427_v35 = vld [vmem:[#allocation7 + $0x158] sm:$0xff] }
 0x1ba   :  { %7256 = vst [vmem:[#allocation47_spill] sm:$0xff] %v5869_v50  ;;  %7257 = vst [vmem:[#allocation48_spill] sm:$0xff] %v5872_v24  ;;  %v2015_v0 = vunpack.c.l.bf16 %v5422_v27  ;;  %v2017_v24 = vunpack.c.l.bf16 %v5423_v28  ;;  %v2016_v50 = vunpack.c.h.bf16 %v5422_v27  ;;  %v2025_v36 = vunpack.c.l.bf16 %v5427_v35 }
 0x1bb   :  { %7258 = vst [vmem:[#allocation49_spill] sm:$0xff] %v5875_v16  ;;  %7259 = vst [vmem:[#allocation50_spill] sm:$0xff] %v5878_v30  ;;  %v5424_v16 = vld [vmem:[#allocation7 + $0x140] sm:$0xff]  ;;  %v5887_v60 = vmul.f32 %v5663_v32, %v2011_v21  ;;  %v5890_v46 = vmul.f32 %v5663_v32, %v2013_v26  ;;  %v5893_v27 = vmul.f32 %v5663_v32, %v2012_v49 }
 0x1bc   :  { %7260 = vst [vmem:[#allocation51_spill] sm:$0xff] %v5881_v22  ;;  %v2019_v56 = vunpack.c.l.bf16 %v5424_v16  ;;  %v2020_v25 = vunpack.c.h.bf16 %v5424_v16  ;;  %7261 = vst [vmem:[#allocation52_spill] sm:$0xff] %v5884_v43  ;;  %v2023_v22 = vunpack.c.l.bf16 %v5426_v1  ;;  %v5896_v28 = vmul.f32 %v5663_v32, %v2014_v44 }
 0x1bd   :  { %7262 = vst [vmem:[#allocation53_spill] sm:$0xff] %v5887_v60  ;;  %7263 = vst [vmem:[#allocation54_spill] sm:$0xff] %v5890_v46  ;;  %v5899_v16 = vmul.f32 %v5663_v32, %v2015_v0  ;;  %v5902_v43 = vmul.f32 %v5663_v32, %v2017_v24  ;;  %v5905_v21 = vmul.f32 %v5663_v32, %v2016_v50  ;;  %v2024_v46 = vunpack.c.h.bf16 %v5426_v1  ;;  %v5432_v60 = vld [vmem:[#allocation7 + $0x180] sm:$0xff] }
 0x1be   :  { %7264 = vst [vmem:[#allocation55_spill] sm:$0xff] %v5893_v27  ;;  %7265 = vst [vmem:[#allocation56_spill] sm:$0xff] %v5896_v28  ;;  %v5908_v26 = vmul.f32 %v5663_v32, %v2018_v42  ;;  %v5911_v49 = vmul.f32 %v5663_v32, %v2019_v56  ;;  %v5914_v44 = vmul.f32 %v5663_v32, %v2021_v29  ;;  %v2026_v50 = vunpack.c.h.bf16 %v5427_v35  ;;  %v5301_v56 = vld [vmem:[#allocation11 + $0xe0] sm:$0xff]  }
 0x1bf   :  { %7266 = vst [vmem:[#allocation57_spill] sm:$0xff] %v5899_v16  ;;  %7267 = vst [vmem:[#allocation58_spill] sm:$0xff] %v5902_v43  ;;  %v5917_v0 = vmul.f32 %v5663_v32, %v2020_v25  ;;  %v5920_v28 = vmul.f32 %v5663_v32, %v2022_v48  ;;  %v5923_v24 = vmul.f32 %v5663_v32, %v2023_v22  ;;  %v5300_v43 = vld [vmem:[#allocation11 + $0x60] sm:$0xff]   ;;  %v5430_v25 = vld [vmem:[#allocation7 + $0x170] sm:$0xff]  ;;  %5025 = vmatprep.subr.bf16.mxu1 %v5301_v56 }
 0x1c0   :  { %7268 = vst [vmem:[#allocation59_spill] sm:$0xff] %v5905_v21  ;;  %7269 = vst [vmem:[#allocation60_spill] sm:$0xff] %v5908_v26  ;;  %v5428_v21 = vld [vmem:[#allocation7 + $0x160] sm:$0xff]  ;;  %v5429_v26 = vld [vmem:[#allocation7 + $0x168] sm:$0xff]  ;;  %4913 = vmatprep.subr.bf16.mxu0 %v5300_v43  ;;  %v2035_v30 = vunpack.c.l.bf16 %v5432_v60 }
 0x1c1   :  { %7270 = vst [vmem:[#allocation61_spill] sm:$0xff] %v5911_v49  ;;  %7271 = vst [vmem:[#allocation62_spill] sm:$0xff] %v5914_v44  ;;  %v2027_v42 = vunpack.c.l.bf16 %v5428_v21  ;;  %v2029_v1 = vunpack.c.l.bf16 %v5429_v26  ;;  %v5926_v49 = vmul.f32 %v5663_v32, %v2025_v36  ;;  %v2028_v29 = vunpack.c.h.bf16 %v5428_v21  ;;  %v5302_v16 = vld [vmem:[#allocation11 + $0x20] sm:$0xff]   ;;  %v5431_v22 = vld [vmem:[#allocation7 + $0x178] sm:$0xff] }
 0x1c2   :  { %7272 = vst [vmem:[#allocation63_spill] sm:$0xff] %v5917_v0  ;;  %7273 = vst [vmem:[#allocation64_spill] sm:$0xff] %v5920_v28  ;;  %v2030_v44 = vunpack.c.h.bf16 %v5429_v26  ;;  %v2031_v0 = vunpack.c.l.bf16 %v5430_v25  ;;  %v5303_v48 = vld [vmem:[#allocation11 + $0xa0] sm:$0xff]   ;;  %v5929_v28 = vmul.f32 %v5663_v32, %v2024_v46  ;;  %v2033_v35 = vunpack.c.l.bf16 %v5431_v22  ;;  %4914 = vmatpush3.bf16.msra.mxu0 %v5302_v16 }
 0x1c3   :  { %7274 = vst [vmem:[#allocation65_spill] sm:$0xff] %v5923_v24  ;;  %7275 = vst [vmem:[#allocation66_spill] sm:$0xff] %v5926_v49  ;;  %v2032_v24 = vunpack.c.h.bf16 %v5430_v25  ;;  %v2034_v27 = vunpack.c.h.bf16 %v5431_v22  ;;  %v2037_v36 = vunpack.c.l.bf16 %v5433_v55  ;;  %v2036_v49 = vunpack.c.h.bf16 %v5432_v60  ;;  %5026 = vmatpush3.bf16.msra.mxu1 %v5303_v48  ;;  %v5434_v25 = vld [vmem:[#allocation7 + $0x190] sm:$0xff]  ;;  %v5435_v60 = vld [vmem:[#allocation7 + $0x198] sm:$0xff] }
 0x1c4   :  { %7276 = vst [vmem:[#allocation67_spill] sm:$0xff] %v5929_v28  ;;  %v2038_v21 = vunpack.c.h.bf16 %v5433_v55  ;;  %v5932_v26 = vmul.f32 %v5663_v32, %v2026_v50  ;;  %v5935_v46 = vmul.f32 %v5663_v32, %v2027_v42  ;;  %v5938_v28 = vmul.f32 %v5663_v32, %v2029_v1 }
 0x1c5   :  { %v2039_v43 = vunpack.c.l.bf16 %v5434_v25  ;;  %v5941_v56 = vmul.f32 %v5663_v32, %v2028_v29  ;;  %v5944_v22 = vmul.f32 %v5663_v32, %v2030_v44  ;;  %v5947_v55 = vmul.f32 %v5663_v32, %v2031_v0 }
 0x1c6   :  { %7277 = vst [vmem:[#allocation68_spill] sm:$0xff] %v5932_v26  ;;  %7278 = vst [vmem:[#allocation69_spill] sm:$0xff] %v5938_v28  ;;  %v2041_v16 = vunpack.c.l.bf16 %v5435_v60  ;;  %v5950_v50 = vmul.f32 %v5663_v32, %v2033_v35  ;;  %v5953_v42 = vmul.f32 %v5663_v32, %v2032_v24  ;;  %v5956_v1 = vmul.f32 %v5663_v32, %v2034_v27 }
 0x1c7   :  { %7279 = vst [vmem:[#allocation70_spill] sm:$0xff] %v5941_v56  ;;  %7280 = vst [vmem:[#allocation71_spill] sm:$0xff] %v5944_v22  ;;  %v2040_v48 = vunpack.c.h.bf16 %v5434_v25  ;;  %v5959_v29 = vmul.f32 %v5663_v32, %v2035_v30  ;;  %v5962_v44 = vmul.f32 %v5663_v32, %v2037_v36  ;;  %v5965_v0 = vmul.f32 %v5663_v32, %v2036_v49  ;;  %v5979_v56 = vld [vmem:[#allocation7 + $0x1b0] sm:$0xff] }
 0x1c8   :  { %7281 = vst [vmem:[#allocation72_spill] sm:$0xff] %v5947_v55  ;;  %7282 = vst [vmem:[#allocation73_spill] sm:$0xff] %v5950_v50  ;;  %v5968_v22 = vmul.f32 %v5663_v32, %v2038_v21  ;;  %v5971_v24 = vmul.f32 %v5663_v32, %v2039_v43  ;;  %v2042_v27 = vunpack.c.h.bf16 %v5435_v60  ;;  %v5974_v36 = vmul.f32 %v5663_v32, %v2041_v16  ;;  %v5439_v60 = vld [vmem:[#allocation7 + $0x1b8] sm:$0xff] }
 0x1c9   :  { %7283 = vst [vmem:[#allocation74_spill] sm:$0xff] %v5953_v42  ;;  %7284 = vst [vmem:[#allocation75_spill] sm:$0xff] %v5956_v1  ;;  %v5436_v1 = vld [vmem:[#allocation7 + $0x1a0] sm:$0xff]  ;;  %v5437_v42 = vld [vmem:[#allocation7 + $0x1a8] sm:$0xff]  ;;  %v5977_v21 = vmul.f32 %v5663_v32, %v2040_v48  ;;  %v2047_v43 = vunpack.c.l.bf16 %v5979_v56 }
 0x1ca   :  { %7285 = vst [vmem:[#allocation76_spill] sm:$0xff] %v5959_v29  ;;  %7286 = vst [vmem:[#allocation77_spill] sm:$0xff] %v5962_v44  ;;  %v2043_v25 = vunpack.c.l.bf16 %v5436_v1  ;;  %v2045_v30 = vunpack.c.l.bf16 %v5437_v42  ;;  %v2044_v49 = vunpack.c.h.bf16 %v5436_v1  ;;  %v5985_v26 = vmul.f32 %v5663_v32, %v2042_v27 }
 0x1cb   :  { %7287 = vst [vmem:[#allocation78_spill] sm:$0xff] %v5965_v0  ;;  %7288 = vst [vmem:[#allocation79_spill] sm:$0xff] %v5968_v22  ;;  %v2046_v22 = vunpack.c.h.bf16 %v5437_v42 }
 0x1cc   :  { %7289 = vst [vmem:[#allocation80_spill] sm:$0xff] %v5971_v24  ;;  %7290 = vst [vmem:[#allocation81_spill] sm:$0xff] %v5974_v36  ;;  %v2049_v24 = vunpack.c.l.bf16 %v5439_v60  ;;  %v5988_v48 = vmul.f32 %v5663_v32, %v2043_v25  ;;  %v5991_v42 = vmul.f32 %v5663_v32, %v2045_v30 }
 0x1cd   :  { %7291 = vst [vmem:[#allocation82_spill] sm:$0xff] %v5977_v21  ;;  %v5994_v21 = vmul.f32 %v5663_v32, %v2044_v49 }
 0x1ce   :  { %7292 = vst [vmem:[#allocation83_spill] sm:$0xff] %v5991_v42 }
 0x1cf   :  { %7293 = vst [vmem:[#allocation84_spill] sm:$0xff] %v5994_v21 }
 0x1ec   :  { %v1330_v35 = vpop.f32.mrf.mxu0  ;;  %v1523_v50 = vpop.f32.mrf.mxu1 }
 0x1ed   :  { %v1682_v29 = vmax.f32 %v1330_v35, 0.0  ;;  %v1684_v55 = vmax.f32 %v1523_v50, 0.0 }
 0x1ee   :  { %v1332_v0 = vpop.f32.mrf.mxu0  ;;  %v1525_v44 = vpop.f32.mrf.mxu1 }
 0x1ef   :  { %v1811_v28 = vmul.f32 %v5815_v9, %v1682_v29  ;;  %v1813_v50 = vmul.f32 %v5815_v9, %v1684_v55  ;;  %v1683_v35 = vmax.f32 %v1332_v0, 0.0  ;;  %v1685_v16 = vmax.f32 %v1525_v44, 0.0 }
 0x1f0   :  { %v1334_v36 = vpop.f32.mrf.mxu0  ;;  %v1527_v1 = vpop.f32.mrf.mxu1  ;;  %v5999_v44 = vmul.f32 %v5663_v32, %v2046_v22  ;;  %v6002_v0 = vmul.f32 %v5663_v32, %v2047_v43  ;;  %v6014_v22 = vmul.f32 %v5663_v32, %v2049_v24 }
 0x1f1   :  { %v1812_v29 = vmul.f32 %v5815_v9, %v1683_v35  ;;  %v1814_v55 = vmul.f32 %v5815_v9, %v1685_v16  ;;  %v6005_v27 = vadd.f32 %v5666_v37, %v1811_v28  ;;  %v6008_v25 = vadd.f32 %v5669_v38, %v1813_v50 }
 0x1f2   :  { %7294 = vst [vmem:[#allocation85_spill] sm:$0xff] %v6002_v0  ;;  %v1686_v30 = vmax.f32 %v1334_v36, 0.0  ;;  %v1688_v60 = vmax.f32 %v1527_v1, 0.0  ;;  %v1336_v49 = vpop.f32.mrf.mxu0  ;;  %v1529_v21 = vpop.f32.mrf.mxu1  ;;  %7298 = vst [vmem:[#allocation89_spill] sm:$0xff] %v6014_v22 }
 0x1f3   :  { %7295 = vst [vmem:[#allocation86_spill] sm:$0xff] %v6005_v27  ;;  %7296 = vst [vmem:[#allocation87_spill] sm:$0xff] %v6008_v25  ;;  %v6011_v35 = vadd.f32 %v5672_v39, %v1812_v29  ;;  %v1687_v16 = vmax.f32 %v1336_v49, 0.0  ;;  %v1689_v42 = vmax.f32 %v1529_v21, 0.0  ;;  %v6019_v38 = vadd.f32 %v5675_v40, %v1814_v55 }
 0x1f4   :  { %v1815_v43 = vmul.f32 %v5815_v9, %v1686_v30  ;;  %v1817_v37 = vmul.f32 %v5815_v9, %v1688_v60  ;;  %v1340_v28 = vpop.f32.mrf.mxu0  ;;  %v1533_v0 = vpop.f32.mrf.mxu1  ;;  %v2324_v60 = vmul.f32 %v6005_v27, %v6005_v27  ;;  %v2326_v55 = vmul.f32 %v6008_v25, %v6008_v25 }
 0x1f5   :  { %7297 = vst [vmem:[#allocation88_spill] sm:$0xff] %v6011_v35  ;;  %7299 = vst [vmem:[#allocation90_spill] sm:$0xff] %v6019_v38  ;;  %v1816_v50 = vmul.f32 %v5815_v9, %v1687_v16  ;;  %v1818_v39 = vmul.f32 %v5815_v9, %v1689_v42  ;;  %v1690_v1 = vmax.f32 %v1340_v28, 0.0  ;;  %v1692_v21 = vmax.f32 %v1533_v0, 0.0 }
 0x1f6   :  { %v6025_v24 = vadd.f32 %v5678_v41, %v1815_v43  ;;  %v1342_v29 = vpop.f32.mrf.mxu0  ;;  %v1535_v30 = vpop.f32.mrf.mxu1  ;;  %v2325_v40 = vmul.f32 %v6011_v35, %v6011_v35  ;;  %v6034_v49 = vadd.f32 %v5681_v47, %v1817_v37  ;;  %v2327_v27 = vmul.f32 %v6019_v38, %v6019_v38 }
 0x1f7   :  { %v6037_v42 = vadd.f32 %v5684_v53, %v1816_v50  ;;  %v1819_v41 = vmul.f32 %v5815_v9, %v1690_v1  ;;  %v1691_v0 = vmax.f32 %v1342_v29, 0.0  ;;  %v1821_v16 = vmul.f32 %v5815_v9, %v1692_v21 }
 0x1f8   :  { %7300 = vst [vmem:[#allocation91_spill] sm:$0xff] %v6025_v24  ;;  %v1693_v43 = vmax.f32 %v1535_v30, 0.0  ;;  %v1344_v28 = vpop.f32.mrf.mxu0  ;;  %v1537_v36 = vpop.f32.mrf.mxu1  ;;  %v2452_v35 = vadd.f32 %v2325_v40, %v2324_v60  ;;  %v2328_v25 = vmul.f32 %v6025_v24, %v6025_v24  ;;  %v6047_v53 = vadd.f32 %v5687_v2, %v1818_v39  ;;  %v5304_v60 = vld [vmem:[#allocation11 + $0x58] sm:$0xff]  }
 0x1f9   :  { %7301 = vst [vmem:[#allocation92_spill] sm:$0xff] %v6037_v42  ;;  %v1820_v47 = vmul.f32 %v5815_v9, %v1691_v0  ;;  %v1694_v37 = vmax.f32 %v1344_v28, 0.0  ;;  %v6050_v50 = vadd.f32 %v5690_v5, %v1819_v41  ;;  %v1696_v1 = vmax.f32 %v1537_v36, 0.0  ;;  %v5305_v40 = vld [vmem:[#allocation11 + $0xd8] sm:$0xff]   ;;  %4915 = vmatprep.subr.bf16.mxu0 %v5304_v60 }
 0x1fa   :  { %v1346_v21 = vpop.f32.mrf.mxu0  ;;  %v1539_v29 = vpop.f32.mrf.mxu1  ;;  %v2453_v30 = vadd.f32 %v2452_v35, %v2326_v55  ;;  %v2329_v38 = vmul.f32 %v6037_v42, %v6037_v42  ;;  %v1822_v24 = vmul.f32 %v5815_v9, %v1693_v43  ;;  %v6057_v2 = vadd.f32 %v5693_v6, %v1821_v16  ;;  %v5306_v41 = vld [vmem:[#allocation11 + $0x18] sm:$0xff]   ;;  %5027 = vmatprep.subr.bf16.mxu1 %v5305_v40 }
 0x1fb   :  { %v1823_v0 = vmul.f32 %v5815_v9, %v1694_v37  ;;  %v1695_v28 = vmax.f32 %v1346_v21, 0.0  ;;  %v1697_v22 = vmax.f32 %v1539_v29, 0.0  ;;  %v6060_v5 = vadd.f32 %v5696_v7, %v1820_v47  ;;  %v5307_v42 = vld [vmem:[#allocation11 + $0x98] sm:$0xff]   ;;  %4916 = vmatpush3.bf16.msra.mxu0 %v5306_v41 }
 0x1fc   :  { %v1825_v36 = vmul.f32 %v5815_v9, %v1696_v1  ;;  %v1350_v35 = vpop.f32.mrf.mxu0  ;;  %v1543_v39 = vpop.f32.mrf.mxu1  ;;  %v2454_v55 = vadd.f32 %v2453_v30, %v2327_v27  ;;  %v2330_v21 = vmul.f32 %v6034_v49, %v6034_v49  ;;  %v2331_v6 = vmul.f32 %v6047_v53, %v6047_v53  ;;  %5028 = vmatpush3.bf16.msra.mxu1 %v5307_v42 }
 0x1fd   :  { %v6064_v43 = vadd.f32 %v5699_v10, %v1823_v0  ;;  %v1698_v37 = vmax.f32 %v1350_v35, 0.0  ;;  %v1824_v7 = vmul.f32 %v5815_v9, %v1695_v28  ;;  %v6072_v16 = vmul.f32 %v5815_v9, %v1697_v22 }
 0x1fe   :  { %v1700_v27 = vmax.f32 %v1543_v39, 0.0  ;;  %2455 = vadd.xlane.f32.xlu0 %v2454_v55  ;;  %v1352_v47 = vpop.f32.mrf.mxu0  ;;  %v1545_v1 = vpop.f32.mrf.mxu1  ;;  %v2457_v29 = vadd.f32 %v2329_v38, %v2328_v25  ;;  %v6075_v10 = vadd.f32 %v5702_v11, %v1825_v36  ;;  %v6079_v0 = vadd.f32 %v5714_v17, %v1822_v24 }
 0x1ff   :  { %v1827_v30 = vmul.f32 %v5815_v9, %v1698_v37  ;;  %v1699_v60 = vmax.f32 %v1352_v47, 0.0  ;;  %v6083_v22 = vmul.f32 %v6064_v43, %v6064_v43  ;;  %v1701_v28 = vmax.f32 %v1545_v1, 0.0 }
 0x200   :  { %v1829_v40 = vmul.f32 %v5815_v9, %v1700_v27  ;;  %v1354_v35 = vpop.f32.mrf.mxu0  ;;  %v1547_v25 = vpop.f32.mrf.mxu1  ;;  %v2458_v38 = vadd.f32 %v2457_v29, %v2330_v21  ;;  %v6091_v17 = vadd.f32 %v5705_v12, %v1824_v7  ;;  %v2332_v27 = vmul.f32 %v6050_v50, %v6050_v50 }
 0x201   :  { %v6087_v11 = vadd.f32 %v5708_v14, %v1827_v30  ;;  %v1828_v36 = vmul.f32 %v5815_v9, %v1699_v60  ;;  %v1702_v39 = vmax.f32 %v1354_v35, 0.0  ;;  %v1704_v55 = vmax.f32 %v1547_v25, 0.0 }
 0x202   :  { %v1830_v24 = vmul.f32 %v5815_v9, %v1701_v28  ;;  %v2459_v42 = vadd.f32 %v2458_v38, %v2331_v6  ;;  %v1356_v41 = vpop.f32.mrf.mxu0  ;;  %v1549_v37 = vpop.f32.mrf.mxu1  ;;  %v2333_v1 = vmul.f32 %v6060_v5, %v6060_v5  ;;  %v6108_v6 = vadd.f32 %v5711_v15, %v1829_v40 }
 0x203   :  { %7302 = vst [vmem:[#allocation93_spill] sm:$0xff] %v6087_v11  ;;  %v6097_v21 = vadd.f32 %v5717_v18, %v1828_v36  ;;  %v1831_v14 = vmul.f32 %v5815_v9, %v1702_v39  ;;  %v1833_v47 = vmul.f32 %v5815_v9, %v1704_v55  ;;  %v6105_v12 = vmul.f32 %v6087_v11, %v6087_v11 }
 0x204   :  { %7304 = vst [vmem:[#allocation95_spill] sm:$0xff] %v6108_v6  ;;  %2460 = vadd.xlane.f32.xlu0 %v2459_v42  ;;  %v1703_v7 = vmax.f32 %v1356_v41, 0.0  ;;  %v1705_v29 = vmax.f32 %v1549_v37, 0.0  ;;  %v1360_v30 = vpop.f32.mrf.mxu0  ;;  %v1553_v18 = vpop.f32.mrf.mxu1  ;;  %v6111_v60 = vadd.f32 %v5720_v19, %v1830_v24  ;;  %v2334_v25 = vmul.f32 %v6057_v2, %v6057_v2 }
 0x205   :  { %7303 = vst [vmem:[#allocation94_spill] sm:$0xff] %v6097_v21  ;;  %v6114_v28 = vadd.f32 %v5723_v20, %v1831_v14  ;;  %v1706_v35 = vmax.f32 %v1360_v30, 0.0  ;;  %v2341_v38 = vmul.f32 %v6097_v21, %v6097_v21  ;;  %v6121_v15 = vadd.f32 %v5726_v23, %v1833_v47  ;;  %v5311_v21 = vld [vmem:[#allocation11 + $0x90] sm:$0xff]  }
 0x206   :  { %v1832_v40 = vmul.f32 %v5815_v9, %v1703_v7  ;;  %v1708_v36 = vmax.f32 %v1553_v18, 0.0  ;;  %v1362_v39 = vpop.f32.mrf.mxu0  ;;  %v1555_v55 = vpop.f32.mrf.mxu1  ;;  %v6125_v19 = vmul.f32 %v5815_v9, %v1705_v29  ;;  %v2462_v24 = vadd.f32 %v2333_v1, %v2332_v27 }
 0x207   :  { %7305 = vst [vmem:[#allocation96_spill] sm:$0xff] %v6114_v28  ;;  %7306 = vst [vmem:[#allocation97_spill] sm:$0xff] %v6121_v15  ;;  %v1835_v20 = vmul.f32 %v5815_v9, %v1706_v35  ;;  %v1707_v42 = vmax.f32 %v1362_v39, 0.0  ;;  %v6130_v41 = vmul.f32 %v6114_v28, %v6114_v28  ;;  %v2335_v23 = vmul.f32 %v6079_v0, %v6079_v0 }
 0x208   :  { %v1837_v37 = vmul.f32 %v5815_v9, %v1708_v36  ;;  %v1709_v14 = vmax.f32 %v1555_v55, 0.0  ;;  %v1364_v47 = vpop.f32.mrf.mxu0  ;;  %v1557_v7 = vpop.f32.mrf.mxu1  ;;  %v2463_v29 = vadd.f32 %v2462_v24, %v2334_v25  ;;  %v6142_v39 = vadd.f32 %v5729_v31, %v6072_v16 }
 0x209   :  { %v6136_v30 = vadd.f32 %v5735_v45, %v1835_v20  ;;  %v1836_v18 = vmul.f32 %v5815_v9, %v1707_v42  ;;  %v1710_v27 = vmax.f32 %v1364_v47, 0.0  ;;  %v1712_v35 = vmax.f32 %v1557_v7, 0.0 }
 0x20a   :  { %v1838_v1 = vmul.f32 %v5815_v9, %v1709_v14  ;;  %v2337_v36 = vmul.f32 %v6091_v17, %v6091_v17  ;;  %v1366_v55 = vpop.f32.mrf.mxu0  ;;  %v1559_v28 = vpop.f32.mrf.mxu1  ;;  %v6147_v11 = vadd.f32 %v5732_v34, %v1832_v40  ;;  %v2464_v45 = vadd.f32 %v2463_v29, %v2335_v23 }
 0x20b   :  { %7307 = vst [vmem:[#allocation98_spill] sm:$0xff] %v6136_v30  ;;  %v6150_v25 = vadd.f32 %v5741_v52, %v1836_v18  ;;  %v1839_v20 = vmul.f32 %v5815_v9, %v1710_v27  ;;  %v6155_v24 = vmul.f32 %v6136_v30, %v6136_v30  ;;  %v6158_v31 = vadd.f32 %v5738_v51, %v1837_v37 }
 0x20c   :  { %v6161_v16 = vadd.f32 %v5744_v54, %v1838_v1  ;;  %v1841_v42 = vmul.f32 %v5815_v9, %v1712_v35  ;;  %v1370_v34 = vpop.f32.mrf.mxu0  ;;  %v1563_v40 = vpop.f32.mrf.mxu1  ;;  %2465 = vadd.xlane.f32.xlu1 %v2464_v45  ;;  %v2338_v23 = vmul.f32 %v6075_v10, %v6075_v10  ;;  %v2467_v14 = vadd.f32 %v2337_v36, %v6083_v22 }
 0x20d   :  { %7308 = vst [vmem:[#allocation99_spill] sm:$0xff] %v6150_v25  ;;  %7309 = vst [vmem:[#allocation100_spill] sm:$0xff] %v6158_v31  ;;  %v6165_v52 = vadd.f32 %v5747_v57, %v1839_v20  ;;  %v1711_v47 = vmax.f32 %v1366_v55, 0.0  ;;  %v2339_v51 = vmul.f32 %v6142_v39, %v6142_v39  ;;  %v1713_v37 = vmax.f32 %v1559_v28, 0.0 }
 0x20e   :  { %7310 = vst [vmem:[#allocation101_spill] sm:$0xff] %v6161_v16  ;;  %v1714_v54 = vmax.f32 %v1370_v34, 0.0  ;;  %v1716_v7 = vmax.f32 %v1563_v40, 0.0  ;;  %v1372_v29 = vpop.f32.mrf.mxu0  ;;  %v1565_v18 = vpop.f32.mrf.mxu1  ;;  %v6174_v27 = vmul.f32 %v6150_v25, %v6150_v25  ;;  %v6181_v1 = vadd.f32 %v5750_v58, %v1841_v42  ;;  %v5308_v42 = vld [vmem:[#allocation11 + $0x50] sm:$0xff]  }
 0x20f   :  { %7311 = vst [vmem:[#allocation102_spill] sm:$0xff] %v6165_v52  ;;  %v6178_v57 = vmul.f32 %v6165_v52, %v6165_v52  ;;  %v2468_v22 = vadd.f32 %v2467_v14, %v2338_v23  ;;  %v1840_v35 = vmul.f32 %v5815_v9, %v1711_v47  ;;  %v6185_v28 = vmul.f32 %v5815_v9, %v1713_v37  ;;  %v5309_v23 = vld [vmem:[#allocation11 + $0xd0] sm:$0xff]  }
 0x210   :  { %7312 = vst [vmem:[#allocation103_spill] sm:$0xff] %v6181_v1  ;;  %v1843_v36 = vmul.f32 %v5815_v9, %v1714_v54  ;;  %v2342_v55 = vmul.f32 %v6108_v6, %v6108_v6  ;;  %v1374_v45 = vpop.f32.mrf.mxu0  ;;  %v1567_v20 = vpop.f32.mrf.mxu1  ;;  %v1845_v40 = vmul.f32 %v5815_v9, %v1716_v7  ;;  %v2472_v52 = vadd.f32 %v2341_v38, %v6105_v12  ;;  %v5310_v14 = vld [vmem:[#allocation11 + $0x10] sm:$0xff]  }
 0x211   :  { %v2469_v34 = vadd.f32 %v2468_v22, %v2339_v51  ;;  %v1715_v58 = vmax.f32 %v1372_v29, 0.0  ;;  %v2343_v37 = vmul.f32 %v6111_v60, %v6111_v60  ;;  %v1717_v54 = vmax.f32 %v1565_v18, 0.0  ;;  %4917 = vmatprep.subr.bf16.mxu0 %v5308_v42  ;;  %5029 = vmatprep.subr.bf16.mxu1 %v5309_v23 }
 0x212   :  { %v6193_v47 = vadd.f32 %v5759_v62, %v1843_v36  ;;  %v1718_v30 = vmax.f32 %v1374_v45, 0.0  ;;  %v1376_v25 = vpop.f32.mrf.mxu0  ;;  %v1569_v6 = vpop.f32.mrf.mxu1  ;;  %v2473_v51 = vadd.f32 %v2472_v52, %v2342_v55  ;;  %v1720_v12 = vmax.f32 %v1567_v20, 0.0  ;;  %4918 = vmatpush3.bf16.msra.mxu0 %v5310_v14  ;;  %5030 = vmatpush3.bf16.msra.mxu1 %v5311_v21 }
 0x213   :  { %2470 = vadd.xlane.f32.xlu1 %v2469_v34  ;;  %v1844_v7 = vmul.f32 %v5815_v9, %v1715_v58  ;;  %v6200_v38 = vadd.f32 %v5753_v59, %v6125_v19  ;;  %v6203_v62 = vadd.f32 %v5756_v61, %v1840_v35  ;;  %v1846_v29 = vmul.f32 %v5815_v9, %v1717_v54  ;;  %v5314_v58 = vld [vmem:[#allocation11 + $0x8] sm:$0xff]  }
 0x214   :  { %7313 = vst [vmem:[#allocation104_spill] sm:$0xff] %v6193_v47  ;;  %v1847_v18 = vmul.f32 %v5815_v9, %v1718_v30  ;;  %v2345_v22 = vmul.f32 %v6147_v11, %v6147_v11  ;;  %v1380_v36 = vpop.f32.mrf.mxu0  ;;  %v1573_v52 = vpop.f32.mrf.mxu1  ;;  %v6210_v55 = vadd.f32 %v5762_v63, %v1845_v40  ;;  %v2474_v45 = vadd.f32 %v2473_v51, %v2343_v37  ;;  %v5313_v40 = vld [vmem:[#allocation11 + $0xc8] sm:$0xff]  }
 0x215   :  { %7314 = vst [vmem:[#allocation105_spill] sm:$0xff] %v6200_v38  ;;  %7315 = vst [vmem:[#allocation106_spill] sm:$0xff] %v6203_v62  ;;  %v6213_v59 = vadd.f32 %v5767_v3, %v1844_v7  ;;  %v1849_v61 = vmul.f32 %v5815_v9, %v1720_v12  ;;  %v6218_v19 = vmul.f32 %v6193_v47, %v6193_v47  ;;  %v5312_v3 = vld [vmem:[#allocation11 + $0x48] sm:$0xff]   ;;  %v1721_v14 = vmax.f32 %v1569_v6, 0.0 }
 0x216   :  { %7316 = vst [vmem:[#allocation107_spill] sm:$0xff] %v6210_v55  ;;  %v6221_v30 = vadd.f32 %v5770_v4, %v1846_v29  ;;  %v2346_v35 = vmul.f32 %v6121_v15, %v6121_v15  ;;  %v2477_v63 = vadd.f32 %v2345_v22, %v6130_v41  ;;  %v1382_v20 = vpop.f32.mrf.mxu0  ;;  %v1575_v34 = vpop.f32.mrf.mxu1  ;;  %2475 = vadd.xlane.f32.xlu0 %v2474_v45  ;;  %v1719_v4 = vmax.f32 %v1376_v25, 0.0  ;;  %v5315_v37 = vld [vmem:[#allocation11 + $0x88] sm:$0xff]   ;;  %v5317_v22 = vld [vmem:[#allocation11 + $0xc0] sm:$0xff]  }
 0x217   :  { %7317 = vst [vmem:[#allocation108_spill] sm:$0xff] %v6213_v59  ;;  %v6227_v42 = vadd.f32 %v5773_v8, %v1847_v18  ;;  %v2347_v23 = vmul.f32 %v6200_v38, %v6200_v38  ;;  %v6233_v54 = vmul.f32 %v6213_v59, %v6213_v59  ;;  %v1722_v51 = vmax.f32 %v1380_v36, 0.0  ;;  %4919 = vmatprep.subr.bf16.mxu0 %v5312_v3  ;;  %v5316_v18 = vld [vmem:[#allocation11 + $0x40] sm:$0xff]  }
 0x218   :  { %7318 = vst [vmem:[#allocation109_spill] sm:$0xff] %v6221_v30  ;;  %v2478_v41 = vadd.f32 %v2477_v63, %v2346_v35  ;;  %v1724_v21 = vmax.f32 %v1573_v52, 0.0  ;;  %v1384_v7 = vpop.f32.mrf.mxu0  ;;  %v1577_v12 = vpop.f32.mrf.mxu1  ;;  %5031 = vmatprep.subr.bf16.mxu1 %v5313_v40  ;;  %v6236_v8 = vadd.f32 %v5776_v13, %v1849_v61  ;;  %v1848_v29 = vmul.f32 %v5815_v9, %v1719_v4  ;;  %v5318_v45 = vld [vmem:[#allocation11] sm:$0xff]  }
 0x219   :  { %7319 = vst [vmem:[#allocation110_spill] sm:$0xff] %v6227_v42  ;;  %v1850_v25 = vmul.f32 %v5815_v9, %v1721_v14  ;;  %v2350_v6 = vmul.f32 %v6158_v31, %v6158_v31  ;;  %4920 = vmatpush3.bf16.msra.mxu0 %v5314_v58  ;;  %v1851_v52 = vmul.f32 %v5815_v9, %v1722_v51  ;;  %v5319_v3 = vld [vmem:[#allocation11 + $0x80] sm:$0xff]   ;;  %v1723_v4 = vmax.f32 %v1382_v20, 0.0  ;;  %v7322_v14 = vld [vmem:[#allocation21_spill] sm:$0xff] }
 0x21a   :  { %7320 = vst [vmem:[#allocation111_spill] sm:$0xff] %v6236_v8  ;;  %v2479_v36 = vadd.f32 %v2478_v41, %v2347_v23  ;;  %v1853_v35 = vmul.f32 %v5815_v9, %v1724_v21  ;;  %v2482_v13 = vadd.f32 %v6174_v27, %v6155_v24  ;;  %v1386_v61 = vpop.f32.mrf.mxu0  ;;  %v1579_v63 = vpop.f32.mrf.mxu1  ;;  %5032 = vmatpush3.bf16.msra.mxu1 %v5315_v37  ;;  %v1725_v23 = vmax.f32 %v1575_v34, 0.0 }
 0x21b   :  { %v6248_v40 = vmul.f32 %v6227_v42, %v6227_v42  ;;  %v6251_v58 = vadd.f32 %v5782_v33, %v1848_v29  ;;  %4921 = vmatprep.subr.bf16.mxu0 %v5316_v18  ;;  %5033 = vmatprep.subr.bf16.mxu1 %v5317_v22  ;;  %v6254_v41 = vadd.f32 %v7322_v14, %v1851_v52  ;;  %v1726_v37 = vmax.f32 %v1384_v7, 0.0  ;;  %v7324_v42 = vld [vmem:[#allocation20_spill] sm:$0xff]  ;;  %v7326_v29 = vld [vmem:[#allocation22_spill] sm:$0xff] }
 0x21c   :  { %2480 = vadd.xlane.f32.xlu1 %v2479_v36  ;;  %v2351_v24 = vmul.f32 %v6161_v16, %v6161_v16  ;;  %v2483_v27 = vadd.f32 %v2482_v13, %v2350_v6  ;;  %v1390_v51 = vpop.f32.mrf.mxu0  ;;  %v1583_v21 = vpop.f32.mrf.mxu1  ;;  %v6259_v47 = vadd.f32 %v7324_v42, %v1850_v25  ;;  %v1852_v33 = vmul.f32 %v5815_v9, %v1723_v4  ;;  %v7328_v6 = vld [vmem:[#allocation19_spill] sm:$0xff] }
 0x21d   :  { %7321 = vst [vmem:[#allocation112_spill] sm:$0xff] %v6251_v58  ;;  %7323 = vst [vmem:[#allocation21_spill] sm:$0xff] %v6254_v41  ;;  %v1854_v20 = vmul.f32 %v5815_v9, %v1725_v23  ;;  %v1728_v34 = vmax.f32 %v1577_v12, 0.0  ;;  %4922 = vmatpush3.bf16.msra.mxu0 %v5318_v45  ;;  %v6264_v18 = vadd.f32 %v7326_v29, %v1853_v35  ;;  %v7330_v25 = vld [vmem:[#allocation23_spill] sm:$0xff] }
 0x21e   :  { %7325 = vst [vmem:[#allocation20_spill] sm:$0xff] %v6259_v47  ;;  %v2484_v22 = vadd.f32 %v2483_v27, %v2351_v24  ;;  %v1855_v36 = vmul.f32 %v5815_v9, %v1726_v37  ;;  %v6269_v7 = vadd.f32 %v7328_v6, %v6185_v28  ;;  %v1392_v52 = vpop.f32.mrf.mxu0  ;;  %v1585_v13 = vpop.f32.mrf.mxu1  ;;  %5034 = vmatpush3.bf16.msra.mxu1 %v5319_v3  ;;  %v7332_v28 = vld [vmem:[#allocation24_spill] sm:$0xff]  ;;  %v7334_v3 = vld [vmem:[#allocation25_spill] sm:$0xff]  ;;  %v1727_v24 = vmax.f32 %v1386_v61, 0.0 }
 0x21f   :  { %7327 = vst [vmem:[#allocation22_spill] sm:$0xff] %v6264_v18  ;;  %v2361_v42 = vmul.f32 %v6251_v58, %v6251_v58  ;;  %v6274_v4 = vadd.f32 %v7330_v25, %v1852_v33  ;;  %v1857_v12 = vmul.f32 %v5815_v9, %v1728_v34  ;;  %v2353_v45 = vmul.f32 %v6203_v62, %v6203_v62 }
 0x220   :  { %7329 = vst [vmem:[#allocation19_spill] sm:$0xff] %v6269_v7  ;;  %v6281_v35 = vmul.f32 %v6254_v41, %v6254_v41  ;;  %2485 = vadd.xlane.f32.xlu0 %v2484_v22  ;;  %v6284_v23 = vadd.f32 %v7332_v28, %v1854_v20  ;;  %v6287_v14 = vadd.f32 %v7334_v3, %v1855_v36  ;;  %v1394_v27 = vpop.f32.mrf.mxu0  ;;  %v1587_v37 = vpop.f32.mrf.mxu1  ;;  %v1729_v6 = vmax.f32 %v1579_v63, 0.0  ;;  %v7336_v3 = vld [vmem:[#allocation26_spill] sm:$0xff]  ;;  %v7338_v63 = vld [vmem:[#allocation27_spill] sm:$0xff] }
 0x221   :  { %7331 = vst [vmem:[#allocation23_spill] sm:$0xff] %v6274_v4  ;;  %v2354_v33 = vmul.f32 %v6181_v1, %v6181_v1  ;;  %v2355_v34 = vmul.f32 %v6269_v7, %v6269_v7  ;;  %v2487_v29 = vadd.f32 %v2353_v45, %v6178_v57  ;;  %v6296_v22 = vmul.f32 %v6274_v4, %v6274_v4 }
 0x222   :  { %7333 = vst [vmem:[#allocation24_spill] sm:$0xff] %v6284_v23  ;;  %7335 = vst [vmem:[#allocation25_spill] sm:$0xff] %v6287_v14  ;;  %v1856_v20 = vmul.f32 %v5815_v9, %v1727_v24  ;;  %v1730_v36 = vmax.f32 %v1390_v51, 0.0  ;;  %v1732_v25 = vmax.f32 %v1583_v21, 0.0  ;;  %v1396_v61 = vpop.f32.mrf.mxu0  ;;  %v1589_v28 = vpop.f32.mrf.mxu1  ;;  %v6300_v41 = vadd.f32 %v7336_v3, %v1857_v12  ;;  %v7340_v3 = vld [vmem:[#allocation28_spill] sm:$0xff] }
 0x223   :  { %v2488_v58 = vadd.f32 %v2487_v29, %v2354_v33  ;;  %v1858_v59 = vmul.f32 %v5815_v9, %v1729_v6  ;;  %v2358_v57 = vmul.f32 %v6210_v55, %v6210_v55  ;;  %v2492_v51 = vadd.f32 %v6233_v54, %v6218_v19 }
 0x224   :  { %7337 = vst [vmem:[#allocation26_spill] sm:$0xff] %v6300_v41  ;;  %v6306_v45 = vadd.f32 %v7338_v63, %v1856_v20  ;;  %v1859_v4 = vmul.f32 %v5815_v9, %v1730_v36  ;;  %v1861_v24 = vmul.f32 %v5815_v9, %v1732_v25  ;;  %v1400_v21 = vpop.f32.mrf.mxu0  ;;  %v1593_v1 = vpop.f32.mrf.mxu1  ;;  %v6314_v12 = vmul.f32 %v6287_v14, %v6287_v14  ;;  %v7342_v20 = vld [vmem:[#allocation29_spill] sm:$0xff] }
 0x225   :  { %v2489_v33 = vadd.f32 %v2488_v58, %v2355_v34  ;;  %v1731_v29 = vmax.f32 %v1392_v52, 0.0  ;;  %v1733_v6 = vmax.f32 %v1585_v13, 0.0  ;;  %v6317_v55 = vadd.f32 %v7340_v3, %v1858_v59 }
 0x226   :  { %7339 = vst [vmem:[#allocation27_spill] sm:$0xff] %v6306_v45  ;;  %v6320_v63 = vadd.f32 %v7342_v20, %v1859_v4  ;;  %v2359_v36 = vmul.f32 %v6221_v30, %v6221_v30  ;;  %v2493_v25 = vadd.f32 %v2492_v51, %v2358_v57  ;;  %v1402_v19 = vpop.f32.mrf.mxu0  ;;  %v1595_v54 = vpop.f32.mrf.mxu1  ;;  %v1734_v58 = vmax.f32 %v1394_v27, 0.0  ;;  %v7344_v4 = vld [vmem:[#allocation30_spill] sm:$0xff] }
 0x227   :  { %7341 = vst [vmem:[#allocation28_spill] sm:$0xff] %v6317_v55  ;;  %2490 = vadd.xlane.f32.xlu1 %v2489_v33  ;;  %v1860_v31 = vmul.f32 %v5815_v9, %v1731_v29  ;;  %v1862_v14 = vmul.f32 %v5815_v9, %v1733_v6  ;;  %v1736_v52 = vmax.f32 %v1587_v37, 0.0  ;;  %v2369_v59 = vmul.f32 %v6306_v45, %v6306_v45  ;;  %v7346_v33 = vld [vmem:[#allocation31_spill] sm:$0xff] }
 0x228   :  { %7343 = vst [vmem:[#allocation29_spill] sm:$0xff] %v6320_v63  ;;  %v6330_v13 = vmul.f32 %v6320_v63, %v6320_v63  ;;  %v6333_v34 = vadd.f32 %v7344_v4, %v1861_v24  ;;  %v2494_v57 = vadd.f32 %v2493_v25, %v2359_v36  ;;  %v1404_v51 = vpop.f32.mrf.mxu0  ;;  %v1597_v3 = vpop.f32.mrf.mxu1  ;;  %v1863_v29 = vmul.f32 %v5815_v9, %v1734_v58  ;;  %v7348_v25 = vld [vmem:[#allocation32_spill] sm:$0xff] }
 0x229   :  { %v6336_v20 = vadd.f32 %v7346_v33, %v1860_v31  ;;  %v1865_v27 = vmul.f32 %v5815_v9, %v1736_v52  ;;  %v2362_v37 = vmul.f32 %v6236_v8, %v6236_v8  ;;  %v2497_v6 = vadd.f32 %v2361_v42, %v6248_v40  ;;  %v7350_v31 = vld [vmem:[#allocation33_spill] sm:$0xff] }
 0x22a   :  { %7345 = vst [vmem:[#allocation30_spill] sm:$0xff] %v6333_v34  ;;  %2495 = vadd.xlane.f32.xlu0 %v2494_v57  ;;  %v1735_v63 = vmax.f32 %v1396_v61, 0.0  ;;  %v1737_v45 = vmax.f32 %v1589_v28, 0.0  ;;  %v1738_v24 = vmax.f32 %v1400_v21, 0.0  ;;  %v1406_v4 = vpop.f32.mrf.mxu0  ;;  %v1599_v36 = vpop.f32.mrf.mxu1  ;;  %v6344_v30 = vadd.f32 %v7348_v25, %v1862_v14  ;;  %v7356_v8 = vld [vmem:[#allocation37_spill] sm:$0xff] }
 0x22b   :  { %7347 = vst [vmem:[#allocation31_spill] sm:$0xff] %v6336_v20  ;;  %v6347_v33 = vadd.f32 %v7350_v31, %v1863_v29  ;;  %v2363_v58 = vmul.f32 %v6259_v47, %v6259_v47  ;;  %v1740_v52 = vmax.f32 %v1593_v1, 0.0  ;;  %v2498_v7 = vadd.f32 %v2497_v6, %v2362_v37  ;;  %v7352_v29 = vld [vmem:[#allocation34_spill] sm:$0xff] }
 0x22c   :  { %7349 = vst [vmem:[#allocation32_spill] sm:$0xff] %v6344_v30  ;;  %v1864_v57 = vmul.f32 %v5815_v9, %v1735_v63  ;;  %v1866_v40 = vmul.f32 %v5815_v9, %v1737_v45  ;;  %v1867_v42 = vmul.f32 %v5815_v9, %v1738_v24  ;;  %v1410_v61 = vpop.f32.mrf.mxu0  ;;  %v1603_v28 = vpop.f32.mrf.mxu1  ;;  %v2373_v14 = vmul.f32 %v6336_v20, %v6336_v20  ;;  %v7354_v63 = vld [vmem:[#allocation35_spill] sm:$0xff] }
 0x22d   :  { %7351 = vst [vmem:[#allocation33_spill] sm:$0xff] %v6347_v33  ;;  %v6358_v21 = vmul.f32 %v6347_v33, %v6347_v33  ;;  %v6361_v25 = vadd.f32 %v7352_v29, %v1865_v27  ;;  %v1869_v1 = vmul.f32 %v5815_v9, %v1740_v52  ;;  %v2499_v37 = vadd.f32 %v2498_v7, %v2363_v58  ;;  %v7358_v7 = vld [vmem:[#allocation36_spill] sm:$0xff] }
 0x22e   :  { %v6365_v6 = vadd.f32 %v7354_v63, %v1864_v57  ;;  %v2366_v45 = vmul.f32 %v6264_v18, %v6264_v18  ;;  %v2367_v24 = vmul.f32 %v6284_v23, %v6284_v23  ;;  %v1412_v31 = vpop.f32.mrf.mxu0  ;;  %v1605_v20 = vpop.f32.mrf.mxu1  ;;  %v6372_v33 = vadd.f32 %v7356_v8, %v1867_v42  ;;  %v7360_v57 = vld [vmem:[#allocation38_spill] sm:$0xff] }
 0x22f   :  { %7353 = vst [vmem:[#allocation34_spill] sm:$0xff] %v6361_v25  ;;  %v2502_v27 = vadd.f32 %v6296_v22, %v6281_v35  ;;  %v1739_v29 = vmax.f32 %v1402_v19, 0.0  ;;  %v1741_v52 = vmax.f32 %v1595_v54, 0.0  ;;  %2500 = vadd.xlane.f32.xlu1 %v2499_v37  ;;  %v6377_v58 = vadd.f32 %v7358_v7, %v1866_v40 }
 0x230   :  { %7355 = vst [vmem:[#allocation35_spill] sm:$0xff] %v6365_v6  ;;  %7357 = vst [vmem:[#allocation37_spill] sm:$0xff] %v6372_v33  ;;  %v6380_v63 = vadd.f32 %v7360_v57, %v1869_v1  ;;  %v1742_v18 = vmax.f32 %v1404_v51, 0.0  ;;  %v1744_v47 = vmax.f32 %v1597_v3, 0.0  ;;  %v1414_v23 = vpop.f32.mrf.mxu0  ;;  %v1607_v62 = vpop.f32.mrf.mxu1  ;;  %v6384_v8 = vmul.f32 %v6365_v6, %v6365_v6 }
 0x231   :  { %7359 = vst [vmem:[#allocation36_spill] sm:$0xff] %v6377_v58  ;;  %v2503_v42 = vadd.f32 %v2502_v27, %v2366_v45  ;;  %v1868_v35 = vmul.f32 %v5815_v9, %v1739_v29  ;;  %v1870_v22 = vmul.f32 %v5815_v9, %v1741_v52  ;;  %v2370_v40 = vmul.f32 %v6300_v41, %v6300_v41  ;;  %v7362_v27 = vld [vmem:[#allocation39_spill] sm:$0xff]  ;;  %v7364_v52 = vld [vmem:[#allocation41_spill] sm:$0xff]  ;;  %v7366_v41 = vld [vmem:[#allocation40_spill] sm:$0xff] }
 0x232   :  { %7361 = vst [vmem:[#allocation38_spill] sm:$0xff] %v6380_v63  ;;  %v1871_v19 = vmul.f32 %v5815_v9, %v1742_v18  ;;  %v1873_v54 = vmul.f32 %v5815_v9, %v1744_v47  ;;  %v2507_v51 = vadd.f32 %v2369_v59, %v6314_v12  ;;  %v6393_v3 = vpop.f32.mrf.mxu0  ;;  %v6395_v1 = vpop.f32.mrf.mxu1  ;;  %v6399_v37 = vmul.f32 %v6372_v33, %v6372_v33 }
 0x233   :  { %v2504_v45 = vadd.f32 %v2503_v42, %v2367_v24  ;;  %v6402_v29 = vadd.f32 %v7362_v27, %v1868_v35  ;;  %v1743_v18 = vmax.f32 %v1406_v4, 0.0  ;;  %v2371_v7 = vmul.f32 %v6317_v55, %v6317_v55 }
 0x234   :  { %v6405_v47 = vadd.f32 %v7364_v52, %v1871_v19  ;;  %v2508_v12 = vadd.f32 %v2507_v51, %v2370_v40  ;;  %v1745_v59 = vmax.f32 %v1599_v36, 0.0  ;;  %v1420_v57 = vpop.f32.mrf.mxu0  ;;  %v1613_v6 = vpop.f32.mrf.mxu1  ;;  %v6410_v16 = vadd.f32 %v7366_v41, %v1870_v22  ;;  %v7368_v19 = vld [vmem:[#allocation42_spill] sm:$0xff]  ;;  %v7370_v22 = vld [vmem:[#allocation43_spill] sm:$0xff] }
 0x235   :  { %7363 = vst [vmem:[#allocation39_spill] sm:$0xff] %v6402_v29  ;;  %2505 = vadd.xlane.f32.xlu0 %v2504_v45  ;;  %v1872_v24 = vmul.f32 %v5815_v9, %v1743_v18  ;;  %v1746_v42 = vmax.f32 %v1410_v61, 0.0  ;;  %v1748_v35 = vmax.f32 %v1603_v28, 0.0  ;;  %v2381_v4 = vmul.f32 %v6402_v29, %v6402_v29 }
 0x236   :  { %7365 = vst [vmem:[#allocation41_spill] sm:$0xff] %v6405_v47  ;;  %7367 = vst [vmem:[#allocation40_spill] sm:$0xff] %v6410_v16  ;;  %v6416_v27 = vadd.f32 %v7368_v19, %v1873_v54  ;;  %v2509_v52 = vadd.f32 %v2508_v12, %v2371_v7  ;;  %v1874_v40 = vmul.f32 %v5815_v9, %v1745_v59  ;;  %v6419_v36 = vpop.f32.mrf.mxu0  ;;  %v6421_v51 = vpop.f32.mrf.mxu1  ;;  %v1747_v7 = vmax.f32 %v1412_v31, 0.0 }
 0x237   :  { %v6425_v41 = vmul.f32 %v6405_v47, %v6405_v47  ;;  %v6428_v61 = vadd.f32 %v7370_v22, %v1872_v24  ;;  %v1875_v28 = vmul.f32 %v5815_v9, %v1746_v42  ;;  %v1877_v45 = vmul.f32 %v5815_v9, %v1748_v35  ;;  %v7372_v47 = vld [vmem:[#allocation44_spill] sm:$0xff]  ;;  %v7374_v24 = vld [vmem:[#allocation45_spill] sm:$0xff] }
 0x238   :  { %7369 = vst [vmem:[#allocation42_spill] sm:$0xff] %v6416_v27  ;;  %2510 = vadd.xlane.f32.xlu1 %v2509_v52  ;;  %v2374_v54 = vmul.f32 %v6333_v34, %v6333_v34  ;;  %v2512_v18 = vadd.f32 %v2373_v14, %v6330_v13  ;;  %v1749_v12 = vmax.f32 %v1605_v20, 0.0  ;;  %v6435_v59 = vpop.f32.mrf.mxu0  ;;  %v6437_v19 = vpop.f32.mrf.mxu1  ;;  %v6440_v33 = vadd.f32 %v7372_v47, %v1874_v40 }
 0x239   :  { %7371 = vst [vmem:[#allocation43_spill] sm:$0xff] %v6428_v61  ;;  %v6443_v22 = vadd.f32 %v7374_v24, %v1875_v28  ;;  %v2375_v42 = vmul.f32 %v6344_v30, %v6344_v30  ;;  %v1750_v35 = vmax.f32 %v1414_v23, 0.0  ;;  %v1876_v29 = vmul.f32 %v5815_v9, %v1747_v7  ;;  %v7376_v28 = vld [vmem:[#allocation46_spill] sm:$0xff] }
 0x23a   :  { %7373 = vst [vmem:[#allocation44_spill] sm:$0xff] %v6440_v33  ;;  %v2513_v52 = vadd.f32 %v2512_v18, %v2374_v54  ;;  %v1878_v13 = vmul.f32 %v5815_v9, %v1749_v12  ;;  %v1752_v20 = vmax.f32 %v1607_v62, 0.0  ;;  %v6449_v14 = vpop.f32.mrf.mxu0  ;;  %v6451_v31 = vpop.f32.mrf.mxu1  ;;  %v2385_v47 = vmul.f32 %v6428_v61, %v6428_v61  ;;  %v7378_v18 = vld [vmem:[#allocation47_spill] sm:$0xff] }
 0x23b   :  { %7375 = vst [vmem:[#allocation45_spill] sm:$0xff] %v6443_v22  ;;  %v6457_v40 = vmul.f32 %v6443_v22, %v6443_v22  ;;  %v6460_v24 = vadd.f32 %v7376_v28, %v1877_v45  ;;  %v1879_v23 = vmul.f32 %v5815_v9, %v1750_v35  ;;  %v6464_v7 = vadd.f32 %v7378_v18, %v1876_v29  ;;  %v7380_v22 = vld [vmem:[#allocation49_spill] sm:$0xff]  ;;  %v7382_v35 = vld [vmem:[#allocation48_spill] sm:$0xff] }
 0x23c   :  { %v2514_v54 = vadd.f32 %v2513_v52, %v2375_v42  ;;  %v1881_v62 = vmul.f32 %v5815_v9, %v1752_v20  ;;  %v2378_v12 = vmul.f32 %v6361_v25, %v6361_v25  ;;  %v6469_v34 = vpop.f32.mrf.mxu0  ;;  %v6471_v61 = vpop.f32.mrf.mxu1  ;;  %v2517_v45 = vadd.f32 %v6384_v8, %v6358_v21 }
 0x23d   :  { %7377 = vst [vmem:[#allocation46_spill] sm:$0xff] %v6460_v24  ;;  %7379 = vst [vmem:[#allocation47_spill] sm:$0xff] %v6464_v7  ;;  %v6474_v30 = vadd.f32 %v7380_v22, %v1879_v23  ;;  %v1751_v42 = vmax.f32 %v6393_v3, 0.0  ;;  %v1753_v29 = vmax.f32 %v6395_v1, 0.0  ;;  %v6481_v52 = vadd.f32 %v7382_v35, %v1878_v13  ;;  %v7384_v23 = vld [vmem:[#allocation50_spill] sm:$0xff] }
 0x23e   :  { %2515 = vadd.xlane.f32.xlu0 %v2514_v54  ;;  %v2379_v20 = vmul.f32 %v6377_v58, %v6377_v58  ;;  %v1754_v28 = vmax.f32 %v1420_v57, 0.0  ;;  %v1756_v18 = vmax.f32 %v1613_v6, 0.0  ;;  %v6485_v25 = vpop.f32.mrf.mxu0  ;;  %v6487_v22 = vpop.f32.mrf.mxu1  ;;  %v6491_v21 = vmul.f32 %v6464_v7, %v6464_v7  ;;  %v7388_v58 = vld [vmem:[#allocation53_spill] sm:$0xff] }
 0x23f   :  { %7381 = vst [vmem:[#allocation49_spill] sm:$0xff] %v6474_v30  ;;  %7383 = vst [vmem:[#allocation48_spill] sm:$0xff] %v6481_v52  ;;  %v2518_v8 = vadd.f32 %v2517_v45, %v2378_v12  ;;  %v1880_v3 = vmul.f32 %v5815_v9, %v1751_v42  ;;  %v1882_v1 = vmul.f32 %v5815_v9, %v1753_v29  ;;  %v7386_v45 = vld [vmem:[#allocation51_spill] sm:$0xff] }
 0x240   :  { %v6497_v13 = vmul.f32 %v6474_v30, %v6474_v30  ;;  %v6500_v57 = vadd.f32 %v7384_v23, %v1881_v62  ;;  %v1883_v6 = vmul.f32 %v5815_v9, %v1754_v28  ;;  %v1885_v54 = vmul.f32 %v5815_v9, %v1756_v18  ;;  %v6504_v35 = vpop.f32.mrf.mxu0  ;;  %v6506_v7 = vpop.f32.mrf.mxu1 }
 0x241   :  { %v2519_v12 = vadd.f32 %v2518_v8, %v2379_v20  ;;  %v6509_v42 = vadd.f32 %v7386_v45, %v1880_v3  ;;  %v2382_v29 = vmul.f32 %v6380_v63, %v6380_v63  ;;  %v2522_v30 = vadd.f32 %v2381_v4, %v6399_v37  ;;  %v7390_v8 = vld [vmem:[#allocation52_spill] sm:$0xff] }
 0x242   :  { %7385 = vst [vmem:[#allocation50_spill] sm:$0xff] %v6500_v57  ;;  %v6515_v62 = vadd.f32 %v7388_v58, %v1883_v6  ;;  %v2383_v28 = vmul.f32 %v6410_v16, %v6410_v16  ;;  %v1755_v18 = vmax.f32 %v6419_v36, 0.0  ;;  %v1757_v23 = vmax.f32 %v6421_v51, 0.0  ;;  %v6521_v55 = vpop.f32.mrf.mxu0  ;;  %v6523_v20 = vpop.f32.mrf.mxu1  ;;  %v7391_v6 = vld [vmem:[#allocation54_spill] sm:$0xff] }
 0x243   :  { %7387 = vst [vmem:[#allocation51_spill] sm:$0xff] %v6509_v42  ;;  %2520 = vadd.xlane.f32.xlu1 %v2519_v12  ;;  %v6526_v3 = vadd.f32 %v7390_v8, %v1882_v1  ;;  %v2523_v45 = vadd.f32 %v2522_v30, %v2382_v29  ;;  %v1758_v37 = vmax.f32 %v6435_v59, 0.0  ;;  %v1760_v58 = vmax.f32 %v6437_v19, 0.0  ;;  %v7392_v29 = vld [vmem:[#allocation55_spill] sm:$0xff] }
 0x244   :  { %7389 = vst [vmem:[#allocation53_spill] sm:$0xff] %v6515_v62  ;;  %v2393_v4 = vmul.f32 %v6509_v42, %v6509_v42  ;;  %v6533_v36 = vadd.f32 %v7391_v6, %v1885_v54  ;;  %v1884_v51 = vmul.f32 %v5815_v9, %v1755_v18  ;;  %v1886_v63 = vmul.f32 %v5815_v9, %v1757_v23  ;;  %v6537_v16 = vpop.f32.mrf.mxu0  ;;  %v6539_v12 = vpop.f32.mrf.mxu1 }
 0x245   :  { %v6543_v30 = vmul.f32 %v6515_v62, %v6515_v62  ;;  %v2524_v59 = vadd.f32 %v2523_v45, %v2383_v28  ;;  %v1887_v19 = vmul.f32 %v5815_v9, %v1758_v37  ;;  %v1889_v1 = vmul.f32 %v5815_v9, %v1760_v58  ;;  %v7394_v28 = vld [vmem:[#allocation57_spill] sm:$0xff] }
 0x246   :  { %v6548_v54 = vadd.f32 %v7392_v29, %v1884_v51  ;;  %v2386_v18 = vmul.f32 %v6416_v27, %v6416_v27  ;;  %v2527_v23 = vadd.f32 %v2385_v47, %v6425_v41  ;;  %v1759_v8 = vmax.f32 %v6449_v14, 0.0  ;;  %v6554_v6 = vpop.f32.mrf.mxu0  ;;  %v6556_v42 = vpop.f32.mrf.mxu1  ;;  %v7396_v29 = vld [vmem:[#allocation56_spill] sm:$0xff] }
 0x247   :  { %2525 = vadd.xlane.f32.xlu0 %v2524_v59  ;;  %v6559_v45 = vadd.f32 %v7394_v28, %v1887_v19  ;;  %v2387_v37 = vmul.f32 %v6440_v33, %v6440_v33  ;;  %v1761_v58 = vmax.f32 %v6451_v31, 0.0  ;;  %v1762_v51 = vmax.f32 %v6469_v34, 0.0  ;;  %v7397_v28 = vld [vmem:[#allocation58_spill] sm:$0xff] }
 0x248   :  { %7393 = vst [vmem:[#allocation52_spill] sm:$0xff] %v6548_v54  ;;  %v6566_v62 = vadd.f32 %v7396_v29, %v1886_v63  ;;  %v2528_v41 = vadd.f32 %v2527_v23, %v2386_v18  ;;  %v1888_v14 = vmul.f32 %v5815_v9, %v1759_v8  ;;  %v1764_v47 = vmax.f32 %v6471_v61, 0.0  ;;  %v6570_v27 = vpop.f32.mrf.mxu0  ;;  %v6572_v59 = vpop.f32.mrf.mxu1  ;;  %v7399_v61 = vld [vmem:[#allocation59_spill] sm:$0xff] }
 0x249   :  { %7395 = vst [vmem:[#allocation54_spill] sm:$0xff] %v6559_v45  ;;  %v2397_v19 = vmul.f32 %v6548_v54, %v6548_v54  ;;  %v6577_v33 = vadd.f32 %v7397_v28, %v1889_v1  ;;  %v1890_v34 = vmul.f32 %v5815_v9, %v1761_v58  ;;  %v1891_v63 = vmul.f32 %v5815_v9, %v1762_v51 }
 0x24a   :  { %v6583_v31 = vmul.f32 %v6559_v45, %v6559_v45  ;;  %v2529_v18 = vadd.f32 %v2528_v41, %v2387_v37  ;;  %v6586_v23 = vadd.f32 %v7399_v61, %v1888_v14  ;;  %v1893_v8 = vmul.f32 %v5815_v9, %v1764_v47  ;;  %v6589_v29 = vpop.f32.mrf.mxu0  ;;  %v6591_v54 = vpop.f32.mrf.mxu1  ;;  %v7401_v41 = vld [vmem:[#allocation60_spill] sm:$0xff]  ;;  %v7402_v47 = vld [vmem:[#allocation61_spill] sm:$0xff] }
 0x24b   :  { %7398 = vst [vmem:[#allocation55_spill] sm:$0xff] %v6577_v33  ;;  %v2390_v1 = vmul.f32 %v6460_v24, %v6460_v24  ;;  %v2391_v58 = vmul.f32 %v6481_v52, %v6481_v52  ;;  %v2532_v51 = vadd.f32 %v6491_v21, %v6457_v40  ;;  %v1763_v37 = vmax.f32 %v6485_v25, 0.0 }
 0x24c   :  { %7400 = vst [vmem:[#allocation57_spill] sm:$0xff] %v6586_v23  ;;  %2530 = vadd.xlane.f32.xlu1 %v2529_v18  ;;  %v6601_v14 = vadd.f32 %v7401_v41, %v1890_v34  ;;  %v6604_v28 = vadd.f32 %v7402_v47, %v1891_v63  ;;  %v1765_v61 = vmax.f32 %v6487_v22, 0.0  ;;  %v1766_v45 = vmax.f32 %v6504_v35, 0.0  ;;  %v6608_v24 = vpop.f32.mrf.mxu0  ;;  %v6610_v15 = vpop.f32.mrf.mxu1  ;;  %v7404_v18 = vld [vmem:[#allocation62_spill] sm:$0xff] }
 0x24d   :  { %v2401_v40 = vmul.f32 %v6586_v23, %v6586_v23  ;;  %v2533_v21 = vadd.f32 %v2532_v51, %v2390_v1  ;;  %v1892_v25 = vmul.f32 %v5815_v9, %v1763_v37  ;;  %v1768_v34 = vmax.f32 %v6506_v7, 0.0  ;;  %v7405_v1 = vld [vmem:[#allocation63_spill] sm:$0xff] }
 0x24e   :  { %7403 = vst [vmem:[#allocation56_spill] sm:$0xff] %v6604_v28  ;;  %v6617_v41 = vadd.f32 %v7404_v18, %v1893_v8  ;;  %v1894_v63 = vmul.f32 %v5815_v9, %v1765_v61  ;;  %v1895_v22 = vmul.f32 %v5815_v9, %v1766_v45  ;;  %v2394_v35 = vmul.f32 %v6500_v57, %v6500_v57  ;;  %v6623_v47 = vpop.f32.mrf.mxu0  ;;  %v6625_v52 = vpop.f32.mrf.mxu1  ;;  %v7407_v45 = vld [vmem:[#allocation65_spill] sm:$0xff] }
 0x24f   :  { %v2534_v23 = vadd.f32 %v2533_v21, %v2391_v58  ;;  %v6628_v51 = vadd.f32 %v7405_v1, %v1892_v25  ;;  %v1897_v7 = vmul.f32 %v5815_v9, %v1768_v34  ;;  %v2537_v8 = vadd.f32 %v2393_v4, %v6497_v13  ;;  %v7409_v58 = vld [vmem:[#allocation64_spill] sm:$0xff]  ;;  %v7410_v1 = vld [vmem:[#allocation66_spill] sm:$0xff] }
 0x250   :  { %v6634_v37 = vmul.f32 %v6604_v28, %v6604_v28  ;;  %v6637_v61 = vadd.f32 %v7407_v45, %v1895_v22  ;;  %v1767_v18 = vmax.f32 %v6521_v55, 0.0  ;;  %v1769_v57 = vmax.f32 %v6523_v20, 0.0  ;;  %v6641_v38 = vpop.f32.mrf.mxu0  ;;  %v6649_v34 = vpop.f32.mrf.mxu1 }
 0x251   :  { %7406 = vst [vmem:[#allocation58_spill] sm:$0xff] %v6628_v51  ;;  %2535 = vadd.xlane.f32.xlu0 %v2534_v23  ;;  %v6644_v21 = vadd.f32 %v7409_v58, %v1894_v63  ;;  %v2395_v13 = vmul.f32 %v6526_v3, %v6526_v3  ;;  %v2538_v4 = vadd.f32 %v2537_v8, %v2394_v35  ;;  %v1770_v25 = vmax.f32 %v6537_v16, 0.0  ;;  %v7411_v58 = vld [vmem:[#allocation67_spill] sm:$0xff] }
 0x252   :  { %7408 = vst [vmem:[#allocation59_spill] sm:$0xff] %v6637_v61  ;;  %v2405_v22 = vmul.f32 %v6628_v51, %v6628_v51  ;;  %v1896_v55 = vmul.f32 %v5815_v9, %v1767_v18  ;;  %v1898_v20 = vmul.f32 %v5815_v9, %v1769_v57  ;;  %v1772_v23 = vmax.f32 %v6539_v12, 0.0  ;;  %v6664_v8 = vpop.f32.mrf.mxu0 }
 0x253   :  { %v6658_v63 = vmul.f32 %v6637_v61, %v6637_v61  ;;  %v6661_v45 = vadd.f32 %v7410_v1, %v1897_v7  ;;  %v2539_v35 = vadd.f32 %v2538_v4, %v2395_v13  ;;  %v1899_v16 = vmul.f32 %v5815_v9, %v1770_v25  ;;  %v6679_v25 = vpop.f32.mrf.mxu1 }
 0x254   :  { %v6667_v28 = vadd.f32 %v7411_v58, %v1896_v55  ;;  %v1901_v18 = vmul.f32 %v5815_v9, %v1772_v23  ;;  %v2398_v57 = vmul.f32 %v6533_v36, %v6533_v36  ;;  %v2542_v12 = vadd.f32 %v2397_v19, %v6543_v30  ;;  %v7414_v55 = vld [vmem:[#allocation68_spill] sm:$0xff]  ;;  %v6692_v19 = vpop.f32.mrf.mxu0 }
 0x255   :  { %2540 = vadd.xlane.f32.xlu1 %v2539_v35  ;;  %v6674_v61 = vadd.f32 %v5935_v46, %v1899_v16  ;;  %v1771_v7 = vmax.f32 %v6554_v6, 0.0  ;;  %v1773_v13 = vmax.f32 %v6556_v42, 0.0  ;;  %v1774_v4 = vmax.f32 %v6570_v27, 0.0  ;;  %v7415_v35 = vld [vmem:[#allocation69_spill] sm:$0xff] }
 0x256   :  { %7412 = vst [vmem:[#allocation60_spill] sm:$0xff] %v6667_v28  ;;  %v6682_v1 = vadd.f32 %v7414_v55, %v1898_v20  ;;  %v2399_v23 = vmul.f32 %v6566_v62, %v6566_v62  ;;  %v2543_v58 = vadd.f32 %v2542_v12, %v2398_v57  ;;  %v1776_v30 = vmax.f32 %v6572_v59, 0.0  ;;  %v7416_v12 = vld [vmem:[#allocation70_spill] sm:$0xff] }
 0x257   :  { %7413 = vst [vmem:[#allocation61_spill] sm:$0xff] %v6674_v61  ;;  %v2409_v46 = vmul.f32 %v6667_v28, %v6667_v28  ;;  %v1900_v6 = vmul.f32 %v5815_v9, %v1771_v7  ;;  %v1902_v42 = vmul.f32 %v5815_v9, %v1773_v13  ;;  %v1903_v27 = vmul.f32 %v5815_v9, %v1774_v4  ;;  %v6710_v28 = vpop.f32.mrf.mxu1 }
 0x258   :  { %v6696_v20 = vmul.f32 %v6674_v61, %v6674_v61  ;;  %v6699_v16 = vadd.f32 %v7415_v35, %v1901_v18  ;;  %v2544_v57 = vadd.f32 %v2543_v58, %v2399_v23  ;;  %v1905_v59 = vmul.f32 %v5815_v9, %v1776_v30  ;;  %v7418_v61 = vld [vmem:[#allocation72_spill] sm:$0xff] }
 0x259   :  { %v6703_v55 = vadd.f32 %v7416_v12, %v1900_v6  ;;  %v2402_v7 = vmul.f32 %v6577_v33, %v6577_v33  ;;  %v2403_v13 = vmul.f32 %v6601_v14, %v6601_v14  ;;  %v2547_v4 = vadd.f32 %v2401_v40, %v6583_v31  ;;  %v7420_v6 = vld [vmem:[#allocation71_spill] sm:$0xff]  ;;  %v7421_v12 = vld [vmem:[#allocation73_spill] sm:$0xff]  ;;  %v6725_v40 = vpop.f32.mrf.mxu0 }
 0x25a   :  { %2545 = vadd.xlane.f32.xlu0 %v2544_v57  ;;  %v6713_v18 = vadd.f32 %v7418_v61, %v1903_v27  ;;  %v1775_v23 = vmax.f32 %v6589_v29, 0.0  ;;  %v1777_v58 = vmax.f32 %v6591_v54, 0.0  ;;  %v1778_v30 = vmax.f32 %v6608_v24, 0.0 }
 0x25b   :  { %7417 = vst [vmem:[#allocation62_spill] sm:$0xff] %v6703_v55  ;;  %v6719_v35 = vadd.f32 %v7420_v6, %v1902_v42  ;;  %v6722_v51 = vadd.f32 %v7421_v12, %v1905_v59  ;;  %v2548_v33 = vadd.f32 %v2547_v4, %v2402_v7  ;;  %v1780_v31 = vmax.f32 %v6610_v15, 0.0  ;;  %v1655_v15 = vpop.f32.mrf.mxu1  ;;  %v7423_v4 = vld [vmem:[#allocation74_spill] sm:$0xff]  ;;  %v1464_v12 = vpop.f32.mrf.mxu0 }
 0x25c   :  { %7419 = vst [vmem:[#allocation63_spill] sm:$0xff] %v6713_v18  ;;  %v2413_v61 = vmul.f32 %v6703_v55, %v6703_v55  ;;  %v1904_v29 = vmul.f32 %v5815_v9, %v1775_v23  ;;  %v1906_v54 = vmul.f32 %v5815_v9, %v1777_v58  ;;  %v1907_v24 = vmul.f32 %v5815_v9, %v1778_v30 }
 0x25d   :  { %7422 = vst [vmem:[#allocation65_spill] sm:$0xff] %v6722_v51  ;;  %v2549_v27 = vadd.f32 %v2548_v33, %v2403_v13  ;;  %v1909_v42 = vmul.f32 %v5815_v9, %v1780_v31  ;;  %v2406_v57 = vmul.f32 %v6617_v41, %v6617_v41  ;;  %v2552_v59 = vadd.f32 %v2405_v22, %v6634_v37  ;;  %v7425_v13 = vld [vmem:[#allocation76_spill] sm:$0xff]  ;;  %v7427_v31 = vld [vmem:[#allocation75_spill] sm:$0xff] }
 0x25e   :  { %v6738_v7 = vmul.f32 %v6713_v18, %v6713_v18  ;;  %v6741_v6 = vadd.f32 %v7423_v4, %v1904_v29  ;;  %v2407_v23 = vmul.f32 %v6644_v21, %v6644_v21  ;;  %v1779_v33 = vmax.f32 %v6623_v47, 0.0  ;;  %v7429_v29 = vld [vmem:[#allocation77_spill] sm:$0xff] }
 0x25f   :  { %2550 = vadd.xlane.f32.xlu1 %v2549_v27  ;;  %v6747_v58 = vadd.f32 %v7425_v13, %v1907_v24  ;;  %v2553_v30 = vadd.f32 %v2552_v59, %v2406_v57  ;;  %v1781_v37 = vmax.f32 %v6625_v52, 0.0  ;;  %v1782_v22 = vmax.f32 %v6641_v38, 0.0  ;;  %v1657_v38 = vpop.f32.mrf.mxu1  ;;  %v7431_v59 = vld [vmem:[#allocation78_spill] sm:$0xff] }
 0x260   :  { %7424 = vst [vmem:[#allocation64_spill] sm:$0xff] %v6741_v6  ;;  %v6752_v18 = vadd.f32 %v7427_v31, %v1906_v54  ;;  %v6755_v4 = vadd.f32 %v7429_v29, %v1909_v42  ;;  %v1908_v55 = vmul.f32 %v5815_v9, %v1779_v33  ;;  %v1784_v47 = vmax.f32 %v6649_v34, 0.0  ;;  %v7435_v31 = vld [vmem:[#allocation79_spill] sm:$0xff] }
 0x261   :  { %7426 = vst [vmem:[#allocation66_spill] sm:$0xff] %v6747_v58  ;;  %v2417_v24 = vmul.f32 %v6741_v6, %v6741_v6  ;;  %v2554_v27 = vadd.f32 %v2553_v30, %v2407_v23  ;;  %v1910_v57 = vmul.f32 %v5815_v9, %v1781_v37  ;;  %v1911_v52 = vmul.f32 %v5815_v9, %v1782_v22  ;;  %v7433_v23 = vld [vmem:[#allocation80_spill] sm:$0xff]  ;;  %v1466_v22 = vpop.f32.mrf.mxu0 }
 0x262   :  { %7428 = vst [vmem:[#allocation67_spill] sm:$0xff] %v6752_v18  ;;  %7430 = vst [vmem:[#allocation68_spill] sm:$0xff] %v6755_v4  ;;  %v6764_v13 = vadd.f32 %v7431_v59, %v1908_v55  ;;  %v1913_v54 = vmul.f32 %v5815_v9, %v1784_v47  ;;  %v2410_v42 = vmul.f32 %v6661_v45, %v6661_v45  ;;  %v1783_v37 = vmax.f32 %v6664_v8, 0.0  ;;  %v1659_v59 = vpop.f32.mrf.mxu1 }
 0x263   :  { %v2557_v33 = vadd.f32 %v2409_v46, %v6658_v63  ;;  %v6772_v34 = vmul.f32 %v6747_v58, %v6747_v58  ;;  %2555 = vadd.xlane.f32.xlu0 %v2554_v27  ;;  %v6775_v30 = vadd.f32 %v7433_v23, %v1911_v52  ;;  %v1785_v55 = vmax.f32 %v6679_v25, 0.0  ;;  %v7437_v23 = vld [vmem:[#allocation81_spill] sm:$0xff] }
 0x264   :  { %7432 = vst [vmem:[#allocation69_spill] sm:$0xff] %v6764_v13  ;;  %v6780_v29 = vadd.f32 %v7435_v31, %v1910_v57  ;;  %v2411_v47 = vmul.f32 %v6682_v1, %v6682_v1  ;;  %v1786_v46 = vmax.f32 %v6692_v19, 0.0  ;;  %v6787_v27 = vmul.f32 %v6764_v13, %v6764_v13  ;;  %v1470_v13 = vpop.f32.mrf.mxu0 }
 0x265   :  { %7434 = vst [vmem:[#allocation70_spill] sm:$0xff] %v6775_v30  ;;  %v2558_v63 = vadd.f32 %v2557_v33, %v2410_v42  ;;  %v1912_v52 = vmul.f32 %v5815_v9, %v1783_v37  ;;  %v1914_v8 = vmul.f32 %v5815_v9, %v1785_v55  ;;  %v1788_v25 = vmax.f32 %v6710_v28, 0.0  ;;  %v7438_v33 = vld [vmem:[#allocation82_spill] sm:$0xff] }
 0x266   :  { %7436 = vst [vmem:[#allocation72_spill] sm:$0xff] %v6780_v29  ;;  %v6794_v57 = vmul.f32 %v6775_v30, %v6775_v30  ;;  %v6797_v31 = vadd.f32 %v7437_v23, %v1913_v54  ;;  %v1915_v19 = vmul.f32 %v5815_v9, %v1786_v46  ;;  %v2414_v55 = vmul.f32 %v6699_v16, %v6699_v16 }
 0x267   :  { %v2559_v42 = vadd.f32 %v2558_v63, %v2411_v47  ;;  %v6801_v58 = vadd.f32 %v7438_v33, %v1912_v52  ;;  %v1917_v37 = vmul.f32 %v5815_v9, %v1788_v25  ;;  %v2562_v28 = vadd.f32 %v2413_v61, %v6696_v20  ;;  %v1663_v33 = vpop.f32.mrf.mxu1 }
 0x268   :  { %v6808_v30 = vadd.f32 %v5988_v48, %v1915_v19  ;;  %v1787_v54 = vmax.f32 %v6725_v40, 0.0  ;;  %v1789_v47 = vmax.f32 %v1655_v15, 0.0  ;;  %v1790_v63 = vmax.f32 %v1464_v12, 0.0  ;;  %v7441_v15 = vld [vmem:[#allocation83_spill] sm:$0xff]  ;;  %v7443_v19 = vld [vmem:[#allocation84_spill] sm:$0xff] }
 0x269   :  { %7439 = vst [vmem:[#allocation71_spill] sm:$0xff] %v6801_v58  ;;  %2560 = vadd.xlane.f32.xlu1 %v2559_v42  ;;  %v6812_v46 = vadd.f32 %v5985_v26, %v1914_v8  ;;  %v2415_v52 = vmul.f32 %v6719_v35, %v6719_v35  ;;  %v2563_v25 = vadd.f32 %v2562_v28, %v2414_v55  ;;  %v1792_v23 = vmax.f32 %v1657_v38, 0.0  ;;  %v1472_v42 = vpop.f32.mrf.mxu0 }
 0x26a   :  { %7440 = vst [vmem:[#allocation73_spill] sm:$0xff] %v6808_v30  ;;  %v6818_v20 = vmul.f32 %v6801_v58, %v6801_v58  ;;  %v1916_v48 = vmul.f32 %v5815_v9, %v1787_v54  ;;  %v1918_v61 = vmul.f32 %v5815_v9, %v1789_v47  ;;  %v1919_v40 = vmul.f32 %v5815_v9, %v1790_v63 }
 0x26b   :  { %v6825_v26 = vmul.f32 %v6808_v30, %v6808_v30  ;;  %v6828_v12 = vadd.f32 %v7441_v15, %v1917_v37  ;;  %v2564_v8 = vadd.f32 %v2563_v25, %v2415_v52  ;;  %v1921_v38 = vmul.f32 %v5815_v9, %v1792_v23  ;;  %v7446_v15 = vld [vmem:[#allocation85_spill] sm:$0xff] }
 0x26c   :  { %v6832_v55 = vadd.f32 %v7443_v19, %v1916_v48  ;;  %v2418_v28 = vmul.f32 %v6722_v51, %v6722_v51  ;;  %v2419_v54 = vmul.f32 %v6752_v18, %v6752_v18  ;;  %v2567_v47 = vadd.f32 %v2417_v24, %v6738_v7  ;;  %v1665_v48 = vpop.f32.mrf.mxu1  ;;  %v7448_v30 = vld [vmem:[#allocation89_spill] sm:$0xff]  ;;  %v5440_v18 = vld [vmem:[#allocation7 + $0x1b8] sm:$0xff] }
 0x26d   :  { %7442 = vst [vmem:[#allocation74_spill] sm:$0xff] %v6828_v12  ;;  %2565 = vadd.xlane.f32.xlu0 %v2564_v8  ;;  %v6840_v63 = vadd.f32 %v5999_v44, %v1918_v61  ;;  %v1791_v37 = vmax.f32 %v1466_v22, 0.0  ;;  %v7445_v52 = vunpack.c.h.bf16 %v5979_v56  ;;  %v1793_v23 = vmax.f32 %v1659_v59, 0.0  ;;  %v5441_v61 = vld [vmem:[#allocation7 + $0x1c0] sm:$0xff]  ;;  %v1474_v8 = vpop.f32.mrf.mxu0 }
 0x26e   :  { %7444 = vst [vmem:[#allocation76_spill] sm:$0xff] %v6832_v55  ;;  %v6846_v19 = vadd.f32 %v7446_v15, %v1919_v40  ;;  %v6849_v58 = vadd.f32 %v7448_v30, %v1921_v38  ;;  %v2568_v51 = vadd.f32 %v2567_v47, %v2418_v28  ;;  %v2050_v7 = vunpack.c.h.bf16 %v5440_v18  ;;  %v5442_v40 = vld [vmem:[#allocation7 + $0x1c8] sm:$0xff] }
 0x26f   :  { %v2177_v25 = vmul.f32 %v5663_v32, %v7445_v52  ;;  %v1920_v24 = vmul.f32 %v5815_v9, %v1791_v37  ;;  %v1922_v44 = vmul.f32 %v5815_v9, %v1793_v23  ;;  %v1794_v22 = vmax.f32 %v1470_v13, 0.0  ;;  %v1667_v13 = vpop.f32.mrf.mxu1 }
 0x270   :  { %7447 = vst [vmem:[#allocation75_spill] sm:$0xff] %v6846_v19  ;;  %7449 = vst [vmem:[#allocation77_spill] sm:$0xff] %v6849_v58  ;;  %v2051_v56 = vunpack.c.l.bf16 %v5441_v61  ;;  %v2569_v52 = vadd.f32 %v2568_v51, %v2419_v54  ;;  %v2179_v59 = vmul.f32 %v5663_v32, %v2050_v7  ;;  %v1796_v6 = vmax.f32 %v1663_v33, 0.0 }
 0x271   :  { %v2053_v15 = vunpack.c.l.bf16 %v5442_v40  ;;  %v6856_v30 = vmul.f32 %v6832_v55, %v6832_v55  ;;  %v6858_v38 = vadd.f32 %v2177_v25, %v1920_v24  ;;  %v1923_v18 = vmul.f32 %v5815_v9, %v1794_v22  ;;  %v1476_v24 = vpop.f32.mrf.mxu0  ;;  %v1669_v55 = vpop.f32.mrf.mxu1 }
 0x272   :  { %v2180_v28 = vmul.f32 %v5663_v32, %v2051_v56  ;;  %v6864_v47 = vmul.f32 %v6846_v19, %v6846_v19  ;;  %2570 = vadd.xlane.f32.xlu1 %v2569_v52  ;;  %v6866_v51 = vadd.f32 %v2179_v59, %v1922_v44  ;;  %v1925_v33 = vmul.f32 %v5815_v9, %v1796_v6 }
 0x273   :  { %7450 = vst [vmem:[#allocation78_spill] sm:$0xff] %v6858_v38  ;;  %v2422_v54 = vmul.f32 %v6755_v4, %v6755_v4  ;;  %v2182_v37 = vmul.f32 %v5663_v32, %v2053_v15  ;;  %v2423_v25 = vmul.f32 %v6780_v29, %v6780_v29  ;;  %v2572_v23 = vadd.f32 %v6787_v27, %v6772_v34  ;;  %v1480_v29 = vpop.f32.mrf.mxu0 }
 0x274   :  { %7451 = vst [vmem:[#allocation80_spill] sm:$0xff] %v6866_v51  ;;  %v1795_v7 = vmax.f32 %v1472_v42, 0.0  ;;  %v6876_v22 = vadd.f32 %v2180_v28, %v1923_v18  ;;  %v2052_v56 = vunpack.c.h.bf16 %v5441_v61  ;;  %v1797_v44 = vmax.f32 %v1665_v48, 0.0  ;;  %v5443_v42 = vld [vmem:[#allocation7 + $0x1d0] sm:$0xff]  ;;  %v5444_v28 = vld [vmem:[#allocation7 + $0x1d8] sm:$0xff] }
 0x275   :  { %v2054_v52 = vunpack.c.h.bf16 %v5442_v40  ;;  %v6880_v6 = vmul.f32 %v6858_v38, %v6858_v38  ;;  %v2573_v59 = vadd.f32 %v2572_v23, %v2422_v54  ;;  %v1798_v19 = vmax.f32 %v1474_v8, 0.0 }
 0x276   :  { %7452 = vst [vmem:[#allocation79_spill] sm:$0xff] %v6876_v22  ;;  %v1924_v15 = vmul.f32 %v5815_v9, %v1795_v7  ;;  %v2181_v4 = vmul.f32 %v5663_v32, %v2052_v56  ;;  %v1926_v34 = vmul.f32 %v5815_v9, %v1797_v44  ;;  %v2055_v18 = vunpack.c.l.bf16 %v5443_v42  ;;  %v1673_v44 = vpop.f32.mrf.mxu1 }
 0x277   :  { %v2183_v27 = vmul.f32 %v5663_v32, %v2054_v52  ;;  %v2574_v61 = vadd.f32 %v2573_v59, %v2423_v25  ;;  %v1927_v48 = vmul.f32 %v5815_v9, %v1798_v19  ;;  %v1800_v40 = vmax.f32 %v1667_v13, 0.0 }
 0x278   :  { %v2057_v38 = vunpack.c.l.bf16 %v5444_v28  ;;  %v6889_v54 = vmul.f32 %v6876_v22, %v6876_v22  ;;  %v6891_v8 = vadd.f32 %v2182_v37, %v1925_v33  ;;  %v6893_v23 = vadd.f32 %v2181_v4, %v1924_v15 }
 0x279   :  { %v2184_v7 = vmul.f32 %v5663_v32, %v2055_v18  ;;  %2575 = vadd.xlane.f32.xlu0 %v2574_v61  ;;  %v6896_v56 = vadd.f32 %v2183_v27, %v1926_v34  ;;  %v1929_v25 = vmul.f32 %v5815_v9, %v1800_v40  ;;  %v2426_v19 = vmul.f32 %v6797_v31, %v6797_v31  ;;  %v1482_v18 = vpop.f32.mrf.mxu0 }
 0x27a   :  { %7453 = vst [vmem:[#allocation81_spill] sm:$0xff] %v6893_v23  ;;  %v2577_v13 = vadd.f32 %v6818_v20, %v6794_v57  ;;  %v2186_v52 = vmul.f32 %v5663_v32, %v2057_v38  ;;  %v2427_v4 = vmul.f32 %v6812_v46, %v6812_v46  ;;  %v1799_v33 = vmax.f32 %v1476_v24, 0.0 }
 0x27b   :  { %v2056_v37 = vunpack.c.h.bf16 %v5443_v42  ;;  %v6906_v59 = vadd.f32 %v2184_v7, %v1927_v48  ;;  %v1801_v34 = vmax.f32 %v1669_v55, 0.0  ;;  %v2058_v27 = vunpack.c.h.bf16 %v5444_v28  ;;  %v5445_v42 = vld [vmem:[#allocation7 + $0x1e0] sm:$0xff]  ;;  %v1675_v7 = vpop.f32.mrf.mxu1 }
 0x27c   :  { %v2578_v15 = vadd.f32 %v2577_v13, %v2426_v19  ;;  %v6910_v61 = vmul.f32 %v6893_v23, %v6893_v23  ;;  %v1928_v57 = vmul.f32 %v5815_v9, %v1799_v33  ;;  %v1802_v38 = vmax.f32 %v1480_v29, 0.0  ;;  %v5446_v13 = vld [vmem:[#allocation7 + $0x1e8] sm:$0xff] }
 0x27d   :  { %7454 = vst [vmem:[#allocation82_spill] sm:$0xff] %v6906_v59  ;;  %v2185_v20 = vmul.f32 %v5663_v32, %v2056_v37  ;;  %v1930_v22 = vmul.f32 %v5815_v9, %v1801_v34  ;;  %v2187_v24 = vmul.f32 %v5663_v32, %v2058_v27  ;;  %v2059_v48 = vunpack.c.l.bf16 %v5445_v42 }
 0x27e   :  { %v2579_v40 = vadd.f32 %v2578_v15, %v2427_v4  ;;  %v6916_v55 = vadd.f32 %v2186_v52, %v1929_v25  ;;  %v1931_v28 = vmul.f32 %v5815_v9, %v1802_v38  ;;  %v1804_v19 = vmax.f32 %v1673_v44, 0.0  ;;  %v1484_v15 = vpop.f32.mrf.mxu0  ;;  %v1677_v38 = vpop.f32.mrf.mxu1 }
 0x27f   :  { %v2061_v23 = vunpack.c.l.bf16 %v5446_v13  ;;  %v6921_v33 = vmul.f32 %v6906_v59, %v6906_v59  ;;  %v6923_v29 = vadd.f32 %v2185_v20, %v1928_v57  ;;  %v6925_v4 = vadd.f32 %v2187_v24, %v1930_v22 }
 0x280   :  { %2580 = vadd.xlane.f32.xlu1 %v2579_v40  ;;  %v2188_v37 = vmul.f32 %v5663_v32, %v2059_v48  ;;  %v1933_v25 = vmul.f32 %v5815_v9, %v1804_v19  ;;  %v2430_v44 = vmul.f32 %v6828_v12, %v6828_v12  ;;  %v2582_v34 = vadd.f32 %v6856_v30, %v6825_v26 }
 0x281   :  { %7455 = vst [vmem:[#allocation83_spill] sm:$0xff] %v6923_v29  ;;  %v2190_v52 = vmul.f32 %v5663_v32, %v2061_v23  ;;  %v2431_v27 = vmul.f32 %v6840_v63, %v6840_v63  ;;  %v1803_v57 = vmax.f32 %v1482_v18, 0.0  ;;  %v2060_v20 = vunpack.c.h.bf16 %v5445_v42 }
 0x282   :  { %v1805_v22 = vmax.f32 %v1675_v7, 0.0  ;;  %v6936_v40 = vadd.f32 %v2188_v37, %v1931_v28  ;;  %v2583_v24 = vadd.f32 %v2582_v34, %v2430_v44  ;;  %v2062_v48 = vunpack.c.h.bf16 %v5446_v13  ;;  %v5447_v7 = vld [vmem:[#allocation7 + $0x1f0] sm:$0xff]  ;;  %v1486_v37 = vpop.f32.mrf.mxu0  ;;  %v5448_v34 = vld [vmem:[#allocation7 + $0x1f8] sm:$0xff] }
 0x283   :  { %v1806_v19 = vmax.f32 %v1484_v15, 0.0  ;;  %v2441_v23 = vmul.f32 %v6923_v29, %v6923_v29  ;;  %v6940_v59 = vadd.f32 %v2190_v52, %v1933_v25  ;;  %v1932_v12 = vmul.f32 %v5815_v9, %v1803_v57  ;;  %v1679_v52 = vpop.f32.mrf.mxu1 }
 0x284   :  { %7456 = vst [vmem:[#allocation84_spill] sm:$0xff] %v6936_v40  ;;  %v2189_v26 = vmul.f32 %v5663_v32, %v2060_v20  ;;  %v2584_v30 = vadd.f32 %v2583_v24, %v2431_v27  ;;  %v1934_v18 = vmul.f32 %v5815_v9, %v1805_v22  ;;  %v2063_v28 = vunpack.c.l.bf16 %v5447_v7 }
 0x285   :  { %v1935_v42 = vmul.f32 %v5815_v9, %v1806_v19  ;;  %v2191_v13 = vmul.f32 %v5663_v32, %v2062_v48  ;;  %v1808_v15 = vmax.f32 %v1677_v38, 0.0  ;;  %v2065_v25 = vunpack.c.l.bf16 %v5448_v34 }
 0x286   :  { %v6946_v44 = vadd.f32 %v2189_v26, %v1932_v12  ;;  %v2444_v57 = vmul.f32 %v6936_v40, %v6936_v40  ;;  %2585 = vadd.xlane.f32.xlu0 %v2584_v30  ;;  %v2192_v27 = vmul.f32 %v5663_v32, %v2063_v28  ;;  %v2434_v20 = vmul.f32 %v6849_v58, %v6849_v58 }
 0x287   :  { %v2587_v22 = vadd.f32 %v6880_v6, %v6864_v47  ;;  %v1937_v12 = vmul.f32 %v5815_v9, %v1808_v15  ;;  %v2194_v24 = vmul.f32 %v5663_v32, %v2065_v25  ;;  %v2435_v38 = vmul.f32 %v6866_v51, %v6866_v51  ;;  %v2456_v19 = vpop.xlane.xlu0 %2455 }
 0x288   :  { %v1807_v48 = vmax.f32 %v1486_v37, 0.0  ;;  %v6960_v26 = vadd.f32 %v2192_v27, %v1935_v42  ;;  %v2064_v40 = vunpack.c.h.bf16 %v5447_v7  ;;  %v1809_v28 = vmax.f32 %v1679_v52, 0.0 }
 0x289   :  { %v2588_v30 = vadd.f32 %v2587_v22, %v2434_v20  ;;  %v2445_v29 = vmul.f32 %v6946_v44, %v6946_v44  ;;  %v6964_v58 = vadd.f32 %v2191_v13, %v1934_v18  ;;  %v2066_v6 = vunpack.c.h.bf16 %v5448_v34 }
 0x28a   :  { %v1936_v47 = vmul.f32 %v5815_v9, %v1807_v48  ;;  %v6967_v15 = vadd.f32 %v2194_v24, %v1937_v12  ;;  %v2193_v51 = vmul.f32 %v5663_v32, %v2064_v40  ;;  %v1938_v37 = vmul.f32 %v5815_v9, %v1809_v28 }
 0x28b   :  { %v2589_v25 = vadd.f32 %v2588_v30, %v2435_v38  ;;  %v2448_v42 = vmul.f32 %v6960_v26, %v6960_v26  ;;  %v2195_v7 = vmul.f32 %v5663_v32, %v2066_v6  ;;  %v2438_v52 = vmul.f32 %v6891_v8, %v6891_v8 }
 0x28c   :  { %v2592_v18 = vadd.f32 %v6910_v61, %v6889_v54  ;;  %v6978_v13 = vadd.f32 %v2193_v51, %v1936_v47  ;;  %v2439_v34 = vmul.f32 %v6896_v56, %v6896_v56  ;;  %v2442_v9 = vmul.f32 %v6916_v55, %v6916_v55 }
 0x28d   :  { %2590 = vadd.xlane.f32.xlu1 %v2589_v25  ;;  %v2597_v40 = vadd.f32 %v2441_v23, %v6921_v33  ;;  %v2443_v32 = vmul.f32 %v6925_v4, %v6925_v4  ;;  %v2446_v20 = vmul.f32 %v6940_v59, %v6940_v59  ;;  %v2602_v22 = vadd.f32 %v2445_v29, %v2444_v57  ;;  %v2461_v54 = vpop.xlane.xlu0 %2460 }
 0x28e   :  { %v2593_v27 = vadd.f32 %v2592_v18, %v2438_v52  ;;  %v2449_v51 = vmul.f32 %v6978_v13, %v6978_v13  ;;  %v6991_v61 = vadd.f32 %v2195_v7, %v1938_v37  ;;  %v2612_v24 = vmax.f32 %v2456_v19, 1e-30 }
 0x28f   :  { %v2598_v12 = vadd.f32 %v2597_v40, %v2442_v9  ;;  %v2447_v33 = vmul.f32 %v6964_v58, %v6964_v58  ;;  %v2603_v23 = vadd.f32 %v2602_v22, %v2446_v20  ;;  %v2613_v48 = vmax.f32 %v2461_v54, 1e-30  ;;  %v7458_v40 = vld [vmem:[#allocation90_spill] sm:$0xff]  ;;  %v7460_v22 = vld [vmem:[#allocation92_spill] sm:$0xff] }
 0x290   :  { %v2594_v38 = vadd.f32 %v2593_v27, %v2439_v34  ;;  %v2450_v28 = vmul.f32 %v6967_v15, %v6967_v15  ;;  %v2607_v47 = vadd.f32 %v2449_v51, %v2448_v42  ;;  %5320 = vrsqrt.f32 %v2612_v24  ;;  %v7457_v42 = vld [vmem:[#allocation88_spill] sm:$0xff] }
 0x291   :  { %v2599_v30 = vadd.f32 %v2598_v12, %v2443_v32  ;;  %v2604_v29 = vadd.f32 %v2603_v23, %v2447_v33  ;;  %5322 = vrsqrt.f32 %v2613_v48  ;;  %v2451_v57 = vmul.f32 %v6991_v61, %v6991_v61  ;;  %v7459_v32 = vld [vmem:[#allocation86_spill] sm:$0xff]  ;;  %v7461_v12 = vld [vmem:[#allocation91_spill] sm:$0xff] }
 0x292   :  { %2595 = vadd.xlane.f32.xlu0 %v2594_v38  ;;  %v2608_v19 = vadd.f32 %v2607_v47, %v2450_v28  ;;  %v7462_v33 = vld [vmem:[#allocation87_spill] sm:$0xff] }
 0x293   :  { %2600 = vadd.xlane.f32.xlu1 %v2599_v30 }
 0x294   :  { %v2609_v6 = vadd.f32 %v2608_v19, %v2451_v57 }
 0x295   :  { %v2466_v25 = vpop.xlane.xlu1 %2465 }
 0x296   :  { %2605 = vadd.xlane.f32.xlu0 %v2604_v29  ;;  %v2614_v37 = vmax.f32 %v2466_v25, 1e-30 }
 0x297   :  { %2610 = vadd.xlane.f32.xlu1 %v2609_v6 }
 0x298   :  { %5324 = vrsqrt.f32 %v2614_v37 }
 0x29c   :  { %v2471_v7 = vpop.xlane.xlu1 %2470 }
 0x29d   :  { %v5321_v52 = vpop.eup %5320  ;;  %v2615_v18 = vmax.f32 %v2471_v7, 1e-30 }
 0x29e   :  { %v5323_v34 = vpop.eup %5322  ;;  %v2677_v9 = vmul.f32 %v5321_v52, %v7457_v42  ;;  %v2679_v27 = vmul.f32 %v5321_v52, %v7458_v40  ;;  %v2676_v20 = vmul.f32 %v5321_v52, %v7459_v32  ;;  %v2678_v23 = vmul.f32 %v5321_v52, %v7462_v33  ;;  %v7465_v33 = vld [vmem:[#allocation93_spill] sm:$0xff] }
 0x29f   :  { %5326 = vrsqrt.f32 %v2615_v18  ;;  %v2681_v54 = vmul.f32 %v5323_v34, %v7460_v22  ;;  %v2683_v51 = vmul.f32 %v5323_v34, %v6047_v53  ;;  %v2680_v24 = vmul.f32 %v5323_v34, %v7461_v12  ;;  %v2476_v38 = vpop.xlane.xlu0 %2475 }
 0x2a0   :  { %v2682_v48 = vmul.f32 %v5323_v34, %v6034_v49  ;;  %v2616_v30 = vmax.f32 %v2476_v38, 1e-30 }
 0x2a1   :  { %v4620_v28 = vpack.c.bf16 %v2681_v54, %v2677_v9  ;;  %v4622_v47 = vpack.c.bf16 %v2683_v51, %v2679_v27  ;;  %v4619_v29 = vpack.c.bf16 %v2680_v24, %v2676_v20  ;;  %v7464_v24 = vld [vmem:[#allocation105_spill] sm:$0xff] }
 0x2a2   :  { %v4621_v57 = vpack.c.bf16 %v2682_v48, %v2678_v23  ;;  %5328 = vrsqrt.f32 %v2616_v30  ;;  %v7466_v48 = vld [vmem:[#allocation96_spill] sm:$0xff] }
 0x2a3   :  { %3924 = vmatprep.mubr.bf16.mxu0 %v4620_v28  ;;  %4085 = vmatprep.mubr.bf16.mxu1 %v4622_v47  ;;  %v7467_v28 = vld [vmem:[#allocation95_spill] sm:$0xff] }
 0x2a4   :  { %3925 = vmatmul.mubr.bf16.vlgmr.msra.gmra.mxu0 %v4619_v29  ;;  %4086 = vmatmul.mubr.bf16.vlgmr.msra.gmra.mxu1 %v4621_v57  ;;  %v7468_v29 = vld [vmem:[#allocation97_spill] sm:$0xff] }
 0x2a5   :  { %v2481_v19 = vpop.xlane.xlu1 %2480  ;;  %v5325_v53 = vpop.eup %5324 }
 0x2a6   :  { %v2617_v6 = vmax.f32 %v2481_v19, 1e-30  ;;  %v2685_v37 = vmul.f32 %v5325_v53, %v6060_v5  ;;  %v2687_v49 = vmul.f32 %v5325_v53, %v6079_v0  ;;  %v2684_v18 = vmul.f32 %v5325_v53, %v6050_v50 }
 0x2a7   :  { %v2686_v34 = vmul.f32 %v5325_v53, %v6057_v2 }
 0x2a8   :  { %5330 = vrsqrt.f32 %v2617_v6 }
 0x2a9   :  { %v2486_v25 = vpop.xlane.xlu0 %2485 }
 0x2aa   :  { %v2618_v52 = vmax.f32 %v2486_v25, 1e-30 }
 0x2ac   :  { %v5327_v7 = vpop.eup %5326  ;;  %5332 = vrsqrt.f32 %v2618_v52 }
 0x2ad   :  { %v2689_v42 = vmul.f32 %v5327_v7, %v6091_v17  ;;  %v2691_v9 = vmul.f32 %v5327_v7, %v6142_v39  ;;  %v2688_v40 = vmul.f32 %v5327_v7, %v6064_v43  ;;  %v2690_v27 = vmul.f32 %v5327_v7, %v6075_v10  ;;  %v7463_v39 = vld [vmem:[#allocation94_spill] sm:$0xff] }
 0x2af   :  { %v4624_v32 = vpack.c.bf16 %v2689_v42, %v2685_v37  ;;  %v4626_v20 = vpack.c.bf16 %v2691_v9, %v2687_v49  ;;  %v4623_v22 = vpack.c.bf16 %v2688_v40, %v2684_v18  ;;  %v4625_v5 = vpack.c.bf16 %v2690_v27, %v2686_v34  ;;  %v5329_v50 = vpop.eup %5328  ;;  %v7469_v18 = vld [vmem:[#allocation99_spill] sm:$0xff]  ;;  %v7470_v42 = vld [vmem:[#allocation101_spill] sm:$0xff]  ;;  %v7471_v40 = vld [vmem:[#allocation98_spill] sm:$0xff] }
 0x2b0   :  { %v2491_v54 = vpop.xlane.xlu1 %2490  ;;  %v2693_v43 = vmul.f32 %v5329_v50, %v7463_v39  ;;  %v2695_v10 = vmul.f32 %v5329_v50, %v6111_v60  ;;  %v2692_v23 = vmul.f32 %v5329_v50, %v7465_v33  ;;  %v2694_v47 = vmul.f32 %v5329_v50, %v7467_v28  ;;  %v7476_v39 = vld [vmem:[#allocation103_spill] sm:$0xff]  ;;  %v7477_v28 = vld [vmem:[#allocation108_spill] sm:$0xff] }
 0x2b1   :  { %v2619_v51 = vmax.f32 %v2491_v54, 1e-30  ;;  %3932 = vmatprep.mubr.bf16.mxu0 %v4624_v32  ;;  %4093 = vmatprep.mubr.bf16.mxu1 %v4626_v20  ;;  %v7472_v20 = vld [vmem:[#allocation106_spill] sm:$0xff] }
 0x2b2   :  { %3933 = vmatmul.mubr.bf16.gmra.mxu0 %v4623_v22  ;;  %4094 = vmatmul.mubr.bf16.gmra.mxu1 %v4625_v5  ;;  %v7473_v5 = vld [vmem:[#allocation19_spill] sm:$0xff] }
 0x2b3   :  { %5334 = vrsqrt.f32 %v2619_v51  ;;  %v2496_v2 = vpop.xlane.xlu0 %2495  ;;  %v7474_v51 = vld [vmem:[#allocation102_spill] sm:$0xff] }
 0x2b4   :  { %v2620_v17 = vmax.f32 %v2496_v2, 1e-30 }
 0x2b5   :  { %v5331_v0 = vpop.eup %5330 }
 0x2b6   :  { %v2697_v12 = vmul.f32 %v5331_v0, %v6147_v11  ;;  %v2699_v38 = vmul.f32 %v5331_v0, %v7464_v24  ;;  %v2696_v30 = vmul.f32 %v5331_v0, %v7466_v48  ;;  %v2698_v57 = vmul.f32 %v5331_v0, %v7468_v29  ;;  %v7475_v0 = vld [vmem:[#allocation100_spill] sm:$0xff]  ;;  %v7478_v29 = vld [vmem:[#allocation109_spill] sm:$0xff] }
 0x2b7   :  { %5336 = vrsqrt.f32 %v2620_v17 }
 0x2b8   :  { %v4628_v19 = vpack.c.bf16 %v2697_v12, %v2693_v43  ;;  %v4630_v6 = vpack.c.bf16 %v2699_v38, %v2695_v10  ;;  %v4627_v53 = vpack.c.bf16 %v2696_v30, %v2692_v23  ;;  %v2501_v25 = vpop.xlane.xlu1 %2500  ;;  %v4629_v37 = vpack.c.bf16 %v2698_v57, %v2694_v47 }
 0x2b9   :  { %v2621_v7 = vmax.f32 %v2501_v25, 1e-30  ;;  %v5333_v11 = vpop.eup %5332 }
 0x2ba   :  { %3940 = vmatprep.mubr.bf16.mxu0 %v4628_v19  ;;  %4101 = vmatprep.mubr.bf16.mxu1 %v4630_v6  ;;  %v2701_v34 = vmul.f32 %v5333_v11, %v7469_v18  ;;  %v2703_v9 = vmul.f32 %v5333_v11, %v7470_v42  ;;  %v2700_v27 = vmul.f32 %v5333_v11, %v7471_v40  ;;  %v7479_v19 = vld [vmem:[#allocation112_spill] sm:$0xff]  ;;  %v7484_v18 = vld [vmem:[#allocation111_spill] sm:$0xff] }
 0x2bb   :  { %3941 = vmatmul.mubr.bf16.gmra.mxu0 %v4627_v53  ;;  %4102 = vmatmul.mubr.bf16.gmra.mxu1 %v4629_v37  ;;  %5338 = vrsqrt.f32 %v2621_v7  ;;  %v2702_v17 = vmul.f32 %v5333_v11, %v7475_v0  ;;  %v7480_v53 = vld [vmem:[#allocation20_spill] sm:$0xff]  ;;  %v7482_v11 = vld [vmem:[#allocation110_spill] sm:$0xff] }
 0x2bc   :  { %v7481_v37 = vld [vmem:[#allocation104_spill] sm:$0xff] }
 0x2bd   :  { %v7486_v0 = vld [vmem:[#allocation24_spill] sm:$0xff] }
 0x2be   :  { %v2506_v60 = vpop.xlane.xlu0 %2505 }
 0x2bf   :  { %v2622_v52 = vmax.f32 %v2506_v60, 1e-30 }
 0x2c0   :  { %v5335_v49 = vpop.eup %5334 }
 0x2c1   :  { %5340 = vrsqrt.f32 %v2622_v52  ;;  %v2511_v32 = vpop.xlane.xlu1 %2510  ;;  %v2705_v22 = vmul.f32 %v5335_v49, %v7472_v20  ;;  %v2707_v54 = vmul.f32 %v5335_v49, %v7473_v5  ;;  %v2704_v50 = vmul.f32 %v5335_v49, %v7474_v51  ;;  %v7483_v52 = vld [vmem:[#allocation107_spill] sm:$0xff] }
 0x2c2   :  { %v2623_v2 = vmax.f32 %v2511_v32, 1e-30  ;;  %v2706_v43 = vmul.f32 %v5335_v49, %v7476_v39  ;;  %v7487_v39 = vld [vmem:[#allocation21_spill] sm:$0xff] }
 0x2c3   :  { %v4632_v10 = vpack.c.bf16 %v2705_v22, %v2701_v34  ;;  %v4634_v12 = vpack.c.bf16 %v2707_v54, %v2703_v9  ;;  %v4631_v24 = vpack.c.bf16 %v2704_v50, %v2700_v27  ;;  %v7485_v54 = vld [vmem:[#allocation23_spill] sm:$0xff] }
 0x2c4   :  { %5342 = vrsqrt.f32 %v2623_v2  ;;  %v4633_v38 = vpack.c.bf16 %v2706_v43, %v2702_v17  ;;  %v5337_v33 = vpop.eup %5336 }
 0x2c5   :  { %3948 = vmatprep.mubr.bf16.mxu0 %v4632_v10  ;;  %4109 = vmatprep.mubr.bf16.mxu1 %v4634_v12  ;;  %v2709_v47 = vmul.f32 %v5337_v33, %v7477_v28  ;;  %v2711_v57 = vmul.f32 %v5337_v33, %v7478_v29  ;;  %v2708_v7 = vmul.f32 %v5337_v33, %v7481_v37  ;;  %v7488_v10 = vld [vmem:[#allocation22_spill] sm:$0xff] }
 0x2c6   :  { %3949 = vmatmul.mubr.bf16.gmra.mxu0 %v4631_v24  ;;  %4110 = vmatmul.mubr.bf16.gmra.mxu1 %v4633_v38  ;;  %v2710_v49 = vmul.f32 %v5337_v33, %v7483_v52  ;;  %v7489_v24 = vld [vmem:[#allocation27_spill] sm:$0xff]  ;;  %v7490_v33 = vld [vmem:[#allocation28_spill] sm:$0xff]  ;;  %v7492_v28 = vld [vmem:[#allocation26_spill] sm:$0xff] }
 0x2c7   :  { %v2516_v23 = vpop.xlane.xlu0 %2515  ;;  %v7493_v52 = vld [vmem:[#allocation31_spill] sm:$0xff] }
 0x2c8   :  { %v2624_v48 = vmax.f32 %v2516_v23, 1e-30  ;;  %v5339_v30 = vpop.eup %5338 }
 0x2c9   :  { %v2713_v6 = vmul.f32 %v5339_v30, %v7479_v19  ;;  %v2715_v25 = vmul.f32 %v5339_v30, %v7480_v53  ;;  %v2712_v60 = vmul.f32 %v5339_v30, %v7482_v11  ;;  %v2714_v34 = vmul.f32 %v5339_v30, %v7484_v18  ;;  %v7494_v18 = vld [vmem:[#allocation32_spill] sm:$0xff] }
 0x2ca   :  { %5344 = vrsqrt.f32 %v2624_v48  ;;  %v7491_v48 = vld [vmem:[#allocation25_spill] sm:$0xff] }
 0x2cb   :  { %v4636_v9 = vpack.c.bf16 %v2713_v6, %v2709_v47  ;;  %v4638_v40 = vpack.c.bf16 %v2715_v25, %v2711_v57  ;;  %v4635_v27 = vpack.c.bf16 %v2712_v60, %v2708_v7  ;;  %v4637_v20 = vpack.c.bf16 %v2714_v34, %v2710_v49 }
 0x2cc   :  { %v2521_v42 = vpop.xlane.xlu1 %2520 }
 0x2cd   :  { %v2625_v32 = vmax.f32 %v2521_v42, 1e-30  ;;  %3956 = vmatprep.mubr.bf16.mxu0 %v4636_v9  ;;  %4117 = vmatprep.mubr.bf16.mxu1 %v4638_v40  ;;  %v7495_v42 = vld [vmem:[#allocation35_spill] sm:$0xff]  ;;  %v7496_v40 = vld [vmem:[#allocation36_spill] sm:$0xff] }
 0x2ce   :  { %v5341_v22 = vpop.eup %5340  ;;  %3957 = vmatmul.mubr.bf16.gmra.mxu0 %v4635_v27  ;;  %4118 = vmatmul.mubr.bf16.gmra.mxu1 %v4637_v20 }
 0x2cf   :  { %5346 = vrsqrt.f32 %v2625_v32  ;;  %v2717_v51 = vmul.f32 %v5341_v22, %v7485_v54  ;;  %v2719_v17 = vmul.f32 %v5341_v22, %v7486_v0  ;;  %v2716_v43 = vmul.f32 %v5341_v22, %v7487_v39  ;;  %v7497_v32 = vld [vmem:[#allocation29_spill] sm:$0xff] }
 0x2d0   :  { %v2526_v5 = vpop.xlane.xlu0 %2525  ;;  %v2718_v12 = vmul.f32 %v5341_v22, %v7488_v10  ;;  %v7498_v22 = vld [vmem:[#allocation33_spill] sm:$0xff] }
 0x2d1   :  { %v5343_v50 = vpop.eup %5342  ;;  %v2626_v2 = vmax.f32 %v2526_v5, 1e-30 }
 0x2d2   :  { %v2721_v38 = vmul.f32 %v5343_v50, %v7489_v24  ;;  %v2723_v23 = vmul.f32 %v5343_v50, %v7490_v33  ;;  %v2720_v30 = vmul.f32 %v5343_v50, %v7491_v48  ;;  %v2722_v47 = vmul.f32 %v5343_v50, %v7492_v28  ;;  %v7501_v48 = vld [vmem:[#allocation39_spill] sm:$0xff]  ;;  %v7502_v28 = vld [vmem:[#allocation40_spill] sm:$0xff] }
 0x2d3   :  { %5348 = vrsqrt.f32 %v2626_v2  ;;  %v7500_v2 = vld [vmem:[#allocation34_spill] sm:$0xff] }
 0x2d4   :  { %v4640_v29 = vpack.c.bf16 %v2721_v38, %v2717_v51  ;;  %v4642_v57 = vpack.c.bf16 %v2723_v23, %v2719_v17  ;;  %v4639_v19 = vpack.c.bf16 %v2720_v30, %v2716_v43  ;;  %v4641_v6 = vpack.c.bf16 %v2722_v47, %v2718_v12  ;;  %v7499_v51 = vld [vmem:[#allocation30_spill] sm:$0xff] }
 0x2d5   :  { %v2531_v53 = vpop.xlane.xlu1 %2530 }
 0x2d6   :  { %v2627_v25 = vmax.f32 %v2531_v53, 1e-30  ;;  %3964 = vmatprep.mubr.bf16.mxu0 %v4640_v29  ;;  %4125 = vmatprep.mubr.bf16.mxu1 %v4642_v57  ;;  %v7503_v29 = vld [vmem:[#allocation43_spill] sm:$0xff]  ;;  %v7505_v53 = vld [vmem:[#allocation37_spill] sm:$0xff] }
 0x2d7   :  { %3965 = vmatmul.mubr.bf16.gmra.mxu0 %v4639_v19  ;;  %4126 = vmatmul.mubr.bf16.gmra.mxu1 %v4641_v6  ;;  %v5345_v37 = vpop.eup %5344  ;;  %v7504_v19 = vld [vmem:[#allocation44_spill] sm:$0xff] }
 0x2d8   :  { %5350 = vrsqrt.f32 %v2627_v25  ;;  %v2725_v49 = vmul.f32 %v5345_v37, %v7493_v52  ;;  %v2727_v34 = vmul.f32 %v5345_v37, %v7494_v18  ;;  %v2724_v20 = vmul.f32 %v5345_v37, %v7497_v32  ;;  %v7508_v52 = vld [vmem:[#allocation42_spill] sm:$0xff] }
 0x2d9   :  { %v2726_v50 = vmul.f32 %v5345_v37, %v7499_v51  ;;  %v7506_v37 = vld [vmem:[#allocation41_spill] sm:$0xff] }
 0x2da   :  { %v2536_v7 = vpop.xlane.xlu0 %2535 }
 0x2db   :  { %v2628_v11 = vmax.f32 %v2536_v7, 1e-30 }
 0x2dc   :  { %v5347_v60 = vpop.eup %5346 }
 0x2dd   :  { %v2729_v9 = vmul.f32 %v5347_v60, %v7495_v42  ;;  %v2731_v27 = vmul.f32 %v5347_v60, %v7496_v40  ;;  %v2728_v5 = vmul.f32 %v5347_v60, %v7498_v22  ;;  %5352 = vrsqrt.f32 %v2628_v11  ;;  %v7507_v11 = vld [vmem:[#allocation38_spill] sm:$0xff] }
 0x2de   :  { %v2541_v54 = vpop.xlane.xlu1 %2540  ;;  %v2730_v0 = vmul.f32 %v5347_v60, %v7500_v2 }
 0x2df   :  { %v2629_v17 = vmax.f32 %v2541_v54, 1e-30  ;;  %v4644_v39 = vpack.c.bf16 %v2729_v9, %v2725_v49  ;;  %v4646_v43 = vpack.c.bf16 %v2731_v27, %v2727_v34  ;;  %v4643_v10 = vpack.c.bf16 %v2728_v5, %v2724_v20  ;;  %v7509_v54 = vld [vmem:[#allocation47_spill] sm:$0xff] }
 0x2e0   :  { %v4645_v12 = vpack.c.bf16 %v2730_v0, %v2726_v50  ;;  %v5349_v24 = vpop.eup %5348  ;;  %v7510_v50 = vld [vmem:[#allocation48_spill] sm:$0xff]  ;;  %v7511_v0 = vld [vmem:[#allocation51_spill] sm:$0xff] }
 0x2e1   :  { %5354 = vrsqrt.f32 %v2629_v17  ;;  %3972 = vmatprep.mubr.bf16.mxu0 %v4644_v39  ;;  %4133 = vmatprep.mubr.bf16.mxu1 %v4646_v43  ;;  %v2733_v30 = vmul.f32 %v5349_v24, %v7501_v48  ;;  %v2735_v47 = vmul.f32 %v5349_v24, %v7502_v28  ;;  %v2732_v25 = vmul.f32 %v5349_v24, %v7505_v53  ;;  %v7512_v43 = vld [vmem:[#allocation45_spill] sm:$0xff] }
 0x2e2   :  { %3973 = vmatmul.mubr.bf16.gmra.mxu0 %v4643_v10  ;;  %4134 = vmatmul.mubr.bf16.gmra.mxu1 %v4645_v12  ;;  %v2734_v60 = vmul.f32 %v5349_v24, %v7507_v11  ;;  %v7513_v12 = vld [vmem:[#allocation49_spill] sm:$0xff] }
 0x2e3   :  { %v2546_v38 = vpop.xlane.xlu0 %2545 }
 0x2e4   :  { %v2630_v33 = vmax.f32 %v2546_v38, 1e-30  ;;  %v7514_v38 = vld [vmem:[#allocation46_spill] sm:$0xff] }
 0x2e5   :  { %v5351_v23 = vpop.eup %5350 }
 0x2e6   :  { %v2737_v57 = vmul.f32 %v5351_v23, %v7503_v29  ;;  %v2739_v6 = vmul.f32 %v5351_v23, %v7504_v19  ;;  %v2736_v7 = vmul.f32 %v5351_v23, %v7506_v37  ;;  %v2738_v49 = vmul.f32 %v5351_v23, %v7508_v52  ;;  %v7515_v23 = vld [vmem:[#allocation50_spill] sm:$0xff]  ;;  %v7516_v37 = vld [vmem:[#allocation52_spill] sm:$0xff] }
 0x2e7   :  { %5356 = vrsqrt.f32 %v2630_v33 }
 0x2e8   :  { %v2551_v18 = vpop.xlane.xlu1 %2550  ;;  %v4648_v34 = vpack.c.bf16 %v2737_v57, %v2733_v30  ;;  %v4650_v42 = vpack.c.bf16 %v2739_v6, %v2735_v47  ;;  %v4647_v9 = vpack.c.bf16 %v2736_v7, %v2732_v25  ;;  %v4649_v27 = vpack.c.bf16 %v2738_v49, %v2734_v60  ;;  %v7517_v60 = vld [vmem:[#allocation57_spill] sm:$0xff] }
 0x2e9   :  { %v2631_v40 = vmax.f32 %v2551_v18, 1e-30  ;;  %v7518_v18 = vld [vmem:[#allocation53_spill] sm:$0xff] }
 0x2ea   :  { %3980 = vmatprep.mubr.bf16.mxu0 %v4648_v34  ;;  %4141 = vmatprep.mubr.bf16.mxu1 %v4650_v42  ;;  %v5353_v32 = vpop.eup %5352  ;;  %v7519_v42 = vld [vmem:[#allocation54_spill] sm:$0xff] }
 0x2eb   :  { %5358 = vrsqrt.f32 %v2631_v40  ;;  %3981 = vmatmul.mubr.bf16.gmra.mxu0 %v4647_v9  ;;  %4142 = vmatmul.mubr.bf16.gmra.mxu1 %v4649_v27  ;;  %v2741_v51 = vmul.f32 %v5353_v32, %v7509_v54  ;;  %v2743_v2 = vmul.f32 %v5353_v32, %v7510_v50  ;;  %v2740_v10 = vmul.f32 %v5353_v32, %v7512_v43  ;;  %v7520_v27 = vld [vmem:[#allocation55_spill] sm:$0xff] }
 0x2ec   :  { %v2556_v20 = vpop.xlane.xlu0 %2555  ;;  %v2742_v33 = vmul.f32 %v5353_v32, %v7514_v38 }
 0x2ed   :  { %v2632_v22 = vmax.f32 %v2556_v20, 1e-30 }
 0x2ee   :  { %v5355_v5 = vpop.eup %5354 }
 0x2ef   :  { %v2745_v17 = vmul.f32 %v5355_v5, %v7511_v0  ;;  %v2747_v39 = vmul.f32 %v5355_v5, %v6526_v3  ;;  %v2744_v24 = vmul.f32 %v5355_v5, %v7513_v12  ;;  %v2746_v48 = vmul.f32 %v5355_v5, %v7515_v23  ;;  %v7523_v12 = vld [vmem:[#allocation60_spill] sm:$0xff] }
 0x2f0   :  { %5360 = vrsqrt.f32 %v2632_v22 }
 0x2f1   :  { %v4652_v28 = vpack.c.bf16 %v2745_v17, %v2741_v51  ;;  %v4654_v47 = vpack.c.bf16 %v2747_v39, %v2743_v2  ;;  %v4651_v29 = vpack.c.bf16 %v2744_v24, %v2740_v10  ;;  %v4653_v19 = vpack.c.bf16 %v2746_v48, %v2742_v33  ;;  %v7521_v2 = vld [vmem:[#allocation58_spill] sm:$0xff]  ;;  %v7524_v33 = vld [vmem:[#allocation59_spill] sm:$0xff] }
 0x2f2   :  { %v2561_v30 = vpop.xlane.xlu1 %2560 }
 0x2f3   :  { %v2633_v57 = vmax.f32 %v2561_v30, 1e-30  ;;  %3988 = vmatprep.mubr.bf16.mxu0 %v4652_v28  ;;  %4149 = vmatprep.mubr.bf16.mxu1 %v4654_v47 }
 0x2f4   :  { %3989 = vmatmul.mubr.bf16.gmra.mxu0 %v4651_v29  ;;  %4150 = vmatmul.mubr.bf16.gmra.mxu1 %v4653_v19  ;;  %v5357_v3 = vpop.eup %5356 }
 0x2f5   :  { %5362 = vrsqrt.f32 %v2633_v57  ;;  %v2749_v7 = vmul.f32 %v5357_v3, %v7516_v37  ;;  %v2751_v11 = vmul.f32 %v5357_v3, %v6566_v62  ;;  %v2748_v34 = vmul.f32 %v5357_v3, %v7518_v18 }
 0x2f6   :  { %v2566_v6 = vpop.xlane.xlu0 %2565  ;;  %v2750_v40 = vmul.f32 %v5357_v3, %v6533_v36  ;;  %v7522_v36 = vld [vmem:[#allocation56_spill] sm:$0xff]  ;;  %v7525_v3 = vld [vmem:[#allocation62_spill] sm:$0xff] }
 0x2f7   :  { %v2634_v53 = vmax.f32 %v2566_v6, 1e-30 }
 0x2f8   :  { %v5359_v25 = vpop.eup %5358 }
 0x2f9   :  { %v2753_v52 = vmul.f32 %v5359_v25, %v7517_v60  ;;  %v2755_v49 = vmul.f32 %v5359_v25, %v6601_v14  ;;  %v2752_v9 = vmul.f32 %v5359_v25, %v7519_v42  ;;  %5364 = vrsqrt.f32 %v2634_v53  ;;  %v7528_v60 = vld [vmem:[#allocation67_spill] sm:$0xff] }
 0x2fa   :  { %v2754_v32 = vmul.f32 %v5359_v25, %v7520_v27 }
 0x2fb   :  { %v2571_v20 = vpop.xlane.xlu1 %2570  ;;  %v4656_v22 = vpack.c.bf16 %v2753_v52, %v2749_v7  ;;  %v4658_v5 = vpack.c.bf16 %v2755_v49, %v2751_v11  ;;  %v4655_v54 = vpack.c.bf16 %v2752_v9, %v2748_v34  ;;  %v7527_v7 = vld [vmem:[#allocation64_spill] sm:$0xff]  ;;  %v7529_v49 = vld [vmem:[#allocation63_spill] sm:$0xff]  ;;  %v7530_v34 = vld [vmem:[#allocation65_spill] sm:$0xff] }
 0x2fc   :  { %v2635_v51 = vmax.f32 %v2571_v20, 1e-30  ;;  %v4657_v50 = vpack.c.bf16 %v2754_v32, %v2750_v40 }
 0x2fd   :  { %3996 = vmatprep.mubr.bf16.mxu0 %v4656_v22  ;;  %4157 = vmatprep.mubr.bf16.mxu1 %v4658_v5  ;;  %v5361_v62 = vpop.eup %5360 }
 0x2fe   :  { %5366 = vrsqrt.f32 %v2635_v51  ;;  %3997 = vmatmul.mubr.bf16.gmra.mxu0 %v4655_v54  ;;  %4158 = vmatmul.mubr.bf16.gmra.mxu1 %v4657_v50  ;;  %v2757_v0 = vmul.f32 %v5361_v62, %v7521_v2  ;;  %v2759_v17 = vmul.f32 %v5361_v62, %v6644_v21  ;;  %v2756_v39 = vmul.f32 %v5361_v62, %v7522_v36  ;;  %v7531_v51 = vld [vmem:[#allocation69_spill] sm:$0xff]  ;;  %v7533_v2 = vld [vmem:[#allocation66_spill] sm:$0xff] }
 0x2ff   :  { %v2758_v43 = vmul.f32 %v5361_v62, %v6617_v41  ;;  %v7532_v62 = vld [vmem:[#allocation72_spill] sm:$0xff] }
 0x302   :  { %v5363_v14 = vpop.eup %5362  ;;  %v2576_v10 = vpop.xlane.xlu0 %2575 }
 0x303   :  { %v2761_v24 = vmul.f32 %v5363_v14, %v7523_v12  ;;  %v2763_v38 = vmul.f32 %v5363_v14, %v6682_v1  ;;  %v2760_v23 = vmul.f32 %v5363_v14, %v7524_v33  ;;  %v2762_v48 = vmul.f32 %v5363_v14, %v6661_v45  ;;  %v7526_v45 = vld [vmem:[#allocation61_spill] sm:$0xff] }
 0x304   :  { %v2636_v30 = vmax.f32 %v2576_v10, 1e-30 }
 0x305   :  { %v4660_v28 = vpack.c.bf16 %v2761_v24, %v2757_v0  ;;  %v4662_v47 = vpack.c.bf16 %v2763_v38, %v2759_v17  ;;  %v4659_v29 = vpack.c.bf16 %v2760_v23, %v2756_v39  ;;  %v4661_v57 = vpack.c.bf16 %v2762_v48, %v2758_v43  ;;  %v7534_v17 = vld [vmem:[#allocation71_spill] sm:$0xff]  ;;  %v7535_v43 = vld [vmem:[#allocation70_spill] sm:$0xff]  ;;  %v7536_v38 = vld [vmem:[#allocation68_spill] sm:$0xff] }
 0x306   :  { %v5365_v21 = vpop.eup %5364  ;;  %5368 = vrsqrt.f32 %v2636_v30 }
 0x307   :  { %4004 = vmatprep.mubr.bf16.mxu0 %v4660_v28  ;;  %4165 = vmatprep.mubr.bf16.mxu1 %v4662_v47  ;;  %v2765_v6 = vmul.f32 %v5365_v21, %v7525_v3  ;;  %v2767_v53 = vmul.f32 %v5365_v21, %v6719_v35  ;;  %v2764_v25 = vmul.f32 %v5365_v21, %v7526_v45  ;;  %v7538_v45 = vld [vmem:[#allocation73_spill] sm:$0xff] }
 0x308   :  { %4005 = vmatmul.mubr.bf16.gmra.mxu0 %v4659_v29  ;;  %4166 = vmatmul.mubr.bf16.gmra.mxu1 %v4661_v57  ;;  %v2766_v37 = vmul.f32 %v5365_v21, %v6699_v16 }
 0x309   :  { %v2581_v41 = vpop.xlane.xlu1 %2580 }
 0x30a   :  { %v2637_v19 = vmax.f32 %v2581_v41, 1e-30 }
 0x30b   :  { %v5367_v1 = vpop.eup %5366 }
 0x30c   :  { %5370 = vrsqrt.f32 %v2637_v19  ;;  %v2769_v11 = vmul.f32 %v5367_v1, %v7527_v7  ;;  %v2771_v52 = vmul.f32 %v5367_v1, %v7528_v60  ;;  %v2768_v18 = vmul.f32 %v5367_v1, %v7529_v49 }
 0x30d   :  { %v2770_v42 = vmul.f32 %v5367_v1, %v7530_v34 }
 0x30e   :  { %v4664_v9 = vpack.c.bf16 %v2769_v11, %v2765_v6  ;;  %v4666_v40 = vpack.c.bf16 %v2771_v52, %v2767_v53  ;;  %v4663_v27 = vpack.c.bf16 %v2768_v18, %v2764_v25  ;;  %v7537_v6 = vld [vmem:[#allocation76_spill] sm:$0xff]  ;;  %v7540_v11 = vld [vmem:[#allocation78_spill] sm:$0xff]  ;;  %v7542_v18 = vld [vmem:[#allocation75_spill] sm:$0xff] }
 0x30f   :  { %v4665_v32 = vpack.c.bf16 %v2770_v42, %v2766_v37  ;;  %v2586_v20 = vpop.xlane.xlu0 %2585  ;;  %v7539_v37 = vld [vmem:[#allocation74_spill] sm:$0xff]  ;;  %v7541_v52 = vld [vmem:[#allocation80_spill] sm:$0xff]  ;;  %v7543_v42 = vld [vmem:[#allocation77_spill] sm:$0xff] }
 0x310   :  { %4012 = vmatprep.mubr.bf16.mxu0 %v4664_v9  ;;  %4173 = vmatprep.mubr.bf16.mxu1 %v4666_v40  ;;  %v2638_v35 = vmax.f32 %v2586_v20, 1e-30 }
 0x311   :  { %4013 = vmatmul.mubr.bf16.gmra.mxu0 %v4663_v27  ;;  %4174 = vmatmul.mubr.bf16.gmra.mxu1 %v4665_v32 }
 0x312   :  { %5372 = vrsqrt.f32 %v2638_v35 }
 0x313   :  { %v5369_v22 = vpop.eup %5368 }
 0x314   :  { %v2773_v50 = vmul.f32 %v5369_v22, %v7531_v51  ;;  %v2775_v14 = vmul.f32 %v5369_v22, %v7532_v62  ;;  %v2772_v0 = vmul.f32 %v5369_v22, %v7533_v2  ;;  %v2774_v33 = vmul.f32 %v5369_v22, %v7536_v38  ;;  %v7544_v22 = vld [vmem:[#allocation81_spill] sm:$0xff]  ;;  %v7546_v62 = vld [vmem:[#allocation82_spill] sm:$0xff]  ;;  %v7547_v2 = vld [vmem:[#allocation79_spill] sm:$0xff] }
 0x316   :  { %v2591_v16 = vpop.xlane.xlu1 %2590 }
 0x317   :  { %v2639_v5 = vmax.f32 %v2591_v16, 1e-30 }
 0x319   :  { %v5371_v54 = vpop.eup %5370  ;;  %5374 = vrsqrt.f32 %v2639_v5  ;;  %v7545_v5 = vld [vmem:[#allocation83_spill] sm:$0xff] }
 0x31a   :  { %v2777_v36 = vmul.f32 %v5371_v54, %v7534_v17  ;;  %v2779_v39 = vmul.f32 %v5371_v54, %v6812_v46  ;;  %v2776_v10 = vmul.f32 %v5371_v54, %v7535_v43  ;;  %v2778_v12 = vmul.f32 %v5371_v54, %v6797_v31 }
 0x31b   :  { %v2596_v24 = vpop.xlane.xlu0 %2595 }
 0x31c   :  { %v2640_v23 = vmax.f32 %v2596_v24, 1e-30  ;;  %v2601_v48 = vpop.xlane.xlu1 %2600  ;;  %v4668_v30 = vpack.c.bf16 %v2777_v36, %v2773_v50  ;;  %v4670_v28 = vpack.c.bf16 %v2779_v39, %v2775_v14  ;;  %v4667_v47 = vpack.c.bf16 %v2776_v10, %v2772_v0 }
 0x31d   :  { %v2641_v29 = vmax.f32 %v2601_v48, 1e-30  ;;  %v4669_v57 = vpack.c.bf16 %v2778_v12, %v2774_v33 }
 0x31e   :  { %5376 = vrsqrt.f32 %v2640_v23  ;;  %4020 = vmatprep.mubr.bf16.mxu0 %v4668_v30  ;;  %4181 = vmatprep.mubr.bf16.mxu1 %v4670_v28  ;;  %v7548_v28 = vld [vmem:[#allocation84_spill] sm:$0xff] }
 0x31f   :  { %5378 = vrsqrt.f32 %v2641_v29  ;;  %v2606_v21 = vpop.xlane.xlu0 %2605  ;;  %4021 = vmatmul.mubr.bf16.gmra.mxu0 %v4667_v47  ;;  %4182 = vmatmul.mubr.bf16.gmra.mxu1 %v4669_v57  ;;  %v5373_v19 = vpop.eup %5372 }
 0x320   :  { %v2642_v46 = vmax.f32 %v2606_v21, 1e-30  ;;  %v2611_v41 = vpop.xlane.xlu1 %2610  ;;  %v2781_v1 = vmul.f32 %v5373_v19, %v7537_v6  ;;  %v2783_v53 = vmul.f32 %v5373_v19, %v6840_v63  ;;  %v2780_v25 = vmul.f32 %v5373_v19, %v7538_v45 }
 0x321   :  { %v2643_v31 = vmax.f32 %v2611_v41, 1e-30  ;;  %v2782_v7 = vmul.f32 %v5373_v19, %v7539_v37 }
 0x322   :  { %5380 = vrsqrt.f32 %v2642_v46 }
 0x323   :  { %5382 = vrsqrt.f32 %v2643_v31 }
 0x326   :  { %v5375_v3 = vpop.eup %5374 }
 0x327   :  { %v2785_v60 = vmul.f32 %v5375_v3, %v7540_v11  ;;  %v2787_v49 = vmul.f32 %v5375_v3, %v7541_v52  ;;  %v2784_v34 = vmul.f32 %v5375_v3, %v7542_v18  ;;  %v2786_v9 = vmul.f32 %v5375_v3, %v7543_v42 }
 0x329   :  { %v4672_v40 = vpack.c.bf16 %v2785_v60, %v2781_v1  ;;  %v4674_v27 = vpack.c.bf16 %v2787_v49, %v2783_v53  ;;  %v4671_v32 = vpack.c.bf16 %v2784_v34, %v2780_v25  ;;  %v4673_v20 = vpack.c.bf16 %v2786_v9, %v2782_v7 }
 0x32b   :  { %v5377_v35 = vpop.eup %5376  ;;  %4028 = vmatprep.mubr.bf16.mxu0 %v4672_v40  ;;  %4189 = vmatprep.mubr.bf16.mxu1 %v4674_v27 }
 0x32c   :  { %v5379_v63 = vpop.eup %5378  ;;  %4029 = vmatmul.mubr.bf16.gmra.mxu0 %v4671_v32  ;;  %4190 = vmatmul.mubr.bf16.gmra.mxu1 %v4673_v20  ;;  %v2789_v16 = vmul.f32 %v5377_v35, %v7544_v22  ;;  %v2791_v51 = vmul.f32 %v5377_v35, %v6896_v56  ;;  %v2788_v0 = vmul.f32 %v5377_v35, %v7547_v2 }
 0x32d   :  { %v2793_v54 = vmul.f32 %v5379_v63, %v7545_v5  ;;  %v2795_v50 = vmul.f32 %v5379_v63, %v6925_v4  ;;  %v2792_v14 = vmul.f32 %v5379_v63, %v7546_v62  ;;  %v2790_v17 = vmul.f32 %v5377_v35, %v6891_v8 }
 0x32e   :  { %v2794_v36 = vmul.f32 %v5379_v63, %v6916_v55 }
 0x32f   :  { %v5381_v39 = vpop.eup %5380  ;;  %v4676_v43 = vpack.c.bf16 %v2793_v54, %v2789_v16  ;;  %v4678_v10 = vpack.c.bf16 %v2795_v50, %v2791_v51  ;;  %v4675_v24 = vpack.c.bf16 %v2792_v14, %v2788_v0 }
 0x330   :  { %v5383_v12 = vpop.eup %5382  ;;  %v4677_v38 = vpack.c.bf16 %v2794_v36, %v2790_v17  ;;  %v2797_v33 = vmul.f32 %v5381_v39, %v6946_v44  ;;  %v2799_v4 = vmul.f32 %v5381_v39, %v6964_v58  ;;  %v2796_v44 = vmul.f32 %v5381_v39, %v7548_v28 }
 0x331   :  { %4036 = vmatprep.mubr.bf16.mxu0 %v4676_v43  ;;  %4197 = vmatprep.mubr.bf16.mxu1 %v4678_v10  ;;  %v2801_v56 = vmul.f32 %v5383_v12, %v6978_v13  ;;  %v2803_v23 = vmul.f32 %v5383_v12, %v6991_v61  ;;  %v2800_v55 = vmul.f32 %v5383_v12, %v6960_v26 }
 0x332   :  { %v2802_v30 = vmul.f32 %v5383_v12, %v6967_v15  ;;  %v2798_v47 = vmul.f32 %v5381_v39, %v6940_v59 }
 0x333   :  { %v4680_v48 = vpack.c.bf16 %v2801_v56, %v2797_v33  ;;  %v4682_v8 = vpack.c.bf16 %v2803_v23, %v2799_v4  ;;  %v4679_v29 = vpack.c.bf16 %v2800_v55, %v2796_v44 }
 0x334   :  { %4037 = vmatmul.mubr.bf16.gmra.mxu0 %v4675_v24  ;;  %4198 = vmatmul.mubr.bf16.gmra.mxu1 %v4677_v38  ;;  %v4681_v13 = vpack.c.bf16 %v2802_v30, %v2798_v47 }
 0x335   :  { %4044 = vmatprep.mubr.bf16.mxu0 %v4680_v48  ;;  %4205 = vmatprep.mubr.bf16.mxu1 %v4682_v8 }
 0x33c   :  { %4045 = vmatmul.mubr.bf16.gmra.mxu0 %v4679_v29  ;;  %4206 = vmatmul.mubr.bf16.gmra.mxu1 %v4681_v13 }
 0x364   :  { %v4923_v58 = vpop.f32.mrf.mxu0  ;;  %v5035_v61 = vpop.f32.mrf.mxu1 }
 0x366   :  { %v4924_v57 = vpop.f32.mrf.mxu0  ;;  %v5036_v21 = vpop.f32.mrf.mxu1 }
 0x367   :  { %v4925_v46 = vadd.f32 %v4924_v57, %v4923_v58  ;;  %v5037_v41 = vadd.f32 %v5036_v21, %v5035_v61 }
 0x368   :  { %v4926_v31 = vpop.f32.mrf.mxu0  ;;  %v5038_v26 = vpop.f32.mrf.mxu1 }
 0x369   :  { %v4088_v19 = vadd.f32 %v5037_v41, %v4925_v46 }
 0x36a   :  { %v4927_v15 = vpop.f32.mrf.mxu0  ;;  %v5039_v3 = vpop.f32.mrf.mxu1 }
 0x36b   :  { %4214 = vst [vmem:[#allocation13] sm:$0xff] %v4088_v19  ;;  %v4928_v6 = vadd.f32 %v4927_v15, %v4926_v31  ;;  %v5040_v1 = vadd.f32 %v5039_v3, %v5038_v26 }
 0x36d   :  { %v4091_v53 = vadd.f32 %v5040_v1, %v4928_v6 }
 0x36f   :  { %4215 = vst [vmem:[#allocation13 + $0x8] sm:$0xff] %v4091_v53 }
 0x372   :  { %v4929_v59 = vpop.f32.mrf.mxu0  ;;  %v5041_v45 = vpop.f32.mrf.mxu1 }
 0x374   :  { %v4930_v25 = vpop.f32.mrf.mxu0  ;;  %v5042_v37 = vpop.f32.mrf.mxu1 }
 0x375   :  { %v4931_v7 = vadd.f32 %v4930_v25, %v4929_v59  ;;  %v5043_v11 = vadd.f32 %v5042_v37, %v5041_v45 }
 0x376   :  { %v4932_v60 = vpop.f32.mrf.mxu0  ;;  %v5044_v52 = vpop.f32.mrf.mxu1 }
 0x377   :  { %v4096_v49 = vadd.f32 %v5043_v11, %v4931_v7 }
 0x378   :  { %v4933_v18 = vpop.f32.mrf.mxu0  ;;  %v5045_v34 = vpop.f32.mrf.mxu1 }
 0x379   :  { %4216 = vst [vmem:[#allocation13 + $0x10] sm:$0xff] %v4096_v49  ;;  %v4934_v42 = vadd.f32 %v4933_v18, %v4932_v60  ;;  %v5046_v9 = vadd.f32 %v5045_v34, %v5044_v52 }
 0x37b   :  { %v4099_v40 = vadd.f32 %v5046_v9, %v4934_v42  ;;  %v4935_v27 = vpop.f32.mrf.mxu0  ;;  %v5047_v32 = vpop.f32.mrf.mxu1 }
 0x37d   :  { %4217 = vst [vmem:[#allocation13 + $0x18] sm:$0xff] %v4099_v40  ;;  %v4936_v20 = vpop.f32.mrf.mxu0  ;;  %v5048_v35 = vpop.f32.mrf.mxu1 }
 0x37e   :  { %v4937_v63 = vadd.f32 %v4936_v20, %v4935_v27  ;;  %v5049_v22 = vadd.f32 %v5048_v35, %v5047_v32 }
 0x37f   :  { %v4938_v16 = vpop.f32.mrf.mxu0  ;;  %v5050_v5 = vpop.f32.mrf.mxu1 }
 0x380   :  { %v4104_v54 = vadd.f32 %v5049_v22, %v4937_v63 }
 0x381   :  { %v4939_v51 = vpop.f32.mrf.mxu0  ;;  %v5051_v50 = vpop.f32.mrf.mxu1 }
 0x382   :  { %4218 = vst [vmem:[#allocation13 + $0x20] sm:$0xff] %v4104_v54  ;;  %v4940_v62 = vadd.f32 %v4939_v51, %v4938_v16  ;;  %v5052_v14 = vadd.f32 %v5051_v50, %v5050_v5 }
 0x384   :  { %v4107_v2 = vadd.f32 %v5052_v14, %v4940_v62 }
 0x386   :  { %4219 = vst [vmem:[#allocation13 + $0x28] sm:$0xff] %v4107_v2  ;;  %v4941_v0 = vpop.f32.mrf.mxu0  ;;  %v5053_v17 = vpop.f32.mrf.mxu1 }
 0x388   :  { %v4942_v36 = vpop.f32.mrf.mxu0  ;;  %v5054_v39 = vpop.f32.mrf.mxu1 }
 0x389   :  { %v4943_v43 = vadd.f32 %v4942_v36, %v4941_v0  ;;  %v5055_v10 = vadd.f32 %v5054_v39, %v5053_v17 }
 0x38a   :  { %v4944_v12 = vpop.f32.mrf.mxu0  ;;  %v5056_v24 = vpop.f32.mrf.mxu1 }
 0x38b   :  { %v4112_v38 = vadd.f32 %v5055_v10, %v4943_v43 }
 0x38c   :  { %v4945_v33 = vpop.f32.mrf.mxu0  ;;  %v5057_v56 = vpop.f32.mrf.mxu1 }
 0x38d   :  { %4220 = vst [vmem:[#allocation13 + $0x30] sm:$0xff] %v4112_v38  ;;  %v4946_v4 = vadd.f32 %v4945_v33, %v4944_v12  ;;  %v5058_v23 = vadd.f32 %v5057_v56, %v5056_v24 }
 0x38e   :  { %v4947_v8 = vpop.f32.mrf.mxu0  ;;  %v5059_v55 = vpop.f32.mrf.mxu1 }
 0x38f   :  { %v4115_v48 = vadd.f32 %v5058_v23, %v4946_v4 }
 0x390   :  { %v4948_v30 = vpop.f32.mrf.mxu0  ;;  %v5060_v28 = vpop.f32.mrf.mxu1 }
 0x391   :  { %4221 = vst [vmem:[#allocation13 + $0x38] sm:$0xff] %v4115_v48  ;;  %v4949_v44 = vadd.f32 %v4948_v30, %v4947_v8  ;;  %v5061_v47 = vadd.f32 %v5060_v28, %v5059_v55 }
 0x392   :  { %v4950_v29 = vpop.f32.mrf.mxu0  ;;  %v5062_v13 = vpop.f32.mrf.mxu1 }
 0x393   :  { %v4120_v58 = vadd.f32 %v5061_v47, %v4949_v44 }
 0x394   :  { %v4951_v61 = vpop.f32.mrf.mxu0  ;;  %v5063_v57 = vpop.f32.mrf.mxu1 }
 0x395   :  { %4222 = vst [vmem:[#allocation13 + $0x40] sm:$0xff] %v4120_v58  ;;  %v4952_v21 = vadd.f32 %v4951_v61, %v4950_v29  ;;  %v5064_v46 = vadd.f32 %v5063_v57, %v5062_v13 }
 0x397   :  { %v4953_v41 = vpop.f32.mrf.mxu0  ;;  %v5065_v31 = vpop.f32.mrf.mxu1  ;;  %v4123_v26 = vadd.f32 %v5064_v46, %v4952_v21 }
 0x399   :  { %v4954_v19 = vpop.f32.mrf.mxu0  ;;  %v5066_v15 = vpop.f32.mrf.mxu1  ;;  %4223 = vst [vmem:[#allocation13 + $0x48] sm:$0xff] %v4123_v26 }
 0x39a   :  { %v4955_v3 = vadd.f32 %v4954_v19, %v4953_v41  ;;  %v5067_v6 = vadd.f32 %v5066_v15, %v5065_v31 }
 0x39b   :  { %v4956_v1 = vpop.f32.mrf.mxu0  ;;  %v5068_v53 = vpop.f32.mrf.mxu1 }
 0x39c   :  { %v4128_v59 = vadd.f32 %v5067_v6, %v4955_v3 }
 0x39d   :  { %v4957_v45 = vpop.f32.mrf.mxu0  ;;  %v5069_v25 = vpop.f32.mrf.mxu1 }
 0x39e   :  { %4224 = vst [vmem:[#allocation13 + $0x50] sm:$0xff] %v4128_v59  ;;  %v4958_v37 = vadd.f32 %v4957_v45, %v4956_v1  ;;  %v5070_v7 = vadd.f32 %v5069_v25, %v5068_v53 }
 0x3a0   :  { %v4131_v11 = vadd.f32 %v5070_v7, %v4958_v37 }
 0x3a2   :  { %4225 = vst [vmem:[#allocation13 + $0x58] sm:$0xff] %v4131_v11  ;;  %v4959_v60 = vpop.f32.mrf.mxu0  ;;  %v5071_v52 = vpop.f32.mrf.mxu1 }
 0x3a4   :  { %v4960_v49 = vpop.f32.mrf.mxu0  ;;  %v5072_v18 = vpop.f32.mrf.mxu1 }
 0x3a5   :  { %v4961_v34 = vadd.f32 %v4960_v49, %v4959_v60  ;;  %v5073_v42 = vadd.f32 %v5072_v18, %v5071_v52 }
 0x3a6   :  { %v4962_v9 = vpop.f32.mrf.mxu0  ;;  %v5074_v40 = vpop.f32.mrf.mxu1 }
 0x3a7   :  { %v4136_v27 = vadd.f32 %v5073_v42, %v4961_v34 }
 0x3a8   :  { %v4963_v32 = vpop.f32.mrf.mxu0  ;;  %v5075_v20 = vpop.f32.mrf.mxu1 }
 0x3a9   :  { %4226 = vst [vmem:[#allocation13 + $0x60] sm:$0xff] %v4136_v27  ;;  %v4964_v35 = vadd.f32 %v4963_v32, %v4962_v9  ;;  %v5076_v63 = vadd.f32 %v5075_v20, %v5074_v40 }
 0x3ab   :  { %v4139_v22 = vadd.f32 %v5076_v63, %v4964_v35  ;;  %v4965_v16 = vpop.f32.mrf.mxu0  ;;  %v5077_v5 = vpop.f32.mrf.mxu1 }
 0x3ad   :  { %4227 = vst [vmem:[#allocation13 + $0x68] sm:$0xff] %v4139_v22  ;;  %v4966_v54 = vpop.f32.mrf.mxu0  ;;  %v5078_v51 = vpop.f32.mrf.mxu1 }
 0x3ae   :  { %v4967_v50 = vadd.f32 %v4966_v54, %v4965_v16  ;;  %v5079_v62 = vadd.f32 %v5078_v51, %v5077_v5 }
 0x3af   :  { %v4968_v14 = vpop.f32.mrf.mxu0  ;;  %v5080_v2 = vpop.f32.mrf.mxu1 }
 0x3b0   :  { %v4144_v0 = vadd.f32 %v5079_v62, %v4967_v50 }
 0x3b1   :  { %v4969_v17 = vpop.f32.mrf.mxu0  ;;  %v5081_v36 = vpop.f32.mrf.mxu1 }
 0x3b2   :  { %4228 = vst [vmem:[#allocation13 + $0x70] sm:$0xff] %v4144_v0  ;;  %v4970_v39 = vadd.f32 %v4969_v17, %v4968_v14  ;;  %v5082_v43 = vadd.f32 %v5081_v36, %v5080_v2 }
 0x3b4   :  { %v4147_v10 = vadd.f32 %v5082_v43, %v4970_v39  ;;  %v4971_v12 = vpop.f32.mrf.mxu0  ;;  %v5083_v24 = vpop.f32.mrf.mxu1 }
 0x3b6   :  { %4229 = vst [vmem:[#allocation13 + $0x78] sm:$0xff] %v4147_v10  ;;  %v4972_v38 = vpop.f32.mrf.mxu0  ;;  %v5084_v33 = vpop.f32.mrf.mxu1 }
 0x3b7   :  { %v4973_v56 = vadd.f32 %v4972_v38, %v4971_v12  ;;  %v5085_v4 = vadd.f32 %v5084_v33, %v5083_v24 }
 0x3b8   :  { %v4974_v23 = vpop.f32.mrf.mxu0  ;;  %v5086_v48 = vpop.f32.mrf.mxu1 }
 0x3b9   :  { %v4152_v8 = vadd.f32 %v5085_v4, %v4973_v56 }
 0x3ba   :  { %v4975_v55 = vpop.f32.mrf.mxu0  ;;  %v5087_v30 = vpop.f32.mrf.mxu1 }
 0x3bb   :  { %4230 = vst [vmem:[#allocation13 + $0x80] sm:$0xff] %v4152_v8  ;;  %v4976_v28 = vadd.f32 %v4975_v55, %v4974_v23  ;;  %v5088_v44 = vadd.f32 %v5087_v30, %v5086_v48 }
 0x3bd   :  { %v4155_v47 = vadd.f32 %v5088_v44, %v4976_v28 }
 0x3be   :  { %v4977_v29 = vpop.f32.mrf.mxu0  ;;  %v5089_v13 = vpop.f32.mrf.mxu1 }
 0x3bf   :  { %4231 = vst [vmem:[#allocation13 + $0x88] sm:$0xff] %v4155_v47 }
 0x3c0   :  { %v4978_v58 = vpop.f32.mrf.mxu0  ;;  %v5090_v61 = vpop.f32.mrf.mxu1 }
 0x3c1   :  { %v4979_v57 = vadd.f32 %v4978_v58, %v4977_v29  ;;  %v5091_v21 = vadd.f32 %v5090_v61, %v5089_v13 }
 0x3c2   :  { %v4980_v46 = vpop.f32.mrf.mxu0  ;;  %v5092_v41 = vpop.f32.mrf.mxu1 }
 0x3c3   :  { %v4160_v31 = vadd.f32 %v5091_v21, %v4979_v57 }
 0x3c4   :  { %v4981_v26 = vpop.f32.mrf.mxu0  ;;  %v5093_v19 = vpop.f32.mrf.mxu1 }
 0x3c5   :  { %4232 = vst [vmem:[#allocation13 + $0x90] sm:$0xff] %v4160_v31  ;;  %v4982_v15 = vadd.f32 %v4981_v26, %v4980_v46  ;;  %v5094_v3 = vadd.f32 %v5093_v19, %v5092_v41 }
 0x3c7   :  { %v4163_v6 = vadd.f32 %v5094_v3, %v4982_v15 }
 0x3c8   :  { %v4983_v1 = vpop.f32.mrf.mxu0  ;;  %v5095_v53 = vpop.f32.mrf.mxu1 }
 0x3c9   :  { %4233 = vst [vmem:[#allocation13 + $0x98] sm:$0xff] %v4163_v6 }
 0x3ca   :  { %v4984_v59 = vpop.f32.mrf.mxu0  ;;  %v5096_v45 = vpop.f32.mrf.mxu1 }
 0x3cb   :  { %v4985_v25 = vadd.f32 %v4984_v59, %v4983_v1  ;;  %v5097_v37 = vadd.f32 %v5096_v45, %v5095_v53 }
 0x3cc   :  { %v4986_v7 = vpop.f32.mrf.mxu0  ;;  %v5098_v11 = vpop.f32.mrf.mxu1 }
 0x3cd   :  { %v4168_v60 = vadd.f32 %v5097_v37, %v4985_v25 }
 0x3ce   :  { %v4987_v52 = vpop.f32.mrf.mxu0  ;;  %v5099_v49 = vpop.f32.mrf.mxu1 }
 0x3cf   :  { %4234 = vst [vmem:[#allocation13 + $0xa0] sm:$0xff] %v4168_v60  ;;  %v4988_v18 = vadd.f32 %v4987_v52, %v4986_v7  ;;  %v5100_v34 = vadd.f32 %v5099_v49, %v5098_v11 }
 0x3d1   :  { %v4171_v42 = vadd.f32 %v5100_v34, %v4988_v18  ;;  %v4989_v9 = vpop.f32.mrf.mxu0  ;;  %v5101_v40 = vpop.f32.mrf.mxu1 }
 0x3d3   :  { %4235 = vst [vmem:[#allocation13 + $0xa8] sm:$0xff] %v4171_v42  ;;  %v4990_v27 = vpop.f32.mrf.mxu0  ;;  %v5102_v32 = vpop.f32.mrf.mxu1 }
 0x3d4   :  { %v4991_v20 = vadd.f32 %v4990_v27, %v4989_v9  ;;  %v5103_v35 = vadd.f32 %v5102_v32, %v5101_v40 }
 0x3d5   :  { %v4992_v63 = vpop.f32.mrf.mxu0  ;;  %v5104_v22 = vpop.f32.mrf.mxu1 }
 0x3d6   :  { %v4176_v16 = vadd.f32 %v5103_v35, %v4991_v20 }
 0x3d7   :  { %v4993_v5 = vpop.f32.mrf.mxu0  ;;  %v5105_v54 = vpop.f32.mrf.mxu1 }
 0x3d8   :  { %4236 = vst [vmem:[#allocation13 + $0xb0] sm:$0xff] %v4176_v16  ;;  %v4994_v51 = vadd.f32 %v4993_v5, %v4992_v63  ;;  %v5106_v50 = vadd.f32 %v5105_v54, %v5104_v22 }
 0x3da   :  { %v4179_v62 = vadd.f32 %v5106_v50, %v4994_v51 }
 0x3dc   :  { %4237 = vst [vmem:[#allocation13 + $0xb8] sm:$0xff] %v4179_v62 }
 0x3df   :  { %v4995_v14 = vpop.f32.mrf.mxu0  ;;  %v5107_v2 = vpop.f32.mrf.mxu1 }
 0x3e1   :  { %v4996_v0 = vpop.f32.mrf.mxu0  ;;  %v5108_v17 = vpop.f32.mrf.mxu1 }
 0x3e2   :  { %v4997_v36 = vadd.f32 %v4996_v0, %v4995_v14  ;;  %v5109_v39 = vadd.f32 %v5108_v17, %v5107_v2 }
 0x3e3   :  { %v4998_v43 = vpop.f32.mrf.mxu0  ;;  %v5110_v10 = vpop.f32.mrf.mxu1 }
 0x3e4   :  { %v4184_v12 = vadd.f32 %v5109_v39, %v4997_v36 }
 0x3e5   :  { %v4999_v24 = vpop.f32.mrf.mxu0  ;;  %v5111_v38 = vpop.f32.mrf.mxu1 }
 0x3e6   :  { %4238 = vst [vmem:[#allocation13 + $0xc0] sm:$0xff] %v4184_v12  ;;  %v5000_v33 = vadd.f32 %v4999_v24, %v4998_v43  ;;  %v5112_v56 = vadd.f32 %v5111_v38, %v5110_v10 }
 0x3e8   :  { %v4187_v4 = vadd.f32 %v5112_v56, %v5000_v33 }
 0x3ea   :  { %4239 = vst [vmem:[#allocation13 + $0xc8] sm:$0xff] %v4187_v4 }
 0x3ec   :  { %v5001_v23 = vpop.f32.mrf.mxu0  ;;  %v5113_v48 = vpop.f32.mrf.mxu1 }
 0x3ee   :  { %v5002_v8 = vpop.f32.mrf.mxu0  ;;  %v5114_v55 = vpop.f32.mrf.mxu1 }
 0x3ef   :  { %v5003_v30 = vadd.f32 %v5002_v8, %v5001_v23  ;;  %v5115_v28 = vadd.f32 %v5114_v55, %v5113_v48 }
 0x3f0   :  { %v5004_v44 = vpop.f32.mrf.mxu0  ;;  %v5116_v47 = vpop.f32.mrf.mxu1 }
 0x3f1   :  { %v4192_v29 = vadd.f32 %v5115_v28, %v5003_v30 }
 0x3f2   :  { %v5005_v13 = vpop.f32.mrf.mxu0  ;;  %v5117_v58 = vpop.f32.mrf.mxu1 }
 0x3f3   :  { %4240 = vst [vmem:[#allocation13 + $0xd0] sm:$0xff] %v4192_v29  ;;  %v5006_v61 = vadd.f32 %v5005_v13, %v5004_v44  ;;  %v5118_v57 = vadd.f32 %v5117_v58, %v5116_v47 }
 0x3f4   :  { %v5007_v21 = vpop.f32.mrf.mxu0  ;;  %v5119_v46 = vpop.f32.mrf.mxu1 }
 0x3f5   :  { %v4195_v41 = vadd.f32 %v5118_v57, %v5006_v61 }
 0x3f6   :  { %v5008_v31 = vpop.f32.mrf.mxu0  ;;  %v5120_v26 = vpop.f32.mrf.mxu1 }
 0x3f7   :  { %4241 = vst [vmem:[#allocation13 + $0xd8] sm:$0xff] %v4195_v41  ;;  %v5009_v19 = vadd.f32 %v5008_v31, %v5007_v21  ;;  %v5121_v15 = vadd.f32 %v5120_v26, %v5119_v46 }
 0x3f8   :  { %v5010_v3 = vpop.f32.mrf.mxu0  ;;  %v5122_v6 = vpop.f32.mrf.mxu1 }
 0x3f9   :  { %v4200_v1 = vadd.f32 %v5121_v15, %v5009_v19 }
 0x3fa   :  { %v5011_v53 = vpop.f32.mrf.mxu0  ;;  %v5123_v59 = vpop.f32.mrf.mxu1 }
 0x3fb   :  { %4242 = vst [vmem:[#allocation13 + $0xe0] sm:$0xff] %v4200_v1  ;;  %v5012_v45 = vadd.f32 %v5011_v53, %v5010_v3  ;;  %v5124_v25 = vadd.f32 %v5123_v59, %v5122_v6 }
 0x3fc   :  { %v5013_v37 = vpop.f32.mrf.mxu0  ;;  %v5125_v7 = vpop.f32.mrf.mxu1 }
 0x3fd   :  { %v4203_v11 = vadd.f32 %v5124_v25, %v5012_v45 }
 0x3fe   :  { %v5014_v60 = vpop.f32.mrf.mxu0  ;;  %v5126_v52 = vpop.f32.mrf.mxu1 }
 0x3ff   :  { %4243 = vst [vmem:[#allocation13 + $0xe8] sm:$0xff] %v4203_v11  ;;  %v5015_v49 = vadd.f32 %v5014_v60, %v5013_v37  ;;  %v5127_v18 = vadd.f32 %v5126_v52, %v5125_v7 }
 0x400   :  { %v5016_v34 = vpop.f32.mrf.mxu0  ;;  %v5128_v42 = vpop.f32.mrf.mxu1 }
 0x401   :  { %v4208_v9 = vadd.f32 %v5127_v18, %v5015_v49 }
 0x402   :  { %v5017_v40 = vpop.f32.mrf.mxu0  ;;  %v5129_v27 = vpop.f32.mrf.mxu1 }
 0x403   :  { %4244 = vst [vmem:[#allocation13 + $0xf0] sm:$0xff] %v4208_v9  ;;  %v5018_v32 = vadd.f32 %v5017_v40, %v5016_v34  ;;  %v5130_v20 = vadd.f32 %v5129_v27, %v5128_v42 }
 0x405   :  { %v4211_v35 = vadd.f32 %v5130_v20, %v5018_v32 }
 0x407   :  { %4245 = vst [vmem:[#allocation13 + $0xf8] sm:$0xff] %v4211_v35 }
 0x408   :  { %5548 = shalt.err (!%p5545_p10)
}
 0x409   :  { %s5578_s20 = smov 128   ;;  %s5579_s21 = smov 8  }
 0x40a   :  { %4257 = dma.vmem_to_hbm [thread:$0]  %s4252_s18, 4096, %s7135_s5, [#allocation5], %s5578_s20, %s5578_s20, %s5579_s21  }
 0x40b   :  { %5565 = dma.done.wait [#allocation5], 4096  }
 0x40c   :  { %5566 = vsyncadd [#allocation5], 4294963200 }
 0x40d   :  { %4261 = vsyncpa [#allocation4], 1 }
 0x40e   :  { %4262 = vsyncpa [#allocation9], 1 }
 0x40f   :  { %4263 = vsyncpa [#allocation12], 1 }
 0x410   :  { %4264 = vsyncpa [#allocation5], 1 }
 0x411   :  { %4265 = vsyncpa [#allocation6], 1 }

</bundles_post_ra>
